<compile_context>
chip_gen: v7x
topology: tpu7x:2x2x1
jax: 0.10.0
libtpu: 0.0.40
codegen_flags: <defaults>
</compile_context>

<pallas_src>
import math

import numpy as np
import jax
import jax.numpy as jnp
from jax import lax
from jax.experimental import pallas as pl
from jax.experimental.pallas import tpu as pltpu

# ---------------- configuration (small, consistent with the module) ----------------
DIM = 32          # embedding channels C
H = W = 8         # input resolution
WINDOW = 4        # window size
NUM_HEADS = 2
DEPTH = 2         # two blocks -> exercises both W-MSA and SW-MSA (shifted) paths
MLP_RATIO = 2.0
BATCH = 2
EPS = 1e-5        # nn.LayerNorm default eps

L = H * W                                # tokens per image = 64
N_TOK = WINDOW * WINDOW                  # tokens per window = 16
NWH, NWW = H // WINDOW, W // WINDOW
NW = NWH * NWW                           # windows per image = 4
HIDDEN = int(DIM * MLP_RATIO)
HEAD_DIM = DIM // NUM_HEADS
SCALE = HEAD_DIM ** -0.5
NEG = -1e9                               # blocks cross-window attention in the fused scores


# ---------------------------- in-kernel helpers ---------------------------------------
def _gelu_exact(x):
    # nn.GELU default (erf-based, exact)
    return 0.5 * x * (1.0 + lax.erf(x * (1.0 / math.sqrt(2.0))))


def _layer_norm(x, g, b):
    mu = jnp.mean(x, axis=-1, keepdims=True)
    xc = x - mu
    var = jnp.mean(xc * xc, axis=-1, keepdims=True)
    return xc * lax.rsqrt(var + EPS) * g + b


# ---------------------------- the fused RSTB kernel ------------------------------------
def rstb_kernel(x_ref, bias_ref, wqkv_ref, wproj_ref, w1_ref, w2_ref, vec_ref, o_ref):
    """Whole RSTB (DEPTH Swin blocks + outer residual) for ONE image (grid step = image).

    x_ref    : (L, C)               this image's tokens
    bias_ref : (DEPTH, NH, L, L)    rel-pos bias + shift mask + cross-window -1e9,
                                    conjugated into original token order (encodes
                                    roll + window partition/reverse)
    wqkv_ref : (DEPTH, C, 3C)       (Q columns pre-scaled by head_dim**-0.5)
    wproj_ref: (DEPTH, C, C)
    w1_ref   : (DEPTH, C, HID)    w2_ref: (DEPTH, HID, C)
    vec_ref  : (DEPTH, 8, 3C)     rows: g1, be1, g2, be2, bqkv(scaled Q part), bproj, bfc1, bfc2
    """
    x_in = x_ref[...]                                           # (L, C)
    x = x_in

    for blk in range(DEPTH):                                    # fully unrolled (DEPTH=2)
        vec = vec_ref[blk]                                      # (8, 3C) packed vectors
        g1, be1 = vec[0:1, :DIM], vec[1:2, :DIM]
        g2, be2 = vec[2:3, :DIM], vec[3:4, :DIM]
        bqkv = vec[4:5, :]                                      # (1, 3C)
        bproj = vec[5:6, :DIM]                                  # (1, C)
        bfc1 = vec[6:7, :HIDDEN]                                # (1, HID)
        bfc2 = vec[7:8, :DIM]                                   # (1, C)

        # -------- (S)W-MSA: the window structure lives entirely in bias_ref --------
        xn = _layer_norm(x, g1, be1)                            # (L, C)
        qkv = jnp.dot(xn, wqkv_ref[blk],
                      preferred_element_type=jnp.float32) + bqkv  # (L, 3C)
        wproj = wproj_ref[blk]                                  # (C, C)

        attn = None
        for h in range(NUM_HEADS):
            lo = h * HEAD_DIM
            qh = qkv[:, lo:lo + HEAD_DIM]                       # (L, hd), already scaled
            kh = qkv[:, DIM + lo:DIM + lo + HEAD_DIM]
            vh = qkv[:, 2 * DIM + lo:2 * DIM + lo + HEAD_DIM]
            # q @ k^T over all tokens of this image (64x64 scores)
            s = lax.dot_general(qh, kh, (((1,), (1,)), ((), ())),
                                preferred_element_type=jnp.float32)
            s = s + bias_ref[blk, h]                            # rpb + shift mask + window mask
            m = jnp.max(s, axis=-1, keepdims=True)
            e = jnp.exp(s - m)
            p = e * pl.reciprocal(jnp.sum(e, axis=-1, keepdims=True), approx=True)
            oh = jnp.dot(p, vh, preferred_element_type=jnp.float32)   # (L, hd)
            # fold the head straight into the output projection (no lane concat)
            contrib = jnp.dot(oh, wproj[lo:lo + HEAD_DIM, :],
                              preferred_element_type=jnp.float32)      # (L, C)
            attn = contrib if attn is None else attn + contrib

        x = x + attn + bproj                                    # residual 1

        # ----------------------------- MLP -----------------------------------------
        xn2 = _layer_norm(x, g2, be2)
        hmid = _gelu_exact(jnp.dot(xn2, w1_ref[blk],
                                   preferred_element_type=jnp.float32) + bfc1)
        x = x + jnp.dot(hmid, w2_ref[blk],
                        preferred_element_type=jnp.float32) + bfc2      # residual 2

    o_ref[...] = x + x_in                                       # outer RSTB residual


# ---------------------------- pallas_call wrapper ---------------------------------------
def rstb_forward(x, packed):
    """x: (B, L, C). One pallas_call, gridded over the batch ('parallel' on dual-TC chips)."""
    b, l, c = x.shape
    x2 = x.reshape(b * l, c)

    def const_spec(shape):
        nd = len(shape)
        return pl.BlockSpec(shape, lambda i, _nd=nd: (0,) * _nd)   # weights stay resident

    per_img = pl.BlockSpec((l, c), lambda i: (i, 0))               # one image per grid step

    out = pl.pallas_call(
        rstb_kernel,
        out_shape=jax.ShapeDtypeStruct((b * l, c), jnp.float32),
        grid=(b,),
        in_specs=[
            per_img,
            const_spec(packed["bias"].shape),
            const_spec(packed["wqkv"].shape),
            const_spec(packed["wproj"].shape),
            const_spec(packed["w1"].shape),
            const_spec(packed["w2"].shape),
            const_spec(packed["vec"].shape),
        ],
        out_specs=per_img,
        compiler_params=pltpu.CompilerParams(dimension_semantics=("parallel",)),
    )(x2, packed["bias"], packed["wqkv"], packed["wproj"],
      packed["w1"], packed["w2"], packed["vec"])
    return out.reshape(b, l, c)


# ---------------------------- static windowing / mask / bias prep -----------------------
def calculate_mask(shift):
    """Shifted-window attention mask per window, (nW, N, N) with 0 / -100 (PyTorch semantics)."""
    if shift == 0:
        return np.zeros((NW, N_TOK, N_TOK), np.float32)
    img_mask = np.zeros((1, H, W, 1), np.float32)
    slices = (slice(0, -WINDOW), slice(-WINDOW, -shift), slice(-shift, None))
    cnt = 0
    for hs in slices:
        for ws in slices:
            img_mask[:, hs, ws, :] = cnt
            cnt += 1
    mw = img_mask.reshape(1, NWH, WINDOW, NWW, WINDOW, 1)
    mw = mw.transpose(0, 1, 3, 2, 4, 5).reshape(-1, N_TOK)
    am = mw[:, None, :] - mw[:, :, None]
    return np.where(am != 0, -100.0, 0.0).astype(np.float32)


def relative_position_index():
    coords = np.stack(np.meshgrid(np.arange(WINDOW), np.arange(WINDOW), indexing="ij"))
    cf = coords.reshape(2, -1)
    rel = cf[:, :, None] - cf[:, None, :]
    rel = rel.transpose(1, 2, 0).copy()
    rel[:, :, 0] += WINDOW - 1
    rel[:, :, 1] += WINDOW - 1
    rel[:, :, 0] *= 2 * WINDOW - 1
    return rel.sum(-1)  # (N, N) int


REL_IDX = relative_position_index()


def window_perm(shift):
    """perm[a] = original flat (h*W+w) token index sitting at window-order position a."""
    idx = np.arange(L).reshape(H, W)
    if shift > 0:
        idx = np.roll(idx, (-shift, -shift), axis=(0, 1))
    return idx.reshape(NWH, WINDOW, NWW, WINDOW).transpose(0, 2, 1, 3).reshape(-1)


def build_attn_bias(rpb, shift):
    """Fold roll + window partition + shift mask + relative-position bias into a single
    additive (NH, L, L) bias over ONE image's tokens in ORIGINAL (h*W+w) order."""
    mask = calculate_mask(shift)                               # (nW, N, N)
    static_w = np.full((L, L), NEG, np.float32)                # window-order layout
    for w in range(NW):
        r = w * N_TOK
        static_w[r:r + N_TOK, r:r + N_TOK] = mask[w]
    perm = window_perm(shift)
    inv = np.argsort(perm)                                     # original pos -> window-order pos
    static_o = static_w[np.ix_(inv, inv)]                      # conjugate to original order

    eye = jnp.eye(NW, dtype=jnp.float32)
    inv_j = jnp.asarray(inv)
    heads = []
    for h in range(NUM_HEADS):
        rpb_w = jnp.kron(eye, rpb[h])                          # block-diag rel-pos bias
        heads.append(rpb_w[inv_j, :][:, inv_j])
    return jnp.stack(heads) + jnp.asarray(static_o)[None]      # (NH, L, L)


# ---------------------------- parameters (deterministic init) ---------------------------
def init_block_params(key):
    ks = jax.random.split(key, 13)
    std = 0.02
    return {
        "g1": 1.0 + std * jax.random.normal(ks[0], (1, DIM), jnp.float32),
        "be1": std * jax.random.normal(ks[1], (1, DIM), jnp.float32),
        "wqkv": std * jax.random.normal(ks[2], (DIM, 3 * DIM), jnp.float32),
        "bqkv": std * jax.random.normal(ks[3], (1, 3 * DIM), jnp.float32),
        "wproj": std * jax.random.normal(ks[4], (DIM, DIM), jnp.float32),
        "bproj": std * jax.random.normal(ks[5], (1, DIM), jnp.float32),
        "rpb_table": std * jax.random.normal(
            ks[6], ((2 * WINDOW - 1) * (2 * WINDOW - 1), NUM_HEADS), jnp.float32),
        "g2": 1.0 + std * jax.random.normal(ks[7], (1, DIM), jnp.float32),
        "be2": std * jax.random.normal(ks[8], (1, DIM), jnp.float32),
        "w1": std * jax.random.normal(ks[9], (DIM, HIDDEN), jnp.float32),
        "b1": std * jax.random.normal(ks[10], (1, HIDDEN), jnp.float32),
        "w2": std * jax.random.normal(ks[11], (HIDDEN, DIM), jnp.float32),
        "b2": std * jax.random.normal(ks[12], (1, DIM), jnp.float32),
    }


def init_rstb_params(key):
    keys = jax.random.split(key, DEPTH)
    return [init_block_params(k) for k in keys]


def prepare_kernel_params(params):
    """One-time host prep: gather rel-pos bias, fold masks/windowing into the per-image
    attention bias, fold SCALE into the Q weights/bias, pack tiny vectors, and stack
    everything along a leading DEPTH axis."""
    q_col_scale = jnp.concatenate(
        [jnp.full((DIM,), SCALE, jnp.float32), jnp.ones((2 * DIM,), jnp.float32)])
    biases, wqkvs, wprojs, w1s, w2s, vecs = [], [], [], [], [], []
    for i, p in enumerate(params):
        shift = 0 if i % 2 == 0 else WINDOW // 2
        rpb = p["rpb_table"][REL_IDX.reshape(-1)].reshape(N_TOK, N_TOK, NUM_HEADS)
        rpb = jnp.transpose(rpb, (2, 0, 1))                    # (NH, N, N)
        biases.append(build_attn_bias(rpb, shift))
        wqkvs.append(p["wqkv"] * q_col_scale[None, :])         # fold head_dim**-0.5 into Q
        wprojs.append(p["wproj"])
        w1s.append(p["w1"])
        w2s.append(p["w2"])
        bqkv_scaled = p["bqkv"][0] * q_col_scale
        vec = jnp.zeros((8, 3 * DIM), jnp.float32)
        vec = vec.at[0, :DIM].set(p["g1"][0])
        vec = vec.at[1, :DIM].set(p["be1"][0])
        vec = vec.at[2, :DIM].set(p["g2"][0])
        vec = vec.at[3, :DIM].set(p["be2"][0])
        vec = vec.at[4, :].set(bqkv_scaled)
        vec = vec.at[5, :DIM].set(p["bproj"][0])
        vec = vec.at[6, :HIDDEN].set(p["b1"][0])
        vec = vec.at[7, :DIM].set(p["b2"][0])
        vecs.append(vec)
    return {
        "bias": jnp.stack(biases),     # (D, NH, L, L)  -- 64 KiB f32 total
        "wqkv": jnp.stack(wqkvs),      # (D, C, 3C)
        "wproj": jnp.stack(wprojs),    # (D, C, C)
        "w1": jnp.stack(w1s),          # (D, C, HID)
        "w2": jnp.stack(w2s),          # (D, HID, C)
        "vec": jnp.stack(vecs),        # (D, 8, 3C)
    }


# ---------------------------- plain-JAX reference (mirrors the PyTorch forward) ---------
def _ref_window_attention(xw, mask, rpb, p):
    bnw, n, c = xw.shape
    qkv = xw @ p["wqkv"] + p["bqkv"]
    qkv = qkv.reshape(bnw, n, 3, NUM_HEADS, HEAD_DIM).transpose(2, 0, 3, 1, 4)
    q, k, v = qkv[0], qkv[1], qkv[2]
    attn = (q * SCALE) @ jnp.swapaxes(k, -2, -1)
    attn = attn + rpb[None]
    attn = attn.reshape(BATCH, NW, NUM_HEADS, n, n) + mask[None, :, None]
    attn = jax.nn.softmax(attn.reshape(bnw, NUM_HEADS, n, n), axis=-1)
    out = jnp.swapaxes(attn @ v, 1, 2).reshape(bnw, n, c)
    return out @ p["wproj"] + p["bproj"]


def _ref_swin_block(x, p, shift, mask):
    b, l, c = x.shape
    shortcut = x
    xn = _layer_norm(x, p["g1"], p["be1"])
    xi = xn.reshape(b, H, W, c)
    if shift > 0:
        xi = jnp.roll(xi, (-shift, -shift), axis=(1, 2))
    xw = xi.reshape(b, NWH, WINDOW, NWW, WINDOW, c).transpose(0, 1, 3, 2, 4, 5)
    xw = xw.reshape(b * NW, N_TOK, c)
    rpb = p["rpb_table"][REL_IDX.reshape(-1)].reshape(N_TOK, N_TOK, NUM_HEADS)
    rpb = jnp.transpose(rpb, (2, 0, 1))
    aw = _ref_window_attention(xw, mask, rpb, p)
    aw = aw.reshape(b, NWH, NWW, WINDOW, WINDOW, c).transpose(0, 1, 3, 2, 4, 5)
    aw = aw.reshape(b, H, W, c)
    if shift > 0:
        aw = jnp.roll(aw, (shift, shift), axis=(1, 2))
    x = shortcut + aw.reshape(b, l, c)
    xn2 = _layer_norm(x, p["g2"], p["be2"])
    h1 = _gelu_exact(xn2 @ p["w1"] + p["b1"])
    return x + (h1 @ p["w2"] + p["b2"])


def rstb_reference(x, params):
    y = x
    for i in range(DEPTH):
        shift = 0 if i % 2 == 0 else WINDOW // 2
        y = _ref_swin_block(y, params[i], shift, jnp.asarray(calculate_mask(shift)))
    return y + x


# ---------------------------- main -------------------------------------------------------
if __name__ == "__main__":
    key = jax.random.PRNGKey(0)
    kx, kp = jax.random.split(key)
    x = jax.random.normal(kx, (BATCH, L, DIM), jnp.float32)
    params = init_rstb_params(kp)

    # one-time prep (outside the jitted forward): masks, rel-pos bias, windowing and the
    # q scale are folded into the kernel's bias / weight inputs.
    packed = prepare_kernel_params(params)

    out = jax.jit(rstb_forward)(x, packed)
    jax.block_until_ready(out)

    assert out.shape == (BATCH, L, DIM)
    assert bool(jnp.all(jnp.isfinite(out)))

    # correctness vs. a plain-JAX transcription of the PyTorch forward
    # (tolerance 5e-2 covers pl.reciprocal(approx=True); observed error ~1e-3)
    ref = jax.jit(rstb_reference)(x, params)
    assert bool(jnp.allclose(out, ref, rtol=5e-2, atol=5e-2)), \
        float(jnp.max(jnp.abs(out - ref)))

    print("KERNEL_OK")
</pallas_src>

<mosaic_0001>
module attributes {stable_mosaic.version = 11 : i64} {
  func.func @rstb_kernel(%arg0: i32, %arg1: memref<64x32xf32, #tpu.memory_space<vmem>>, %arg2: memref<2x2x64x64xf32, #tpu.memory_space<vmem>>, %arg3: memref<2x32x96xf32, #tpu.memory_space<vmem>>, %arg4: memref<2x32x32xf32, #tpu.memory_space<vmem>>, %arg5: memref<2x32x64xf32, #tpu.memory_space<vmem>>, %arg6: memref<2x64x32xf32, #tpu.memory_space<vmem>>, %arg7: memref<2x8x96xf32, #tpu.memory_space<vmem>>, %arg8: memref<64x32xf32, #tpu.memory_space<vmem>>) attributes {dimension_semantics = [#tpu.dimension_semantics<parallel>], iteration_bounds = array<i64: 2>, scalar_prefetch = 0 : i64, scratch_operands = 0 : i64, tpu.core_type = #tpu.core_type<tc>, window_params = [{transform_indices = @transform_0, window_bounds = array<i64: 64, 32>}, {pipeline_mode = #tpu.pipeline_mode<synchronous>, transform_indices = @transform_1, window_bounds = array<i64: 2, 2, 64, 64>}, {pipeline_mode = #tpu.pipeline_mode<synchronous>, transform_indices = @transform_2, window_bounds = array<i64: 2, 32, 96>}, {pipeline_mode = #tpu.pipeline_mode<synchronous>, transform_indices = @transform_3, window_bounds = array<i64: 2, 32, 32>}, {pipeline_mode = #tpu.pipeline_mode<synchronous>, transform_indices = @transform_4, window_bounds = array<i64: 2, 32, 64>}, {pipeline_mode = #tpu.pipeline_mode<synchronous>, transform_indices = @transform_5, window_bounds = array<i64: 2, 64, 32>}, {pipeline_mode = #tpu.pipeline_mode<synchronous>, transform_indices = @transform_6, window_bounds = array<i64: 2, 8, 96>}, {transform_indices = @transform_7, window_bounds = array<i64: 64, 32>}]} {
    %c0 = arith.constant 0 : index
    %c0_0 = arith.constant 0 : index
    %0 = vector.load %arg1[%c0, %c0_0] : memref<64x32xf32, #tpu.memory_space<vmem>>, vector<64x32xf32>
    %c0_1 = arith.constant 0 : index
    %c0_2 = arith.constant 0 : index
    %c0_3 = arith.constant 0 : index
    %1 = vector.load %arg7[%c0_1, %c0_2, %c0_3] : memref<2x8x96xf32, #tpu.memory_space<vmem>>, vector<1x8x96xf32>
    %2 = vector.shape_cast %1 : vector<1x8x96xf32> to vector<8x96xf32>
    %3 = vector.extract_strided_slice %2 {offsets = [0, 0], sizes = [1, 32], strides = [1, 1]} : vector<8x96xf32> to vector<1x32xf32>
    %4 = vector.extract_strided_slice %2 {offsets = [1, 0], sizes = [1, 32], strides = [1, 1]} : vector<8x96xf32> to vector<1x32xf32>
    %5 = vector.extract_strided_slice %2 {offsets = [2, 0], sizes = [1, 32], strides = [1, 1]} : vector<8x96xf32> to vector<1x32xf32>
    %6 = vector.extract_strided_slice %2 {offsets = [3, 0], sizes = [1, 32], strides = [1, 1]} : vector<8x96xf32> to vector<1x32xf32>
    %7 = vector.extract_strided_slice %2 {offsets = [4, 0], sizes = [1, 96], strides = [1, 1]} : vector<8x96xf32> to vector<1x96xf32>
    %8 = vector.extract_strided_slice %2 {offsets = [5, 0], sizes = [1, 32], strides = [1, 1]} : vector<8x96xf32> to vector<1x32xf32>
    %9 = vector.extract_strided_slice %2 {offsets = [6, 0], sizes = [1, 64], strides = [1, 1]} : vector<8x96xf32> to vector<1x64xf32>
    %10 = vector.extract_strided_slice %2 {offsets = [7, 0], sizes = [1, 32], strides = [1, 1]} : vector<8x96xf32> to vector<1x32xf32>
    %cst = arith.constant dense<0.000000e+00> : vector<64xf32>
    %11 = vector.multi_reduction <add>, %0, %cst [1] : vector<64x32xf32> to vector<64xf32>
    %12 = vector.shape_cast %11 : vector<64xf32> to vector<64x1xf32>
    %cst_4 = arith.constant 3.200000e+01 : f32
    %13 = vector.broadcast %cst_4 : f32 to vector<64x1xf32>
    %14 = arith.divf %12, %13 : vector<64x1xf32>
    %15 = vector.broadcast %14 : vector<64x1xf32> to vector<64x32xf32>
    %16 = arith.subf %0, %15 : vector<64x32xf32>
    %17 = arith.mulf %16, %16 : vector<64x32xf32>
    %cst_5 = arith.constant dense<0.000000e+00> : vector<64xf32>
    %18 = vector.multi_reduction <add>, %17, %cst_5 [1] : vector<64x32xf32> to vector<64xf32>
    %19 = vector.shape_cast %18 : vector<64xf32> to vector<64x1xf32>
    %cst_6 = arith.constant 3.200000e+01 : f32
    %20 = vector.broadcast %cst_6 : f32 to vector<64x1xf32>
    %21 = arith.divf %19, %20 : vector<64x1xf32>
    %cst_7 = arith.constant 9.99999974E-6 : f32
    %22 = vector.broadcast %cst_7 : f32 to vector<64x1xf32>
    %23 = arith.addf %21, %22 : vector<64x1xf32>
    %24 = math.rsqrt %23 : vector<64x1xf32>
    %25 = vector.broadcast %24 : vector<64x1xf32> to vector<64x32xf32>
    %26 = arith.mulf %16, %25 : vector<64x32xf32>
    %27 = vector.broadcast %3 : vector<1x32xf32> to vector<64x32xf32>
    %28 = arith.mulf %26, %27 : vector<64x32xf32>
    %29 = vector.broadcast %4 : vector<1x32xf32> to vector<64x32xf32>
    %30 = arith.addf %28, %29 : vector<64x32xf32>
    %c0_8 = arith.constant 0 : index
    %c0_9 = arith.constant 0 : index
    %c0_10 = arith.constant 0 : index
    %31 = vector.load %arg3[%c0_8, %c0_9, %c0_10] : memref<2x32x96xf32, #tpu.memory_space<vmem>>, vector<1x32x96xf32>
    %32 = vector.shape_cast %31 : vector<1x32x96xf32> to vector<32x96xf32>
    %cst_11 = arith.constant dense<0.000000e+00> : vector<64x96xf32>
    %33 = tpu.matmul %30, %32, %cst_11 {dimension_numbers = #tpu.dot_dimension_numbers<[1], [0], [0], [1], [0, 0, 1, 1], [], []>} : vector<64x32xf32>, vector<32x96xf32>, vector<64x96xf32> -> vector<64x96xf32>
    %34 = vector.broadcast %7 : vector<1x96xf32> to vector<64x96xf32>
    %35 = arith.addf %33, %34 : vector<64x96xf32>
    %c0_12 = arith.constant 0 : index
    %c0_13 = arith.constant 0 : index
    %c0_14 = arith.constant 0 : index
    %36 = vector.load %arg4[%c0_12, %c0_13, %c0_14] : memref<2x32x32xf32, #tpu.memory_space<vmem>>, vector<1x32x32xf32>
    %37 = vector.shape_cast %36 : vector<1x32x32xf32> to vector<32x32xf32>
    %38 = vector.extract_strided_slice %35 {offsets = [0, 0], sizes = [64, 16], strides = [1, 1]} : vector<64x96xf32> to vector<64x16xf32>
    %39 = vector.extract_strided_slice %35 {offsets = [0, 32], sizes = [64, 16], strides = [1, 1]} : vector<64x96xf32> to vector<64x16xf32>
    %40 = vector.extract_strided_slice %35 {offsets = [0, 64], sizes = [64, 16], strides = [1, 1]} : vector<64x96xf32> to vector<64x16xf32>
    %cst_15 = arith.constant dense<0.000000e+00> : vector<64x64xf32>
    %41 = tpu.matmul %38, %39, %cst_15 {dimension_numbers = #tpu.dot_dimension_numbers<[1], [1], [0], [0], [0, 0, 1, 0], [], []>} : vector<64x16xf32>, vector<64x16xf32>, vector<64x64xf32> -> vector<64x64xf32>
    %c0_16 = arith.constant 0 : index
    %c0_17 = arith.constant 0 : index
    %c0_18 = arith.constant 0 : index
    %c0_19 = arith.constant 0 : index
    %42 = vector.load %arg2[%c0_16, %c0_17, %c0_18, %c0_19] : memref<2x2x64x64xf32, #tpu.memory_space<vmem>>, vector<1x1x64x64xf32>
    %43 = vector.shape_cast %42 : vector<1x1x64x64xf32> to vector<64x64xf32>
    %44 = arith.addf %41, %43 : vector<64x64xf32>
    %cst_20 = arith.constant dense<0xFF800000> : vector<64xf32>
    %45 = vector.multi_reduction <maximumf>, %44, %cst_20 [1] : vector<64x64xf32> to vector<64xf32>
    %46 = vector.shape_cast %45 : vector<64xf32> to vector<64x1xf32>
    %47 = vector.broadcast %46 : vector<64x1xf32> to vector<64x64xf32>
    %48 = arith.subf %44, %47 : vector<64x64xf32>
    %49 = math.exp %48 : vector<64x64xf32>
    %cst_21 = arith.constant dense<0.000000e+00> : vector<64xf32>
    %50 = vector.multi_reduction <add>, %49, %cst_21 [1] : vector<64x64xf32> to vector<64xf32>
    %51 = vector.shape_cast %50 : vector<64xf32> to vector<64x1xf32>
    %52 = tpu.reciprocal %51 {approx = true} : vector<64x1xf32> -> vector<64x1xf32>
    %53 = vector.broadcast %52 : vector<64x1xf32> to vector<64x64xf32>
    %54 = arith.mulf %49, %53 : vector<64x64xf32>
    %cst_22 = arith.constant dense<0.000000e+00> : vector<64x16xf32>
    %55 = tpu.matmul %54, %40, %cst_22 {dimension_numbers = #tpu.dot_dimension_numbers<[1], [0], [0], [1], [0, 0, 1, 1], [], []>} : vector<64x64xf32>, vector<64x16xf32>, vector<64x16xf32> -> vector<64x16xf32>
    %56 = vector.extract_strided_slice %37 {offsets = [0, 0], sizes = [16, 32], strides = [1, 1]} : vector<32x32xf32> to vector<16x32xf32>
    %cst_23 = arith.constant dense<0.000000e+00> : vector<64x32xf32>
    %57 = tpu.matmul %55, %56, %cst_23 {dimension_numbers = #tpu.dot_dimension_numbers<[1], [0], [0], [1], [0, 0, 1, 1], [], []>} : vector<64x16xf32>, vector<16x32xf32>, vector<64x32xf32> -> vector<64x32xf32>
    %58 = vector.extract_strided_slice %35 {offsets = [0, 16], sizes = [64, 16], strides = [1, 1]} : vector<64x96xf32> to vector<64x16xf32>
    %59 = vector.extract_strided_slice %35 {offsets = [0, 48], sizes = [64, 16], strides = [1, 1]} : vector<64x96xf32> to vector<64x16xf32>
    %60 = vector.extract_strided_slice %35 {offsets = [0, 80], sizes = [64, 16], strides = [1, 1]} : vector<64x96xf32> to vector<64x16xf32>
    %cst_24 = arith.constant dense<0.000000e+00> : vector<64x64xf32>
    %61 = tpu.matmul %58, %59, %cst_24 {dimension_numbers = #tpu.dot_dimension_numbers<[1], [1], [0], [0], [0, 0, 1, 0], [], []>} : vector<64x16xf32>, vector<64x16xf32>, vector<64x64xf32> -> vector<64x64xf32>
    %c0_25 = arith.constant 0 : index
    %c1 = arith.constant 1 : index
    %c0_26 = arith.constant 0 : index
    %c0_27 = arith.constant 0 : index
    %62 = vector.load %arg2[%c0_25, %c1, %c0_26, %c0_27] : memref<2x2x64x64xf32, #tpu.memory_space<vmem>>, vector<1x1x64x64xf32>
    %63 = vector.shape_cast %62 : vector<1x1x64x64xf32> to vector<64x64xf32>
    %64 = arith.addf %61, %63 : vector<64x64xf32>
    %cst_28 = arith.constant dense<0xFF800000> : vector<64xf32>
    %65 = vector.multi_reduction <maximumf>, %64, %cst_28 [1] : vector<64x64xf32> to vector<64xf32>
    %66 = vector.shape_cast %65 : vector<64xf32> to vector<64x1xf32>
    %67 = vector.broadcast %66 : vector<64x1xf32> to vector<64x64xf32>
    %68 = arith.subf %64, %67 : vector<64x64xf32>
    %69 = math.exp %68 : vector<64x64xf32>
    %cst_29 = arith.constant dense<0.000000e+00> : vector<64xf32>
    %70 = vector.multi_reduction <add>, %69, %cst_29 [1] : vector<64x64xf32> to vector<64xf32>
    %71 = vector.shape_cast %70 : vector<64xf32> to vector<64x1xf32>
    %72 = tpu.reciprocal %71 {approx = true} : vector<64x1xf32> -> vector<64x1xf32>
    %73 = vector.broadcast %72 : vector<64x1xf32> to vector<64x64xf32>
    %74 = arith.mulf %69, %73 : vector<64x64xf32>
    %cst_30 = arith.constant dense<0.000000e+00> : vector<64x16xf32>
    %75 = tpu.matmul %74, %60, %cst_30 {dimension_numbers = #tpu.dot_dimension_numbers<[1], [0], [0], [1], [0, 0, 1, 1], [], []>} : vector<64x64xf32>, vector<64x16xf32>, vector<64x16xf32> -> vector<64x16xf32>
    %76 = vector.extract_strided_slice %37 {offsets = [16, 0], sizes = [16, 32], strides = [1, 1]} : vector<32x32xf32> to vector<16x32xf32>
    %cst_31 = arith.constant dense<0.000000e+00> : vector<64x32xf32>
    %77 = tpu.matmul %75, %76, %cst_31 {dimension_numbers = #tpu.dot_dimension_numbers<[1], [0], [0], [1], [0, 0, 1, 1], [], []>} : vector<64x16xf32>, vector<16x32xf32>, vector<64x32xf32> -> vector<64x32xf32>
    %78 = arith.addf %57, %77 : vector<64x32xf32>
    %79 = arith.addf %0, %78 : vector<64x32xf32>
    %80 = vector.broadcast %8 : vector<1x32xf32> to vector<64x32xf32>
    %81 = arith.addf %79, %80 : vector<64x32xf32>
    %cst_32 = arith.constant dense<0.000000e+00> : vector<64xf32>
    %82 = vector.multi_reduction <add>, %81, %cst_32 [1] : vector<64x32xf32> to vector<64xf32>
    %83 = vector.shape_cast %82 : vector<64xf32> to vector<64x1xf32>
    %cst_33 = arith.constant 3.200000e+01 : f32
    %84 = vector.broadcast %cst_33 : f32 to vector<64x1xf32>
    %85 = arith.divf %83, %84 : vector<64x1xf32>
    %86 = vector.broadcast %85 : vector<64x1xf32> to vector<64x32xf32>
    %87 = arith.subf %81, %86 : vector<64x32xf32>
    %88 = arith.mulf %87, %87 : vector<64x32xf32>
    %cst_34 = arith.constant dense<0.000000e+00> : vector<64xf32>
    %89 = vector.multi_reduction <add>, %88, %cst_34 [1] : vector<64x32xf32> to vector<64xf32>
    %90 = vector.shape_cast %89 : vector<64xf32> to vector<64x1xf32>
    %cst_35 = arith.constant 3.200000e+01 : f32
    %91 = vector.broadcast %cst_35 : f32 to vector<64x1xf32>
    %92 = arith.divf %90, %91 : vector<64x1xf32>
    %cst_36 = arith.constant 9.99999974E-6 : f32
    %93 = vector.broadcast %cst_36 : f32 to vector<64x1xf32>
    %94 = arith.addf %92, %93 : vector<64x1xf32>
    %95 = math.rsqrt %94 : vector<64x1xf32>
    %96 = vector.broadcast %95 : vector<64x1xf32> to vector<64x32xf32>
    %97 = arith.mulf %87, %96 : vector<64x32xf32>
    %98 = vector.broadcast %5 : vector<1x32xf32> to vector<64x32xf32>
    %99 = arith.mulf %97, %98 : vector<64x32xf32>
    %100 = vector.broadcast %6 : vector<1x32xf32> to vector<64x32xf32>
    %101 = arith.addf %99, %100 : vector<64x32xf32>
    %c0_37 = arith.constant 0 : index
    %c0_38 = arith.constant 0 : index
    %c0_39 = arith.constant 0 : index
    %102 = vector.load %arg5[%c0_37, %c0_38, %c0_39] : memref<2x32x64xf32, #tpu.memory_space<vmem>>, vector<1x32x64xf32>
    %103 = vector.shape_cast %102 : vector<1x32x64xf32> to vector<32x64xf32>
    %cst_40 = arith.constant dense<0.000000e+00> : vector<64x64xf32>
    %104 = tpu.matmul %101, %103, %cst_40 {dimension_numbers = #tpu.dot_dimension_numbers<[1], [0], [0], [1], [0, 0, 1, 1], [], []>} : vector<64x32xf32>, vector<32x64xf32>, vector<64x64xf32> -> vector<64x64xf32>
    %105 = vector.broadcast %9 : vector<1x64xf32> to vector<64x64xf32>
    %106 = arith.addf %104, %105 : vector<64x64xf32>
    %cst_41 = arith.constant 5.000000e-01 : f32
    %107 = vector.broadcast %cst_41 : f32 to vector<64x64xf32>
    %108 = arith.mulf %107, %106 : vector<64x64xf32>
    %cst_42 = arith.constant 0.707106769 : f32
    %109 = vector.broadcast %cst_42 : f32 to vector<64x64xf32>
    %110 = arith.mulf %106, %109 : vector<64x64xf32>
    %111 = math.erf %110 : vector<64x64xf32>
    %cst_43 = arith.constant 1.000000e+00 : f32
    %112 = vector.broadcast %cst_43 : f32 to vector<64x64xf32>
    %113 = arith.addf %112, %111 : vector<64x64xf32>
    %114 = arith.mulf %108, %113 : vector<64x64xf32>
    %c0_44 = arith.constant 0 : index
    %c0_45 = arith.constant 0 : index
    %c0_46 = arith.constant 0 : index
    %115 = vector.load %arg6[%c0_44, %c0_45, %c0_46] : memref<2x64x32xf32, #tpu.memory_space<vmem>>, vector<1x64x32xf32>
    %116 = vector.shape_cast %115 : vector<1x64x32xf32> to vector<64x32xf32>
    %cst_47 = arith.constant dense<0.000000e+00> : vector<64x32xf32>
    %117 = tpu.matmul %114, %116, %cst_47 {dimension_numbers = #tpu.dot_dimension_numbers<[1], [0], [0], [1], [0, 0, 1, 1], [], []>} : vector<64x64xf32>, vector<64x32xf32>, vector<64x32xf32> -> vector<64x32xf32>
    %118 = arith.addf %81, %117 : vector<64x32xf32>
    %119 = vector.broadcast %10 : vector<1x32xf32> to vector<64x32xf32>
    %120 = arith.addf %118, %119 : vector<64x32xf32>
    %c1_48 = arith.constant 1 : index
    %c0_49 = arith.constant 0 : index
    %c0_50 = arith.constant 0 : index
    %121 = vector.load %arg7[%c1_48, %c0_49, %c0_50] : memref<2x8x96xf32, #tpu.memory_space<vmem>>, vector<1x8x96xf32>
    %122 = vector.shape_cast %121 : vector<1x8x96xf32> to vector<8x96xf32>
    %123 = vector.extract_strided_slice %122 {offsets = [0, 0], sizes = [1, 32], strides = [1, 1]} : vector<8x96xf32> to vector<1x32xf32>
    %124 = vector.extract_strided_slice %122 {offsets = [1, 0], sizes = [1, 32], strides = [1, 1]} : vector<8x96xf32> to vector<1x32xf32>
    %125 = vector.extract_strided_slice %122 {offsets = [2, 0], sizes = [1, 32], strides = [1, 1]} : vector<8x96xf32> to vector<1x32xf32>
    %126 = vector.extract_strided_slice %122 {offsets = [3, 0], sizes = [1, 32], strides = [1, 1]} : vector<8x96xf32> to vector<1x32xf32>
    %127 = vector.extract_strided_slice %122 {offsets = [4, 0], sizes = [1, 96], strides = [1, 1]} : vector<8x96xf32> to vector<1x96xf32>
    %128 = vector.extract_strided_slice %122 {offsets = [5, 0], sizes = [1, 32], strides = [1, 1]} : vector<8x96xf32> to vector<1x32xf32>
    %129 = vector.extract_strided_slice %122 {offsets = [6, 0], sizes = [1, 64], strides = [1, 1]} : vector<8x96xf32> to vector<1x64xf32>
    %130 = vector.extract_strided_slice %122 {offsets = [7, 0], sizes = [1, 32], strides = [1, 1]} : vector<8x96xf32> to vector<1x32xf32>
    %cst_51 = arith.constant dense<0.000000e+00> : vector<64xf32>
    %131 = vector.multi_reduction <add>, %120, %cst_51 [1] : vector<64x32xf32> to vector<64xf32>
    %132 = vector.shape_cast %131 : vector<64xf32> to vector<64x1xf32>
    %cst_52 = arith.constant 3.200000e+01 : f32
    %133 = vector.broadcast %cst_52 : f32 to vector<64x1xf32>
    %134 = arith.divf %132, %133 : vector<64x1xf32>
    %135 = vector.broadcast %134 : vector<64x1xf32> to vector<64x32xf32>
    %136 = arith.subf %120, %135 : vector<64x32xf32>
    %137 = arith.mulf %136, %136 : vector<64x32xf32>
    %cst_53 = arith.constant dense<0.000000e+00> : vector<64xf32>
    %138 = vector.multi_reduction <add>, %137, %cst_53 [1] : vector<64x32xf32> to vector<64xf32>
    %139 = vector.shape_cast %138 : vector<64xf32> to vector<64x1xf32>
    %cst_54 = arith.constant 3.200000e+01 : f32
    %140 = vector.broadcast %cst_54 : f32 to vector<64x1xf32>
    %141 = arith.divf %139, %140 : vector<64x1xf32>
    %cst_55 = arith.constant 9.99999974E-6 : f32
    %142 = vector.broadcast %cst_55 : f32 to vector<64x1xf32>
    %143 = arith.addf %141, %142 : vector<64x1xf32>
    %144 = math.rsqrt %143 : vector<64x1xf32>
    %145 = vector.broadcast %144 : vector<64x1xf32> to vector<64x32xf32>
    %146 = arith.mulf %136, %145 : vector<64x32xf32>
    %147 = vector.broadcast %123 : vector<1x32xf32> to vector<64x32xf32>
    %148 = arith.mulf %146, %147 : vector<64x32xf32>
    %149 = vector.broadcast %124 : vector<1x32xf32> to vector<64x32xf32>
    %150 = arith.addf %148, %149 : vector<64x32xf32>
    %c1_56 = arith.constant 1 : index
    %c0_57 = arith.constant 0 : index
    %c0_58 = arith.constant 0 : index
    %151 = vector.load %arg3[%c1_56, %c0_57, %c0_58] : memref<2x32x96xf32, #tpu.memory_space<vmem>>, vector<1x32x96xf32>
    %152 = vector.shape_cast %151 : vector<1x32x96xf32> to vector<32x96xf32>
    %cst_59 = arith.constant dense<0.000000e+00> : vector<64x96xf32>
    %153 = tpu.matmul %150, %152, %cst_59 {dimension_numbers = #tpu.dot_dimension_numbers<[1], [0], [0], [1], [0, 0, 1, 1], [], []>} : vector<64x32xf32>, vector<32x96xf32>, vector<64x96xf32> -> vector<64x96xf32>
    %154 = vector.broadcast %127 : vector<1x96xf32> to vector<64x96xf32>
    %155 = arith.addf %153, %154 : vector<64x96xf32>
    %c1_60 = arith.constant 1 : index
    %c0_61 = arith.constant 0 : index
    %c0_62 = arith.constant 0 : index
    %156 = vector.load %arg4[%c1_60, %c0_61, %c0_62] : memref<2x32x32xf32, #tpu.memory_space<vmem>>, vector<1x32x32xf32>
    %157 = vector.shape_cast %156 : vector<1x32x32xf32> to vector<32x32xf32>
    %158 = vector.extract_strided_slice %155 {offsets = [0, 0], sizes = [64, 16], strides = [1, 1]} : vector<64x96xf32> to vector<64x16xf32>
    %159 = vector.extract_strided_slice %155 {offsets = [0, 32], sizes = [64, 16], strides = [1, 1]} : vector<64x96xf32> to vector<64x16xf32>
    %160 = vector.extract_strided_slice %155 {offsets = [0, 64], sizes = [64, 16], strides = [1, 1]} : vector<64x96xf32> to vector<64x16xf32>
    %cst_63 = arith.constant dense<0.000000e+00> : vector<64x64xf32>
    %161 = tpu.matmul %158, %159, %cst_63 {dimension_numbers = #tpu.dot_dimension_numbers<[1], [1], [0], [0], [0, 0, 1, 0], [], []>} : vector<64x16xf32>, vector<64x16xf32>, vector<64x64xf32> -> vector<64x64xf32>
    %c1_64 = arith.constant 1 : index
    %c0_65 = arith.constant 0 : index
    %c0_66 = arith.constant 0 : index
    %c0_67 = arith.constant 0 : index
    %162 = vector.load %arg2[%c1_64, %c0_65, %c0_66, %c0_67] : memref<2x2x64x64xf32, #tpu.memory_space<vmem>>, vector<1x1x64x64xf32>
    %163 = vector.shape_cast %162 : vector<1x1x64x64xf32> to vector<64x64xf32>
    %164 = arith.addf %161, %163 : vector<64x64xf32>
    %cst_68 = arith.constant dense<0xFF800000> : vector<64xf32>
    %165 = vector.multi_reduction <maximumf>, %164, %cst_68 [1] : vector<64x64xf32> to vector<64xf32>
    %166 = vector.shape_cast %165 : vector<64xf32> to vector<64x1xf32>
    %167 = vector.broadcast %166 : vector<64x1xf32> to vector<64x64xf32>
    %168 = arith.subf %164, %167 : vector<64x64xf32>
    %169 = math.exp %168 : vector<64x64xf32>
    %cst_69 = arith.constant dense<0.000000e+00> : vector<64xf32>
    %170 = vector.multi_reduction <add>, %169, %cst_69 [1] : vector<64x64xf32> to vector<64xf32>
    %171 = vector.shape_cast %170 : vector<64xf32> to vector<64x1xf32>
    %172 = tpu.reciprocal %171 {approx = true} : vector<64x1xf32> -> vector<64x1xf32>
    %173 = vector.broadcast %172 : vector<64x1xf32> to vector<64x64xf32>
    %174 = arith.mulf %169, %173 : vector<64x64xf32>
    %cst_70 = arith.constant dense<0.000000e+00> : vector<64x16xf32>
    %175 = tpu.matmul %174, %160, %cst_70 {dimension_numbers = #tpu.dot_dimension_numbers<[1], [0], [0], [1], [0, 0, 1, 1], [], []>} : vector<64x64xf32>, vector<64x16xf32>, vector<64x16xf32> -> vector<64x16xf32>
    %176 = vector.extract_strided_slice %157 {offsets = [0, 0], sizes = [16, 32], strides = [1, 1]} : vector<32x32xf32> to vector<16x32xf32>
    %cst_71 = arith.constant dense<0.000000e+00> : vector<64x32xf32>
    %177 = tpu.matmul %175, %176, %cst_71 {dimension_numbers = #tpu.dot_dimension_numbers<[1], [0], [0], [1], [0, 0, 1, 1], [], []>} : vector<64x16xf32>, vector<16x32xf32>, vector<64x32xf32> -> vector<64x32xf32>
    %178 = vector.extract_strided_slice %155 {offsets = [0, 16], sizes = [64, 16], strides = [1, 1]} : vector<64x96xf32> to vector<64x16xf32>
    %179 = vector.extract_strided_slice %155 {offsets = [0, 48], sizes = [64, 16], strides = [1, 1]} : vector<64x96xf32> to vector<64x16xf32>
    %180 = vector.extract_strided_slice %155 {offsets = [0, 80], sizes = [64, 16], strides = [1, 1]} : vector<64x96xf32> to vector<64x16xf32>
    %cst_72 = arith.constant dense<0.000000e+00> : vector<64x64xf32>
    %181 = tpu.matmul %178, %179, %cst_72 {dimension_numbers = #tpu.dot_dimension_numbers<[1], [1], [0], [0], [0, 0, 1, 0], [], []>} : vector<64x16xf32>, vector<64x16xf32>, vector<64x64xf32> -> vector<64x64xf32>
    %c1_73 = arith.constant 1 : index
    %c1_74 = arith.constant 1 : index
    %c0_75 = arith.constant 0 : index
    %c0_76 = arith.constant 0 : index
    %182 = vector.load %arg2[%c1_73, %c1_74, %c0_75, %c0_76] : memref<2x2x64x64xf32, #tpu.memory_space<vmem>>, vector<1x1x64x64xf32>
    %183 = vector.shape_cast %182 : vector<1x1x64x64xf32> to vector<64x64xf32>
    %184 = arith.addf %181, %183 : vector<64x64xf32>
    %cst_77 = arith.constant dense<0xFF800000> : vector<64xf32>
    %185 = vector.multi_reduction <maximumf>, %184, %cst_77 [1] : vector<64x64xf32> to vector<64xf32>
    %186 = vector.shape_cast %185 : vector<64xf32> to vector<64x1xf32>
    %187 = vector.broadcast %186 : vector<64x1xf32> to vector<64x64xf32>
    %188 = arith.subf %184, %187 : vector<64x64xf32>
    %189 = math.exp %188 : vector<64x64xf32>
    %cst_78 = arith.constant dense<0.000000e+00> : vector<64xf32>
    %190 = vector.multi_reduction <add>, %189, %cst_78 [1] : vector<64x64xf32> to vector<64xf32>
    %191 = vector.shape_cast %190 : vector<64xf32> to vector<64x1xf32>
    %192 = tpu.reciprocal %191 {approx = true} : vector<64x1xf32> -> vector<64x1xf32>
    %193 = vector.broadcast %192 : vector<64x1xf32> to vector<64x64xf32>
    %194 = arith.mulf %189, %193 : vector<64x64xf32>
    %cst_79 = arith.constant dense<0.000000e+00> : vector<64x16xf32>
    %195 = tpu.matmul %194, %180, %cst_79 {dimension_numbers = #tpu.dot_dimension_numbers<[1], [0], [0], [1], [0, 0, 1, 1], [], []>} : vector<64x64xf32>, vector<64x16xf32>, vector<64x16xf32> -> vector<64x16xf32>
    %196 = vector.extract_strided_slice %157 {offsets = [16, 0], sizes = [16, 32], strides = [1, 1]} : vector<32x32xf32> to vector<16x32xf32>
    %cst_80 = arith.constant dense<0.000000e+00> : vector<64x32xf32>
    %197 = tpu.matmul %195, %196, %cst_80 {dimension_numbers = #tpu.dot_dimension_numbers<[1], [0], [0], [1], [0, 0, 1, 1], [], []>} : vector<64x16xf32>, vector<16x32xf32>, vector<64x32xf32> -> vector<64x32xf32>
    %198 = arith.addf %177, %197 : vector<64x32xf32>
    %199 = arith.addf %120, %198 : vector<64x32xf32>
    %200 = vector.broadcast %128 : vector<1x32xf32> to vector<64x32xf32>
    %201 = arith.addf %199, %200 : vector<64x32xf32>
    %cst_81 = arith.constant dense<0.000000e+00> : vector<64xf32>
    %202 = vector.multi_reduction <add>, %201, %cst_81 [1] : vector<64x32xf32> to vector<64xf32>
    %203 = vector.shape_cast %202 : vector<64xf32> to vector<64x1xf32>
    %cst_82 = arith.constant 3.200000e+01 : f32
    %204 = vector.broadcast %cst_82 : f32 to vector<64x1xf32>
    %205 = arith.divf %203, %204 : vector<64x1xf32>
    %206 = vector.broadcast %205 : vector<64x1xf32> to vector<64x32xf32>
    %207 = arith.subf %201, %206 : vector<64x32xf32>
    %208 = arith.mulf %207, %207 : vector<64x32xf32>
    %cst_83 = arith.constant dense<0.000000e+00> : vector<64xf32>
    %209 = vector.multi_reduction <add>, %208, %cst_83 [1] : vector<64x32xf32> to vector<64xf32>
    %210 = vector.shape_cast %209 : vector<64xf32> to vector<64x1xf32>
    %cst_84 = arith.constant 3.200000e+01 : f32
    %211 = vector.broadcast %cst_84 : f32 to vector<64x1xf32>
    %212 = arith.divf %210, %211 : vector<64x1xf32>
    %cst_85 = arith.constant 9.99999974E-6 : f32
    %213 = vector.broadcast %cst_85 : f32 to vector<64x1xf32>
    %214 = arith.addf %212, %213 : vector<64x1xf32>
    %215 = math.rsqrt %214 : vector<64x1xf32>
    %216 = vector.broadcast %215 : vector<64x1xf32> to vector<64x32xf32>
    %217 = arith.mulf %207, %216 : vector<64x32xf32>
    %218 = vector.broadcast %125 : vector<1x32xf32> to vector<64x32xf32>
    %219 = arith.mulf %217, %218 : vector<64x32xf32>
    %220 = vector.broadcast %126 : vector<1x32xf32> to vector<64x32xf32>
    %221 = arith.addf %219, %220 : vector<64x32xf32>
    %c1_86 = arith.constant 1 : index
    %c0_87 = arith.constant 0 : index
    %c0_88 = arith.constant 0 : index
    %222 = vector.load %arg5[%c1_86, %c0_87, %c0_88] : memref<2x32x64xf32, #tpu.memory_space<vmem>>, vector<1x32x64xf32>
    %223 = vector.shape_cast %222 : vector<1x32x64xf32> to vector<32x64xf32>
    %cst_89 = arith.constant dense<0.000000e+00> : vector<64x64xf32>
    %224 = tpu.matmul %221, %223, %cst_89 {dimension_numbers = #tpu.dot_dimension_numbers<[1], [0], [0], [1], [0, 0, 1, 1], [], []>} : vector<64x32xf32>, vector<32x64xf32>, vector<64x64xf32> -> vector<64x64xf32>
    %225 = vector.broadcast %129 : vector<1x64xf32> to vector<64x64xf32>
    %226 = arith.addf %224, %225 : vector<64x64xf32>
    %cst_90 = arith.constant 5.000000e-01 : f32
    %227 = vector.broadcast %cst_90 : f32 to vector<64x64xf32>
    %228 = arith.mulf %227, %226 : vector<64x64xf32>
    %cst_91 = arith.constant 0.707106769 : f32
    %229 = vector.broadcast %cst_91 : f32 to vector<64x64xf32>
    %230 = arith.mulf %226, %229 : vector<64x64xf32>
    %231 = math.erf %230 : vector<64x64xf32>
    %cst_92 = arith.constant 1.000000e+00 : f32
    %232 = vector.broadcast %cst_92 : f32 to vector<64x64xf32>
    %233 = arith.addf %232, %231 : vector<64x64xf32>
    %234 = arith.mulf %228, %233 : vector<64x64xf32>
    %c1_93 = arith.constant 1 : index
    %c0_94 = arith.constant 0 : index
    %c0_95 = arith.constant 0 : index
    %235 = vector.load %arg6[%c1_93, %c0_94, %c0_95] : memref<2x64x32xf32, #tpu.memory_space<vmem>>, vector<1x64x32xf32>
    %236 = vector.shape_cast %235 : vector<1x64x32xf32> to vector<64x32xf32>
    %cst_96 = arith.constant dense<0.000000e+00> : vector<64x32xf32>
    %237 = tpu.matmul %234, %236, %cst_96 {dimension_numbers = #tpu.dot_dimension_numbers<[1], [0], [0], [1], [0, 0, 1, 1], [], []>} : vector<64x64xf32>, vector<64x32xf32>, vector<64x32xf32> -> vector<64x32xf32>
    %238 = arith.addf %201, %237 : vector<64x32xf32>
    %239 = vector.broadcast %130 : vector<1x32xf32> to vector<64x32xf32>
    %240 = arith.addf %238, %239 : vector<64x32xf32>
    %241 = arith.addf %240, %0 : vector<64x32xf32>
    %c0_97 = arith.constant 0 : index
    %c0_98 = arith.constant 0 : index
    %242 = vector.load %arg8[%c0_97, %c0_98] : memref<64x32xf32, #tpu.memory_space<vmem>>, vector<64x32xf32>
    tpu.vector_store %arg8[%c0_97, %c0_98], %241 {strides = array<i32>} : memref<64x32xf32, #tpu.memory_space<vmem>>, vector<64x32xf32>,
    return
  }
  func.func @transform_0(%arg0: i32) -> (i32, i32) {
    %c0_i32 = arith.constant 0 : i32
    %c0_i32_0 = arith.constant 0 : i32
    return %arg0, %c0_i32 : i32, i32
  }
  func.func @transform_1(%arg0: i32) -> (i32, i32, i32, i32) {
    %c0_i32 = arith.constant 0 : i32
    %c0_i32_0 = arith.constant 0 : i32
    %c0_i32_1 = arith.constant 0 : i32
    %c0_i32_2 = arith.constant 0 : i32
    %c0_i32_3 = arith.constant 0 : i32
    return %c0_i32, %c0_i32_0, %c0_i32_1, %c0_i32_2 : i32, i32, i32, i32
  }
  func.func @transform_2(%arg0: i32) -> (i32, i32, i32) {
    %c0_i32 = arith.constant 0 : i32
    %c0_i32_0 = arith.constant 0 : i32
    %c0_i32_1 = arith.constant 0 : i32
    %c0_i32_2 = arith.constant 0 : i32
    return %c0_i32, %c0_i32_0, %c0_i32_1 : i32, i32, i32
  }
  func.func @transform_3(%arg0: i32) -> (i32, i32, i32) {
    %c0_i32 = arith.constant 0 : i32
    %c0_i32_0 = arith.constant 0 : i32
    %c0_i32_1 = arith.constant 0 : i32
    %c0_i32_2 = arith.constant 0 : i32
    return %c0_i32, %c0_i32_0, %c0_i32_1 : i32, i32, i32
  }
  func.func @transform_4(%arg0: i32) -> (i32, i32, i32) {
    %c0_i32 = arith.constant 0 : i32
    %c0_i32_0 = arith.constant 0 : i32
    %c0_i32_1 = arith.constant 0 : i32
    %c0_i32_2 = arith.constant 0 : i32
    return %c0_i32, %c0_i32_0, %c0_i32_1 : i32, i32, i32
  }
  func.func @transform_5(%arg0: i32) -> (i32, i32, i32) {
    %c0_i32 = arith.constant 0 : i32
    %c0_i32_0 = arith.constant 0 : i32
    %c0_i32_1 = arith.constant 0 : i32
    %c0_i32_2 = arith.constant 0 : i32
    return %c0_i32, %c0_i32_0, %c0_i32_1 : i32, i32, i32
  }
  func.func @transform_6(%arg0: i32) -> (i32, i32, i32) {
    %c0_i32 = arith.constant 0 : i32
    %c0_i32_0 = arith.constant 0 : i32
    %c0_i32_1 = arith.constant 0 : i32
    %c0_i32_2 = arith.constant 0 : i32
    return %c0_i32, %c0_i32_0, %c0_i32_1 : i32, i32, i32
  }
  func.func @transform_7(%arg0: i32) -> (i32, i32) {
    %c0_i32 = arith.constant 0 : i32
    %c0_i32_0 = arith.constant 0 : i32
    return %arg0, %c0_i32 : i32, i32
  }
}

</mosaic_0001>

<bundles_post_ra>
// kernel: rstb_forward.1
= control target key start
LH: loop header
LB: loop body
LE: loop exit
PB: predicated region body
PF: predicated region fallthrough
CT: control target
= control target key end

     0   :  { %12 = vsyncpa [#allocation3], 0  ;;  %s7251_s0 = inlined_call_operand.vmem [shape: f32[128,32], index: 0, kind: input, shape index: {}]   ;;  %s7252_s1 = inlined_call_operand.vmem [shape: f32[2,2,64,64], index: 1, kind: input, shape index: {}]   ;;  %s7253_s2 = inlined_call_operand.vmem [shape: f32[2,32,96], index: 2, kind: input, shape index: {}]   ;;  %s7254_s3 = inlined_call_operand.hbm [shape: f32[2,32,32], index: 3, kind: input, shape index: {}]   ;;  %s7255_s4 = inlined_call_operand.hbm [shape: f32[2,32,64], index: 4, kind: input, shape index: {}]   ;;  %s7256_s5 = inlined_call_operand.vmem [shape: f32[2,64,32], index: 5, kind: input, shape index: {}]   ;;  %s7257_s6 = inlined_call_operand.hbm [shape: f32[2,8,96], index: 6, kind: input, shape index: {}]   ;;  %s7258_s7 = inlined_call_operand.vmem [shape: f32[128,32], index: 7, kind: output, shape index: {}]  }
   0x1   :  { %13 = vsyncpa [#allocation5], 0  ;;  %s5888_s24 = smov 0  }
   0x2 LB: > { %s4125_s25 = sadd.s32 4294967295, %s5836_s24   ;;  %p4127_p0 = scmp.ge.s32.totalorder %s5836_s24, 1  ;;  %s5836_s24 = sphi %s5888_s24, %s19_s24  }
   0x3   : > { %p202_p1 = scmp.lt.s32.totalorder %s5836_s24, 3  ;;  %p5898_p2 = scmp.eq.s32.totalorder %s4125_s25, 0 }
   0x4   : > { %s5838_s28 = smov [#allocation4]   ;;  %s5839_s30 = smov [#allocation2]  }
   0x5   : > { %s7262_s26 = scalar_select %p5898_p2, 1, 0 }
   0x6   : > { %p5902_p3 = pnand %p4127_p0, %p202_p1  ;;  %s233_s29 = sshll.u32 %s5838_s28, 4  ;;  %s234_s29 = int_to_ptr.vmem [resolvable:$true] %s233_s29 }
   0x7   : > { %s220_s8 = sshll.u32 %s5839_s30, 4  ;;  %s5840_s10 = smov [#allocation6]   ;;  %s5914_s8 = int_to_ptr.vmem [resolvable:$true] %s220_s8 }
   0x8   : > { %s7263_s27 = scalar_select %p5902_p3, 1, 0 }
   0x9   : > { %p5302_p4 = pneg %p5902_p3  ;;  %s249_s11 = sshll.u32 %s5840_s10, 4  ;;  %s5916_s11 = int_to_ptr.vmem [resolvable:$true] %s249_s11 }
   0xa   : > { %s5738_s14 = scalar_lea.hbm %s7255_s4, 1024 }
   0xb   : > { %p5910_p5 = pnand %p5898_p2, %p5302_p4  ;;  %p5739_p6 = scmp.ne.s32.totalorder %s7255_s4, %s5738_s14 }
   0xc   : > { %p5745_p10 = scmp.lt.u32.totalorder %s5738_s14, %s7255_s4 }
   0xd   : > { %p5926_p7 = pneg %p5910_p5 }
   0xf   : > { %p5741_p8 = pnand %p5926_p7, %p5739_p6 }
  0x11   : > { %p5742_p9 = pneg %p5741_p8 }
  0x13   : > { %p5747_p11 = pnand %p5745_p10, %p5742_p9 }
  0x15   : > { %5750 = shalt.err (!%p5747_p11)
}
  0x16   : > { %s5751_s20 = scalar_lea.vmem %s234_s29, 1024  ;;  %p5759_p1 = scmp.lt.s32.totalorder %s234_s29, %s234_s29 }
  0x17   : > { %p5752_p12 = scmp.ne.s32.totalorder %s234_s29, %s5751_s20  ;;  %p5760_p4 = scmp.lt.s32.totalorder %s5751_s20, %s5751_s20 }
  0x19   : > { %p5754_p13 = pnand %p5752_p12, %p5926_p7  ;;  %p5761_p2 = por %p5760_p4, %p5759_p1 }
  0x1b   : > { %p5755_p0 = pneg %p5754_p13 }
  0x1d   : > { %p5762_p3 = pnand %p5761_p2, %p5755_p0 }
  0x1f   : > { %5765 = shalt.err (!%p5762_p3)
}
  0x20   : > { %s5841_s21 = smov 128   ;;  %s5842_s22 = smov 8  }
  0x21   : > { %5308 = dma.hbm_to_vmem [thread:$0]  (!%p5910_p5), %s7255_s4, 1024, %s234_s29, [#allocation5], %s5841_s21, %s5841_s21, %s5842_s22  }
  0x22   : > { %s5766_s12 = scalar_lea.hbm %s7254_s3, 1024 }
  0x23   : > { %p5767_p2 = scmp.ne.s32.totalorder %s7254_s3, %s5766_s12  ;;  %p5773_p8 = scmp.lt.u32.totalorder %s5766_s12, %s7254_s3 }
  0x25   : > { %p5769_p3 = pnand %p5767_p2, %p5926_p7 }
  0x27   : > { %p5770_p6 = pneg %p5769_p3 }
  0x29   : > { %p5775_p9 = pnand %p5773_p8, %p5770_p6 }
  0x2b   : > { %5778 = shalt.err (!%p5775_p9)
}
  0x2c   : > { %s5779_s29 = scalar_lea.vmem %s5914_s8, 1024  ;;  %p5787_p13 = scmp.lt.s32.totalorder %s5914_s8, %s5914_s8 }
  0x2d   : > { %p5780_p10 = scmp.ne.s32.totalorder %s5914_s8, %s5779_s29  ;;  %p5788_p0 = scmp.lt.s32.totalorder %s5779_s29, %s5779_s29 }
  0x2f   : > { %p5782_p11 = pnand %p5780_p10, %p5926_p7  ;;  %p5789_p1 = por %p5788_p0, %p5787_p13 }
  0x31   : > { %p5783_p12 = pneg %p5782_p11 }
  0x33   : > { %p5790_p4 = pnand %p5789_p1, %p5783_p12 }
  0x35   : > { %5793 = shalt.err (!%p5790_p4)
}
  0x36   : > { %5305 = dma.hbm_to_vmem [thread:$0]  (!%p5910_p5), %s7254_s3, 1024, %s5914_s8, [#allocation3], %s5841_s21, %s5841_s21, %s5842_s22  }
  0x37   : > { %s5794_s28 = scalar_lea.hbm %s7257_s6, 256 }
  0x38   : > { %p5795_p2 = scmp.ne.s32.totalorder %s7257_s6, %s5794_s28  ;;  %p5801_p8 = scmp.lt.u32.totalorder %s5794_s28, %s7257_s6 }
  0x3a   : > { %p5797_p3 = pnand %p5795_p2, %p5926_p7 }
  0x3c   : > { %p5798_p6 = pneg %p5797_p3 }
  0x3e   : > { %p5803_p9 = pnand %p5801_p8, %p5798_p6 }
  0x40   : > { %5806 = shalt.err (!%p5803_p9)
}
  0x41   : > { %s5807_s8 = scalar_lea.vmem %s5916_s11, 256  ;;  %p5815_p13 = scmp.lt.s32.totalorder %s5916_s11, %s5916_s11 }
  0x42   : > { %p5808_p10 = scmp.ne.s32.totalorder %s5916_s11, %s5807_s8  ;;  %p5816_p0 = scmp.lt.s32.totalorder %s5807_s8, %s5807_s8 }
  0x44   : > { %p5810_p11 = pnand %p5808_p10, %p5926_p7  ;;  %p5817_p1 = por %p5816_p0, %p5815_p13 }
  0x46   : > { %p5811_p12 = pneg %p5810_p11 }
  0x48   : > { %p5818_p4 = pnand %p5817_p1, %p5811_p12 }
  0x4a   : > { %5821 = shalt.err (!%p5818_p4)
}
  0x4b   : > { %5311 = dma.hbm_to_vmem [thread:$0]  (!%p5910_p5), %s7257_s6, 256, %s5916_s11, [#allocation5], %s5841_s21, %s5841_s21, %s5842_s22  }
  0x4c   : > { %p7266_p2 = scmp.ne.s32.totalorder %s7263_s27, 0 }
  0x4d   : > { %p7267_p7 = scmp.ne.s32.totalorder (!%p7266_p2), %s7262_s26, 0 }
  0x4e   : > { %274 = sbr.rel (%p7266_p2) target bundleno = 6190 (0x182e), region = 48 }
  0x55   : > { %5827 = dma.done.wait (%p7267_p7), [#allocation3], 1024  }
  0x56   : > { %5829 = vsyncadd (%p7267_p7), [#allocation3], 4294966272 }
  0x57   : > { %5831 = dma.done.wait (%p7267_p7), [#allocation5], 1280  }
  0x58   : > { %5833 = vsyncadd (%p7267_p7), [#allocation5], 4294966016  ;;  %s4136_s9 = sshll.u32 %s4125_s25, 3  ;;  %vm335_vm0 = vcmask 261120   ;;  %v465_v56 = vld [vmem:[%s7253_s2] sm:$0xff]  ;;  %v466_v57 = vld [vmem:[%s7253_s2 + $0x8] sm:$0xff] }
  0x59   : > { %p315_p3 = scmp.lt.s32.totalorder %s4136_s9, 15  ;;  %v5026_v58 = vpack.c.bf16 %v466_v57, %v465_v56  ;;  %v467_v59 = vld [vmem:[%s7253_s2 + $0x10] sm:$0xff]  ;;  %v468_v60 = vld [vmem:[%s7253_s2 + $0x18] sm:$0xff]  ;;  %vm638_vm1 = vcmask 130048   ;;  %s5843_s23 = smov 96   ;;  %vm776_vm3 = vcmask 523264  }
  0x5a   : > { %v5030_v61 = vpack.c.bf16 %v468_v60, %v467_v59  ;;  %vm6158_vm2 = vmpackc.low %vm638_vm1, %vm638_vm1  ;;  %s5844_s19 = smov 64   ;;  %s5845_s20 = smov 80  }
  0x5b   : > { %s7271_s9 = smov (!%p315_p3, %s4136_s9), 15  ;;  %5027 = vmatprep.subr.bf16.mxu0 %v5026_v58  ;;  %s5846_s28 = smov 112  }
  0x5c   : > { %s4137_s27 = sshll.u32 %s7271_s9, 3  ;;  %5029 = vmatpush3.bf16.msra.mxu0 %v5026_v58  ;;  %s5847_s10 = smov 48  }
  0x5d   : > { %s6017_s21 = scalar_lea.vmem %s7251_s0, %s4137_s27  ;;  %5031 = vmatprep.subr.bf16.mxu0 %v5030_v61  ;;  %s7216_s26 = scalar_lea.vmem %s7258_s7, %s4137_s27 }
  0x5e   : > { %v326_v0 = vld [vmem:[%s6017_s21] sm:$0xff]  ;;  %v328_v1 = vld [vmem:[%s6017_s21 + $0x10] sm:$0xff]  ;;  %v327_v2 = vld [vmem:[%s6017_s21 + $0x8] sm:$0xff] }
  0x5f   : > { %v336_v3 = vsel %vm335_vm0, %v326_v0, 0.0  ;;  %v342_v4 = vsel %vm335_vm0, %v328_v1, 0.0  ;;  %v329_v5 = vld [vmem:[%s6017_s21 + $0x18] sm:$0xff]  ;;  %v339_v6 = vsel %vm335_vm0, %v327_v2, 0.0  ;;  %v330_v8 = vld [vmem:[%s6017_s21 + $0x20] sm:$0xff]  ;;  %v331_v9 = vld [vmem:[%s6017_s21 + $0x28] sm:$0xff] }
  0x60   : > { %337 = vadd.xlane.f32.xlu0 %v336_v3  ;;  %343 = vadd.xlane.f32.xlu1 %v342_v4  ;;  %v345_v7 = vsel %vm335_vm0, %v329_v5, 0.0  ;;  %v348_v10 = vsel %vm335_vm0, %v330_v8, 0.0  ;;  %v351_v11 = vsel %vm335_vm0, %v331_v9, 0.0  ;;  %v332_v12 = vld [vmem:[%s6017_s21 + $0x30] sm:$0xff]  ;;  %v333_v13 = vld [vmem:[%s6017_s21 + $0x38] sm:$0xff] }
  0x61   : > { %v354_v14 = vsel %vm335_vm0, %v332_v12, 0.0  ;;  %v357_v15 = vsel %vm335_vm0, %v333_v13, 0.0  ;;  %5033 = vmatpush3.bf16.msra.mxu0 %v5030_v61 }
  0x64   : > { %340 = vadd.xlane.f32.xlu0 %v339_v6  ;;  %346 = vadd.xlane.f32.xlu1 %v345_v7 }
  0x68   : > { %349 = vadd.xlane.f32.xlu0 %v348_v10  ;;  %352 = vadd.xlane.f32.xlu1 %v351_v11 }
  0x6c   : > { %355 = vadd.xlane.f32.xlu0 %v354_v14  ;;  %358 = vadd.xlane.f32.xlu1 %v357_v15 }
  0xed   : > { %v338_v16 = vpop.xlane.xlu0 %337  ;;  %v344_v17 = vpop.xlane.xlu1 %343 }
  0xee   : > { %v361_v18 = vmul.f32 0.03125, %v338_v16  ;;  %v363_v19 = vmul.f32 0.03125, %v344_v17  ;;  %v334_v16 = vld [vmem:[#allocation6] sm:$0xff] }
  0xf0   : > { %v6035_v20 = vsub.f32 %v326_v0, %v361_v18  ;;  %v6037_v21 = vsub.f32 %v328_v1, %v363_v19  ;;  %v441_v0 = vlaneseq }
  0xf1   : > { %v341_v22 = vpop.xlane.xlu0 %340  ;;  %v347_v23 = vpop.xlane.xlu1 %346 }
  0xf2   : > { %v362_v24 = vmul.f32 0.03125, %v341_v22  ;;  %v364_v25 = vmul.f32 0.03125, %v347_v23  ;;  %v377_v26 = vmul.f32 %v6035_v20, %v6035_v20  ;;  %v379_v27 = vmul.f32 %v6037_v21, %v6037_v21 }
  0xf3   : > { %v6087_v6 = vshrl.u32 %v441_v0, 7 }
  0xf4   : > { %v6043_v28 = vsub.f32 %v327_v2, %v362_v24  ;;  %v6045_v29 = vsub.f32 %v329_v5, %v364_v25  ;;  %v385_v30 = vsel %vm335_vm0, %v377_v26, 0.0  ;;  %v391_v33 = vsel %vm335_vm0, %v379_v27, 0.0 }
  0xf5   : > { %386 = vadd.xlane.f32.xlu0 %v385_v30  ;;  %v350_v31 = vpop.xlane.xlu0 %349  ;;  %v353_v32 = vpop.xlane.xlu1 %352  ;;  %v455_v19 = vsub.s32 1, %v6087_v6 }
  0xf6   : > { %v365_v34 = vmul.f32 0.03125, %v350_v31  ;;  %v366_v35 = vmul.f32 0.03125, %v353_v32  ;;  %v378_v36 = vmul.f32 %v6043_v28, %v6043_v28  ;;  %v380_v37 = vmul.f32 %v6045_v29, %v6045_v29 }
  0xf7   : > { %v456_v32 = vrot.slane %v334_v16, %v455_v19 }
  0xf8   : > { %v6053_v38 = vsub.f32 %v330_v8, %v365_v34  ;;  %v6055_v39 = vsub.f32 %v331_v9, %v366_v35  ;;  %v388_v40 = vsel %vm335_vm0, %v378_v36, 0.0  ;;  %v394_v43 = vsel %vm335_vm0, %v380_v37, 0.0 }
  0xf9   : > { %392 = vadd.xlane.f32.xlu0 %v391_v33  ;;  %389 = vadd.xlane.f32.xlu1 %v388_v40  ;;  %v356_v41 = vpop.xlane.xlu0 %355  ;;  %v359_v42 = vpop.xlane.xlu1 %358 }
  0xfa   : > { %v367_v44 = vmul.f32 0.03125, %v356_v41  ;;  %v368_v45 = vmul.f32 0.03125, %v359_v42  ;;  %v381_v46 = vmul.f32 %v6053_v38, %v6053_v38  ;;  %v382_v47 = vmul.f32 %v6055_v39, %v6055_v39 }
  0xfc   : > { %v6063_v48 = vsub.f32 %v332_v12, %v367_v44  ;;  %v6065_v49 = vsub.f32 %v333_v13, %v368_v45  ;;  %v397_v50 = vsel %vm335_vm0, %v381_v46, 0.0  ;;  %v400_v51 = vsel %vm335_vm0, %v382_v47, 0.0 }
  0xfd   : > { %395 = vadd.xlane.f32.xlu1 %v394_v43  ;;  %398 = vadd.xlane.f32.xlu0 %v397_v50  ;;  %v443_v13 = vsub.s32 0, %v6087_v6 }
  0xfe   : > { %v383_v52 = vmul.f32 %v6063_v48, %v6063_v48  ;;  %v384_v53 = vmul.f32 %v6065_v49, %v6065_v49 }
  0xff   : > { %v444_v24 = vrot.slane %v334_v16, %v443_v13 }
 0x100   : > { %v403_v54 = vsel %vm335_vm0, %v383_v52, 0.0  ;;  %v406_v55 = vsel %vm335_vm0, %v384_v53, 0.0 }
 0x101   : > { %401 = vadd.xlane.f32.xlu1 %v400_v51  ;;  %404 = vadd.xlane.f32.xlu0 %v403_v54 }
 0x105   : > { %407 = vadd.xlane.f32.xlu1 %v406_v55 }
 0x182   : > { %v387_v62 = vpop.xlane.xlu0 %386 }
 0x183   : > { %v409_v63 = vmul.f32 0.03125, %v387_v62 }
 0x185   : > { %v417_v1 = vadd.f32 1e-05, %v409_v63 }
 0x186   : > { %v390_v2 = vpop.xlane.xlu1 %389  ;;  %v393_v3 = vpop.xlane.xlu0 %392 }
 0x187   : > { %5496 = vrsqrt.f32 %v417_v1  ;;  %v410_v4 = vmul.f32 0.03125, %v390_v2  ;;  %v411_v5 = vmul.f32 0.03125, %v393_v3 }
 0x189   : > { %v418_v7 = vadd.f32 1e-05, %v410_v4  ;;  %v419_v8 = vadd.f32 1e-05, %v411_v5 }
 0x18a   : > { %v396_v9 = vpop.xlane.xlu1 %395  ;;  %v399_v10 = vpop.xlane.xlu0 %398 }
 0x18b   : > { %5498 = vrsqrt.f32 %v418_v7  ;;  %v412_v11 = vmul.f32 0.03125, %v396_v9  ;;  %v413_v12 = vmul.f32 0.03125, %v399_v10 }
 0x18c   : > { %5500 = vrsqrt.f32 %v419_v8 }
 0x18d   : > { %v420_v14 = vadd.f32 1e-05, %v412_v11  ;;  %v421_v15 = vadd.f32 1e-05, %v413_v12 }
 0x18e   : > { %v402_v17 = vpop.xlane.xlu1 %401  ;;  %v405_v18 = vpop.xlane.xlu0 %404 }
 0x18f   : > { %5502 = vrsqrt.f32 %v420_v14  ;;  %v414_v22 = vmul.f32 0.03125, %v402_v17  ;;  %v415_v23 = vmul.f32 0.03125, %v405_v18 }
 0x190   : > { %5504 = vrsqrt.f32 %v421_v15 }
 0x191   : > { %v5497_v25 = vpop.eup %5496  ;;  %v422_v26 = vadd.f32 1e-05, %v414_v22  ;;  %v423_v27 = vadd.f32 1e-05, %v415_v23 }
 0x192   : > { %v408_v30 = vpop.xlane.xlu1 %407  ;;  %v433_v31 = vmul.f32 %v5497_v25, %v6035_v20 }
 0x193   : > { %5506 = vrsqrt.f32 %v422_v26  ;;  %v416_v33 = vmul.f32 0.03125, %v408_v30 }
 0x194   : > { %5508 = vrsqrt.f32 %v423_v27  ;;  %v445_v34 = vmul.f32 %v444_v24, %v433_v31 }
 0x195   : > { %v5499_v35 = vpop.eup %5498  ;;  %v424_v36 = vadd.f32 1e-05, %v416_v33 }
 0x196   : > { %v5501_v37 = vpop.eup %5500  ;;  %v457_v40 = vadd.f32 %v456_v32, %v445_v34  ;;  %v434_v41 = vmul.f32 %v5499_v35, %v6043_v28 }
 0x197   : > { %5510 = vrsqrt.f32 %v424_v36  ;;  %v435_v42 = vmul.f32 %v5501_v37, %v6037_v21 }
 0x198   : > { %4610 = vmatprep.mubr.msk.f32.mxu0 %vm335_vm0, %v457_v40  ;;  %v446_v43 = vmul.f32 %v444_v24, %v434_v41 }
 0x199   : > { %v5503_v20 = vpop.eup %5502  ;;  %v447_v44 = vmul.f32 %v444_v24, %v435_v42 }
 0x19a   : > { %v5505_v45 = vpop.eup %5504  ;;  %v458_v46 = vadd.f32 %v456_v32, %v446_v43  ;;  %v436_v47 = vmul.f32 %v5503_v20, %v6045_v29 }
 0x19b   : > { %v459_v50 = vadd.f32 %v456_v32, %v447_v44  ;;  %v437_v51 = vmul.f32 %v5505_v45, %v6053_v38  ;;  %v607_v44 = vld [vmem:[%s7252_s1 + $0x8] sm:$0xff]  ;;  %v606_v45 = vld [vmem:[%s7252_s1] sm:$0xff] }
 0x19c   : > { %4611 = vmatmul.mubr.msk.f32.vlgmr.msra.gmra.mrb[0].mxu0 %vm335_vm0, %v458_v46  ;;  %v448_v52 = vmul.f32 %v444_v24, %v436_v47 }
 0x19d   : > { %v5507_v53 = vpop.eup %5506  ;;  %4613 = vmatprep.mubr.msk.f32.mxu0 %vm335_vm0, %v459_v50  ;;  %v449_v28 = vmul.f32 %v444_v24, %v437_v51 }
 0x19e   : > { %v5509_v21 = vpop.eup %5508  ;;  %v460_v54 = vadd.f32 %v456_v32, %v448_v52  ;;  %v438_v55 = vmul.f32 %v5507_v53, %v6055_v39  ;;  %v609_v52 = vld [vmem:[%s7252_s1 + $0x18] sm:$0xff] }
 0x19f   : > { %v461_v56 = vadd.f32 %v456_v32, %v449_v28  ;;  %v439_v57 = vmul.f32 %v5509_v21, %v6063_v48  ;;  %v471_v48 = vsub.s32 4, %v6087_v6 }
 0x1a0   : > { %4614 = vmatmul.mubr.msk.f32.gmra.mrb[2].mxu0 %vm335_vm0, %v460_v54  ;;  %v450_v29 = vmul.f32 %v444_v24, %v438_v55 }
 0x1a1   : > { %v5511_v58 = vpop.eup %5510  ;;  %4616 = vmatprep.mubr.msk.f32.mxu0 %vm335_vm0, %v461_v56  ;;  %v451_v38 = vmul.f32 %v444_v24, %v439_v57  ;;  %v472_v63 = vrot.slane %v334_v16, %v471_v48  ;;  %v608_v56 = vld [vmem:[%s7252_s1 + $0x10] sm:$0xff]  ;;  %v611_v57 = vld [vmem:[%s7252_s1 + $0x28] sm:$0xff] }
 0x1a2   : > { %v462_v59 = vadd.f32 %v456_v32, %v450_v29  ;;  %v440_v60 = vmul.f32 %v5511_v58, %v6065_v49 }
 0x1a3   : > { %v463_v61 = vadd.f32 %v456_v32, %v451_v38 }
 0x1a4   : > { %4617 = vmatmul.mubr.msk.f32.gmra.mrb[4].mxu0 %vm335_vm0, %v462_v59  ;;  %v452_v62 = vmul.f32 %v444_v24, %v440_v60 }
 0x1a5   : > { %4619 = vmatprep.mubr.msk.f32.mxu0 %vm335_vm0, %v463_v61  ;;  %v610_v61 = vld [vmem:[%s7252_s1 + $0x20] sm:$0xff] }
 0x1a6   : > { %v464_v39 = vadd.f32 %v456_v32, %v452_v62  ;;  %v613_v62 = vld [vmem:[%s7252_s1 + $0x38] sm:$0xff] }
 0x1a8   : > { %4620 = vmatmul.mubr.msk.f32.gmra.mrb[6].mxu0 %vm335_vm0, %v464_v39 }
 0x26f   : > { %v4612_v0 = vpop.f32.mrb[0].mxu0 }
 0x270   : > { %v6114_v1 = vadd.f32 %v4612_v0, %v472_v63  ;;  %v563_v2 = vpop.f32.mrb[1].mxu0 }
 0x271   : > { %v6116_v49 = vadd.f32 %v563_v2, %v472_v63 }
 0x273   : > { %v4615_v3 = vpop.f32.mrb[2].mxu0  ;;  %4638 = vmatprep.mubr.msk.f32.mxu1 %vm638_vm1, %v6116_v49  ;;  %v6122_v4 = vpack.i.bf16 %v6114_v1, %v6116_v49 }
 0x274   : > { %v6124_v5 = vadd.f32 %v4615_v3, %v472_v63  ;;  %v573_v7 = vpop.f32.mrb[3].mxu0 }
 0x275   : > { %v6126_v8 = vadd.f32 %v573_v7, %v472_v63  ;;  %5337 = vrot.lane.b32.xlu0 %v6122_v4, %s5843_s23 }
 0x277   : > { %v4618_v9 = vpop.f32.mrb[4].mxu0  ;;  %v6132_v10 = vpack.i.bf16 %v6124_v5, %v6126_v8 }
 0x278   : > { %v6134_v11 = vadd.f32 %v4618_v9, %v472_v63  ;;  %v583_v12 = vpop.f32.mrb[5].mxu0  ;;  %v612_v9 = vld [vmem:[%s7252_s1 + $0x30] sm:$0xff] }
 0x279   : > { %v6136_v14 = vadd.f32 %v583_v12, %v472_v63  ;;  %5342 = vrot.lane.b32.xlu1 %v6132_v10, %s5843_s23 }
 0x27b   : > { %v4621_v15 = vpop.f32.mrb[6].mxu0  ;;  %v6142_v16 = vpack.i.bf16 %v6134_v11, %v6136_v14 }
 0x27c   : > { %v6144_v17 = vadd.f32 %v4621_v15, %v472_v63  ;;  %v593_v18 = vpop.f32.mrb[7].mxu0 }
 0x27d   : > { %v6146_v22 = vadd.f32 %v593_v18, %v472_v63  ;;  %5347 = vrot.lane.b32.xlu1 %v6142_v16, %s5843_s23 }
 0x27f   : > { %v6152_v23 = vpack.i.bf16 %v6144_v17, %v6146_v22 }
 0x281   : > { %5352 = vrot.lane.b32.xlu1 %v6152_v23, %s5843_s23 }
 0x2e7   : > { %v5338_v24 = vpop.permute.xlu0 %5337 }
 0x2e8   : > { %v5340_v25 = vunpack.i.h.bf16 %v5338_v24  ;;  %v5339_v26 = vunpack.i.l.bf16 %v5338_v24 }
 0x2ea   : > { %v5034_v30 = vpack.c.bf16 %v5340_v25, %v5339_v26 }
 0x2eb   : > { %v5343_v31 = vpop.permute.xlu1 %5342 }
 0x2ec   : > { %v5345_v32 = vunpack.i.h.bf16 %v5343_v31  ;;  %v5344_v33 = vunpack.i.l.bf16 %v5343_v31  ;;  %5036 = vmatprep.subr.msk.bf16.mxu1 %vm6158_vm2, %v5034_v30 }
 0x2ed   : > { %5039 = vmatpush3.bf16.xpose.msk.msra.mxu1 %vm6158_vm2, %v5034_v30 }
 0x2ee   : > { %v5040_v34 = vpack.c.bf16 %v5345_v32, %v5344_v33 }
 0x2ef   : > { %v5348_v35 = vpop.permute.xlu1 %5347 }
 0x2f0   : > { %v5350_v36 = vunpack.i.h.bf16 %v5348_v35  ;;  %v5349_v37 = vunpack.i.l.bf16 %v5348_v35  ;;  %5042 = vmatprep.subr.msk.bf16.mxu1 %vm6158_vm2, %v5040_v34 }
 0x2f2   : > { %v5046_v40 = vpack.c.bf16 %v5350_v36, %v5349_v37 }
 0x2f3   : > { %v5353_v41 = vpop.permute.xlu1 %5352 }
 0x2f4   : > { %v5355_v42 = vunpack.i.h.bf16 %v5353_v41  ;;  %v5354_v43 = vunpack.i.l.bf16 %v5353_v41 }
 0x2f5   : > { %5045 = vmatpush3.bf16.xpose.msk.msra.mxu1 %vm6158_vm2, %v5040_v34 }
 0x2f6   : > { %5048 = vmatprep.subr.msk.bf16.mxu1 %vm6158_vm2, %v5046_v40  ;;  %v5052_v20 = vpack.c.bf16 %v5355_v42, %v5354_v43 }
 0x2fd   : > { %5051 = vmatpush3.bf16.xpose.msk.msra.mxu1 %vm6158_vm2, %v5046_v40 }
 0x2fe   : > { %5054 = vmatprep.subr.msk.bf16.mxu1 %vm6158_vm2, %v5052_v20 }
 0x305   : > { %5057 = vmatpush3.bf16.xpose.msk.msra.mxu1 %vm6158_vm2, %v5052_v20 }
 0x30c   : > { %4639 = vmatmul.mubr.msk.f32.vlgmr.msra.gmra.mrb[0].mxu1 %vm638_vm1, %v6114_v1 }
 0x30d   : > { %4641 = vmatprep.mubr.msk.f32.mxu1 %vm638_vm1, %v6126_v8 }
 0x310   : > { %4642 = vmatmul.mubr.msk.f32.gmra.mrb[2].mxu1 %vm638_vm1, %v6124_v5 }
 0x311   : > { %4644 = vmatprep.mubr.msk.f32.mxu1 %vm638_vm1, %v6136_v14 }
 0x314   : > { %4645 = vmatmul.mubr.msk.f32.gmra.mrb[4].mxu1 %vm638_vm1, %v6134_v11 }
 0x315   : > { %4647 = vmatprep.mubr.msk.f32.mxu1 %vm638_vm1, %v6146_v22 }
 0x318   : > { %4648 = vmatmul.mubr.msk.f32.gmra.mrb[6].mxu1 %vm638_vm1, %v6144_v17 }
 0x3df   : > { %v4640_v46 = vpop.f32.mrb[0].mxu1 }
 0x3e0   : > { %v743_v47 = vadd.f32 %v4640_v46, %v607_v44  ;;  %v737_v50 = vpop.f32.mrb[1].mxu1 }
 0x3e1   : > { %v738_v51 = vadd.f32 %v737_v50, %v606_v45 }
 0x3e2   : > { %v780_v53 = vsel %vm776_vm3, %v743_v47, -inf }
 0x3e3   : > { %781 = vmax.xlane.f32.xlu1 %v780_v53  ;;  %v4643_v28 = vpop.f32.mrb[2].mxu1  ;;  %v777_v21 = vsel %vm776_vm3, %v738_v51, -inf }
 0x3e4   : > { %v753_v54 = vadd.f32 %v4643_v28, %v609_v52  ;;  %v747_v55 = vpop.f32.mrb[3].mxu1  ;;  %778 = vmax.xlane.f32.xlu0 %v777_v21 }
 0x3e5   : > { %v748_v58 = vadd.f32 %v747_v55, %v608_v56 }
 0x3e6   : > { %v786_v29 = vsel %vm776_vm3, %v753_v54, -inf }
 0x3e7   : > { %v4646_v38 = vpop.f32.mrb[4].mxu1  ;;  %v783_v2 = vsel %vm776_vm3, %v748_v58, -inf }
 0x3e8   : > { %v763_v59 = vadd.f32 %v4646_v38, %v611_v57  ;;  %v757_v60 = vpop.f32.mrb[5].mxu1  ;;  %787 = vmax.xlane.f32.xlu0 %v786_v29 }
 0x3e9   : > { %v758_v63 = vadd.f32 %v757_v60, %v610_v61 }
 0x3ea   : > { %v792_v39 = vsel %vm776_vm3, %v763_v59, -inf }
 0x3eb   : > { %793 = vmax.xlane.f32.xlu1 %v792_v39  ;;  %v4649_v0 = vpop.f32.mrb[6].mxu1  ;;  %v789_v18 = vsel %vm776_vm3, %v758_v63, -inf }
 0x3ec   : > { %v6218_v3 = vadd.f32 %v4649_v0, %v613_v62  ;;  %v767_v7 = vpop.f32.mrb[7].mxu1  ;;  %784 = vmax.xlane.f32.xlu0 %v783_v2 }
 0x3ed   : > { %v6225_v15 = vadd.f32 %v767_v7, %v612_v9 }
 0x3ee   : > { %v798_v12 = vsel %vm776_vm3, %v6218_v3, -inf }
 0x3ef   : > { %799 = vmax.xlane.f32.xlu1 %v798_v12  ;;  %v795_v24 = vsel %vm776_vm3, %v6225_v15, -inf }
 0x3f0   : > { %790 = vmax.xlane.f32.xlu0 %v789_v18 }
 0x3f4   : > { %796 = vmax.xlane.f32.xlu0 %v795_v24 }
 0x400   : > { %5362 = vrot.lane.b32.xlu1 %v6132_v10, %s5844_s19 }
 0x404   : > { %5367 = vrot.lane.b32.xlu1 %v6142_v16, %s5844_s19 }
 0x408   : > { %5372 = vrot.lane.b32.xlu1 %v6152_v23, %s5844_s19 }
 0x40a   : > { %5357 = vrot.lane.b32.xlu0 %v6122_v4, %s5844_s19 }
 0x40c   : > { %5382 = vrot.lane.b32.xlu1 %v6132_v10, %s5845_s20 }
 0x40e   : > { %5377 = vrot.lane.b32.xlu0 %v6122_v4, %s5845_s20 }
 0x470   : > { %v782_v25 = vpop.xlane.xlu1 %781 }
 0x471   : > { %v802_v26 = vsub.f32 %v743_v47, %v782_v25  ;;  %v779_v30 = vpop.xlane.xlu0 %778 }
 0x472   : > { %v801_v31 = vsub.f32 %v738_v51, %v779_v30 }
 0x473   : > { %v811_v32 = vmul.f32 1.442695, %v802_v26 }
 0x474   : > { %v809_v33 = vmul.f32 1.442695, %v801_v31 }
 0x475   : > { %5512 = vpow2.f32 %v811_v32  ;;  %v788_v34 = vpop.xlane.xlu0 %787 }
 0x476   : > { %5514 = vpow2.f32 %v809_v33  ;;  %v804_v35 = vsub.f32 %v753_v54, %v788_v34 }
 0x478   : > { %v815_v36 = vmul.f32 1.442695, %v804_v35  ;;  %v794_v37 = vpop.xlane.xlu1 %793 }
 0x479   : > { %v806_v40 = vsub.f32 %v763_v59, %v794_v37  ;;  %v785_v41 = vpop.xlane.xlu0 %784 }
 0x47a   : > { %5516 = vpow2.f32 %v815_v36  ;;  %v803_v42 = vsub.f32 %v748_v58, %v785_v41 }
 0x47b   : > { %v819_v43 = vmul.f32 1.442695, %v806_v40 }
 0x47c   : > { %v813_v20 = vmul.f32 1.442695, %v803_v42  ;;  %v800_v44 = vpop.xlane.xlu1 %799 }
 0x47d   : > { %v791_v45 = vpop.xlane.xlu0 %790  ;;  %v808_v35 = vsub.f32 %v6218_v3, %v800_v44 }
 0x47e   : > { %5518 = vpow2.f32 %v813_v20  ;;  %v805_v46 = vsub.f32 %v758_v63, %v791_v45 }
 0x47f   : > { %v6242_v47 = vpop.eup %5512  ;;  %5520 = vpow2.f32 %v819_v43  ;;  %v823_v36 = vmul.f32 1.442695, %v808_v35 }
 0x480   : > { %v6244_v50 = vpop.eup %5514  ;;  %v817_v51 = vmul.f32 1.442695, %v805_v46  ;;  %v5363_v52 = vpop.permute.xlu1 %5362  ;;  %v828_v53 = vsel %vm776_vm3, %v6242_v47, 0.0 }
 0x481   : > { %829 = vadd.xlane.f32.xlu1 %v828_v53  ;;  %v797_v28 = vpop.xlane.xlu0 %796  ;;  %v825_v21 = vsel %vm776_vm3, %v6244_v50, 0.0  ;;  %v5365_v29 = vunpack.i.h.bf16 %v5363_v52  ;;  %v5364_v58 = vunpack.i.l.bf16 %v5363_v52 }
 0x482   : > { %826 = vadd.xlane.f32.xlu0 %v825_v21  ;;  %5522 = vpow2.f32 %v817_v51  ;;  %v807_v37 = vsub.f32 %v6225_v15, %v797_v28 }
 0x483   : > { %v5062_v2 = vpack.c.bf16 %v5365_v29, %v5364_v58  ;;  %5524 = vpow2.f32 %v823_v36 }
 0x484   : > { %v6250_v54 = vpop.eup %5516  ;;  %v5368_v55 = vpop.permute.xlu1 %5367  ;;  %v821_v40 = vmul.f32 1.442695, %v807_v37 }
 0x485   : > { %v5358_v56 = vpop.permute.xlu0 %5357  ;;  %v834_v57 = vsel %vm776_vm3, %v6250_v54, 0.0  ;;  %v5370_v63 = vunpack.i.h.bf16 %v5368_v55  ;;  %v5369_v0 = vunpack.i.l.bf16 %v5368_v55 }
 0x486   : > { %v5360_v38 = vunpack.i.h.bf16 %v5358_v56  ;;  %v5359_v59 = vunpack.i.l.bf16 %v5358_v56  ;;  %835 = vadd.xlane.f32.xlu1 %v834_v57  ;;  %5526 = vpow2.f32 %v821_v40 }
 0x487   : > { %v5066_v25 = vpack.c.bf16 %v5370_v63, %v5369_v0 }
 0x488   : > { %v6254_v60 = vpop.eup %5518  ;;  %v5058_v61 = vpack.c.bf16 %v5360_v38, %v5359_v59  ;;  %v5373_v7 = vpop.permute.xlu1 %5372 }
 0x489   : > { %v831_v62 = vsel %vm776_vm3, %v6254_v60, 0.0  ;;  %v6258_v39 = vpop.eup %5520  ;;  %v5375_v18 = vunpack.i.h.bf16 %v5373_v7  ;;  %v5374_v24 = vunpack.i.l.bf16 %v5373_v7  ;;  %v5378_v26 = vpop.permute.xlu0 %5377 }
 0x48a   : > { %832 = vadd.xlane.f32.xlu0 %v831_v62  ;;  %5059 = vmatprep.subr.bf16.mxu0 %v5058_v61  ;;  %v840_v9 = vsel %vm776_vm3, %v6258_v39, 0.0  ;;  %v5380_v31 = vunpack.i.h.bf16 %v5378_v26  ;;  %v5379_v32 = vunpack.i.l.bf16 %v5378_v26 }
 0x48b   : > { %5061 = vmatpush3.bf16.msra.mxu0 %v5058_v61  ;;  %v5070_v33 = vpack.c.bf16 %v5375_v18, %v5374_v24 }
 0x48c   : > { %5063 = vmatprep.subr.bf16.mxu0 %v5062_v2  ;;  %v6262_v12 = vpop.eup %5522  ;;  %v5074_v34 = vpack.c.bf16 %v5380_v31, %v5379_v32 }
 0x48d   : > { %v837_v30 = vsel %vm776_vm3, %v6262_v12, 0.0 }
 0x48e   : > { %841 = vadd.xlane.f32.xlu0 %v840_v9 }
 0x48f   : > { %5065 = vmatpush3.bf16.msra.mxu0 %v5062_v2 }
 0x490   : > { %5067 = vmatprep.subr.bf16.mxu0 %v5066_v25 }
 0x492   : > { %838 = vadd.xlane.f32.xlu0 %v837_v30 }
 0x493   : > { %5069 = vmatpush3.bf16.msra.mxu0 %v5066_v25 }
 0x494   : > { %5071 = vmatprep.subr.bf16.mxu0 %v5070_v33 }
 0x497   : > { %5392 = vrot.lane.b32.xlu1 %v6152_v23, %s5845_s20  ;;  %5073 = vmatpush3.bf16.msra.mxu0 %v5070_v33 }
 0x498   : > { %5076 = vmatprep.subr.msk.bf16.mxu0 %vm6158_vm2, %v5074_v34 }
 0x49b   : > { %1029 = vrot.lane.b32.xlu1 %v6114_v1, %s5846_s28  ;;  %v6284_v1 = vpop.eup %5524 }
 0x49c   : > { %v6288_v3 = vpop.eup %5526 }
 0x4a8   : > { %5387 = vrot.lane.b32.xlu0 %v6142_v16, %s5845_s20 }
 0x4ac   : > { %1027 = vrot.lane.b32.xlu0 %v6116_v49, %s5846_s28  ;;  %v846_v49 = vsel %vm776_vm3, %v6284_v1, 0.0 }
 0x4b0   : > { %1031 = vrot.lane.b32.xlu0 %v6126_v8, %s5846_s28  ;;  %v843_v8 = vsel %vm776_vm3, %v6288_v3, 0.0 }
 0x4b4   : > { %1035 = vrot.lane.b32.xlu0 %v6136_v14, %s5846_s28  ;;  %v5383_v14 = vpop.permute.xlu1 %5382 }
 0x4b5   : > { %v5385_v44 = vunpack.i.h.bf16 %v5383_v14  ;;  %v5384_v45 = vunpack.i.l.bf16 %v5383_v14 }
 0x4b8   : > { %1039 = vrot.lane.b32.xlu0 %v6146_v22, %s5846_s28 }
 0x4bf   : > { %847 = vadd.xlane.f32.xlu1 %v846_v49  ;;  %v4173_v49 = vld [vmem:[%s7252_s1 + $0x48] sm:$0xff] }
 0x4c3   : > { %844 = vadd.xlane.f32.xlu1 %v843_v8 }
 0x4d4   : > { %1033 = vrot.lane.b32.xlu1 %v6124_v5, %s5846_s28 }
 0x4d8   : > { %1037 = vrot.lane.b32.xlu1 %v6134_v11, %s5846_s28 }
 0x4dc   : > { %1041 = vrot.lane.b32.xlu1 %v6144_v17, %s5846_s28  ;;  %v5080_v17 = vpack.c.bf16 %v5385_v44, %v5384_v45 }
 0x50e   : > { %v830_v22 = vpop.xlane.xlu1 %829 }
 0x50f   : > { %5528 = vrcp.f32 %v830_v22  ;;  %v827_v15 = vpop.xlane.xlu0 %826 }
 0x510   : > { %5530 = vrcp.f32 %v827_v15 }
 0x513   : > { %v836_v41 = vpop.xlane.xlu1 %835 }
 0x514   : > { %5532 = vrcp.f32 %v836_v41  ;;  %v4175_v41 = vld [vmem:[%s7252_s1 + $0x58] sm:$0xff] }
 0x517   : > { %v833_v42 = vpop.xlane.xlu0 %832  ;;  %v5393_v57 = vpop.permute.xlu1 %5392 }
 0x518   : > { %5534 = vrcp.f32 %v833_v42  ;;  %v5395_v38 = vunpack.i.h.bf16 %v5393_v57  ;;  %v5394_v59 = vunpack.i.l.bf16 %v5393_v57 }
 0x519   : > { %v5529_v43 = vpop.eup %5528 }
 0x51a   : > { %v5531_v20 = vpop.eup %5530  ;;  %v858_v11 = vmul.f32 %v5529_v43, %v6242_v47  ;;  %v5092_v61 = vpack.c.bf16 %v5395_v38, %v5394_v59 }
 0x51b   : > { %v842_v5 = vpop.xlane.xlu0 %841  ;;  %v857_v46 = vmul.f32 %v5531_v20, %v6244_v50  ;;  %v1030_v62 = vpop.permute.xlu1 %1029 }
 0x51c   : > { %5536 = vrcp.f32 %v842_v5  ;;  %v4174_v5 = vld [vmem:[%s7252_s1 + $0x50] sm:$0xff] }
 0x51d   : > { %4666 = vmatprep.mubr.msk.f32.mxu0 %vm776_vm3, %v857_v46  ;;  %v4177_v46 = vld [vmem:[%s7252_s1 + $0x68] sm:$0xff] }
 0x51e   : > { %4667 = vmatmul.mubr.msk.f32.vlgmr.msra.gmra.mrb[8].mxu0 %vm776_vm3, %v858_v11  ;;  %v5533_v52 = vpop.eup %5532 }
 0x51f   : > { %5079 = vmatpush3.bf16.xpose.msk.msra.mxu0 %vm6158_vm2, %v5074_v34  ;;  %v839_v51 = vpop.xlane.xlu0 %838  ;;  %v860_v55 = vmul.f32 %v5533_v52, %v6250_v54 }
 0x520   : > { %5538 = vrcp.f32 %v839_v51  ;;  %5082 = vmatprep.subr.msk.bf16.mxu0 %vm6158_vm2, %v5080_v17 }
 0x522   : > { %v5535_v53 = vpop.eup %5534 }
 0x523   : > { %v5388_v28 = vpop.permute.xlu0 %5387  ;;  %v859_v50 = vmul.f32 %v5535_v53, %v6254_v60 }
 0x524   : > { %v5390_v47 = vunpack.i.h.bf16 %v5388_v28  ;;  %v5389_v21 = vunpack.i.l.bf16 %v5388_v28  ;;  %v4176_v28 = vld [vmem:[%s7252_s1 + $0x60] sm:$0xff] }
 0x525   : > { %4669 = vmatprep.mubr.msk.f32.mxu0 %vm776_vm3, %v859_v50  ;;  %v4179_v50 = vld [vmem:[%s7252_s1 + $0x78] sm:$0xff] }
 0x526   : > { %v5086_v56 = vpack.c.bf16 %v5390_v47, %v5389_v21  ;;  %4670 = vmatmul.mubr.msk.f32.gmra.mrb[10].mxu0 %vm776_vm3, %v860_v55  ;;  %v5537_v29 = vpop.eup %5536 }
 0x527   : > { %5085 = vmatpush3.bf16.xpose.msk.msra.mxu0 %vm6158_vm2, %v5080_v17  ;;  %v862_v54 = vmul.f32 %v5537_v29, %v6258_v39  ;;  %v1028_v39 = vpop.permute.xlu0 %1027 }
 0x528   : > { %5088 = vmatprep.subr.msk.bf16.mxu0 %vm6158_vm2, %v5086_v56 }
 0x52a   : > { %v5539_v58 = vpop.eup %5538 }
 0x52b   : > { %v861_v60 = vmul.f32 %v5539_v58, %v6262_v12  ;;  %v1032_v18 = vpop.permute.xlu0 %1031  ;;  %v4178_v58 = vld [vmem:[%s7252_s1 + $0x70] sm:$0xff] }
 0x52d   : > { %4672 = vmatprep.mubr.msk.f32.mxu0 %vm776_vm3, %v861_v60 }
 0x52e   : > { %4673 = vmatmul.mubr.msk.f32.gmra.mrb[12].mxu0 %vm776_vm3, %v862_v54 }
 0x52f   : > { %5091 = vmatpush3.bf16.xpose.msk.msra.mxu0 %vm6158_vm2, %v5086_v56  ;;  %v1036_v25 = vpop.permute.xlu0 %1035 }
 0x530   : > { %5094 = vmatprep.subr.msk.bf16.mxu0 %vm6158_vm2, %v5092_v61 }
 0x533   : > { %v1040_v30 = vpop.permute.xlu0 %1039 }
 0x537   : > { %5097 = vmatpush3.bf16.xpose.msk.msra.mxu0 %vm6158_vm2, %v5092_v61 }
 0x54c   : > { %v848_v63 = vpop.xlane.xlu1 %847 }
 0x54d   : > { %5540 = vrcp.f32 %v848_v63 }
 0x550   : > { %v845_v0 = vpop.xlane.xlu1 %844 }
 0x551   : > { %5542 = vrcp.f32 %v845_v0 }
 0x554   : > { %v1034_v24 = vpop.permute.xlu1 %1033 }
 0x557   : > { %v5541_v2 = vpop.eup %5540 }
 0x558   : > { %v864_v12 = vmul.f32 %v5541_v2, %v6284_v1  ;;  %v1038_v26 = vpop.permute.xlu1 %1037 }
 0x55b   : > { %v5543_v7 = vpop.eup %5542 }
 0x55c   : > { %v863_v9 = vmul.f32 %v5543_v7, %v6288_v3  ;;  %v1042_v31 = vpop.permute.xlu1 %1041  ;;  %v4172_v3 = vld [vmem:[%s7252_s1 + $0x40] sm:$0xff] }
 0x55e   : > { %4675 = vmatprep.mubr.msk.f32.mxu0 %vm776_vm3, %v863_v9 }
 0x55f   : > { %4676 = vmatmul.mubr.msk.f32.gmra.mrb[14].mxu0 %vm776_vm3, %v864_v12 }
 0x560   : > { %4694 = vmatprep.mubr.msk.f32.mxu0 %vm638_vm1, %v1028_v39 }
 0x563   : > { %4695 = vmatmul.mubr.msk.f32.vlgmr.msra.gmra.mrb[16].mxu0 %vm638_vm1, %v1030_v62 }
 0x564   : > { %4697 = vmatprep.mubr.msk.f32.mxu0 %vm638_vm1, %v1032_v18 }
 0x567   : > { %4698 = vmatmul.mubr.msk.f32.gmra.mrb[18].mxu0 %vm638_vm1, %v1034_v24 }
 0x568   : > { %4700 = vmatprep.mubr.msk.f32.mxu0 %vm638_vm1, %v1036_v25 }
 0x56b   : > { %4701 = vmatmul.mubr.msk.f32.gmra.mrb[20].mxu0 %vm638_vm1, %v1038_v26 }
 0x56c   : > { %4703 = vmatprep.mubr.msk.f32.mxu0 %vm638_vm1, %v1040_v30 }
 0x56f   : > { %4704 = vmatmul.mubr.msk.f32.gmra.mrb[22].mxu0 %vm638_vm1, %v1042_v31 }
 0x5f1   : > { %v6336_v32 = vpop.f32.mrb[8].mxu0 }
 0x5f2   : > { %v6338_v33 = vpop.f32.mrb[9].mxu0 }
 0x5f9   : > { %v6340_v34 = vpop.f32.mrb[10].mxu0 }
 0x5fa   : > { %v6342_v35 = vpop.f32.mrb[11].mxu0 }
 0x601   : > { %v6344_v36 = vpop.f32.mrb[12].mxu0 }
 0x602   : > { %v6346_v37 = vpop.f32.mrb[13].mxu0 }
 0x632   : > { %v6348_v40 = vpop.f32.mrb[14].mxu0 }
 0x633   : > { %v6350_v1 = vpop.f32.mrb[15].mxu0 }
 0x636   : > { %v4696_v8 = vpop.f32.mrb[16].mxu0 }
 0x637   : > { %v1163_v14 = vadd.f32 %v4696_v8, %v4173_v49  ;;  %v1157_v22 = vpop.f32.mrb[17].mxu0 }
 0x638   : > { %v1158_v15 = vadd.f32 %v4172_v3, %v1157_v22 }
 0x639   : > { %v1199_v42 = vsel %vm776_vm3, %v1163_v14, -inf }
 0x63a   : > { %1200 = vmax.xlane.f32.xlu1 %v1199_v42  ;;  %v4699_v43 = vpop.f32.mrb[18].mxu0  ;;  %v1196_v20 = vsel %vm776_vm3, %v1158_v15, -inf }
 0x63b   : > { %v1173_v44 = vadd.f32 %v4699_v43, %v4175_v41  ;;  %v1167_v45 = vpop.f32.mrb[19].mxu0  ;;  %1197 = vmax.xlane.f32.xlu0 %v1196_v20 }
 0x63c   : > { %v1168_v17 = vadd.f32 %v4174_v5, %v1167_v45 }
 0x63d   : > { %v1205_v11 = vsel %vm776_vm3, %v1173_v44, -inf }
 0x63e   : > { %v4702_v51 = vpop.f32.mrb[20].mxu0  ;;  %v1202_v56 = vsel %vm776_vm3, %v1168_v17, -inf }
 0x63f   : > { %v1183_v52 = vadd.f32 %v4702_v51, %v4177_v46  ;;  %v1177_v53 = vpop.f32.mrb[21].mxu0  ;;  %1206 = vmax.xlane.f32.xlu0 %v1205_v11 }
 0x640   : > { %v1178_v21 = vadd.f32 %v4176_v28, %v1177_v53 }
 0x641   : > { %v1211_v47 = vsel %vm776_vm3, %v1183_v52, -inf }
 0x642   : > { %1212 = vmax.xlane.f32.xlu1 %v1211_v47  ;;  %v4705_v55 = vpop.f32.mrb[22].mxu0  ;;  %v1208_v60 = vsel %vm776_vm3, %v1178_v21, -inf }
 0x643   : > { %v1193_v57 = vadd.f32 %v4705_v55, %v4179_v50  ;;  %v1187_v29 = vpop.f32.mrb[23].mxu0  ;;  %1203 = vmax.xlane.f32.xlu0 %v1202_v56 }
 0x644   : > { %v1188_v59 = vadd.f32 %v4178_v58, %v1187_v29 }
 0x645   : > { %v1217_v38 = vsel %vm776_vm3, %v1193_v57, -inf }
 0x646   : > { %1218 = vmax.xlane.f32.xlu1 %v1217_v38  ;;  %v1214_v54 = vsel %vm776_vm3, %v1188_v59, -inf }
 0x647   : > { %1209 = vmax.xlane.f32.xlu0 %v1208_v60 }
 0x64b   : > { %1215 = vmax.xlane.f32.xlu0 %v1214_v54 }
 0x657   : > { %5402 = vrot.lane.b32.xlu1 %v6132_v10, %s5847_s10 }
 0x661   : > { %5397 = vrot.lane.b32.xlu0 %v6122_v4, %s5847_s10 }
 0x6c7   : > { %v1201_v61 = vpop.xlane.xlu1 %1200 }
 0x6c8   : > { %v1221_v62 = vsub.f32 %v1163_v14, %v1201_v61  ;;  %v1198_v63 = vpop.xlane.xlu0 %1197 }
 0x6c9   : > { %v1220_v0 = vsub.f32 %v1158_v15, %v1198_v63 }
 0x6ca   : > { %v1230_v39 = vmul.f32 1.442695, %v1221_v62 }
 0x6cb   : > { %v1228_v2 = vmul.f32 1.442695, %v1220_v0 }
 0x6cc   : > { %5544 = vpow2.f32 %v1230_v39  ;;  %v1207_v7 = vpop.xlane.xlu0 %1206 }
 0x6cd   : > { %5546 = vpow2.f32 %v1228_v2  ;;  %v1223_v9 = vsub.f32 %v1173_v44, %v1207_v7 }
 0x6cf   : > { %v1234_v12 = vmul.f32 1.442695, %v1223_v9  ;;  %v1213_v18 = vpop.xlane.xlu1 %1212 }
 0x6d0   : > { %v1225_v24 = vsub.f32 %v1183_v52, %v1213_v18  ;;  %v1204_v25 = vpop.xlane.xlu0 %1203 }
 0x6d1   : > { %5548 = vpow2.f32 %v1234_v12  ;;  %v1222_v26 = vsub.f32 %v1168_v17, %v1204_v25 }
 0x6d2   : > { %v1238_v10 = vmul.f32 1.442695, %v1225_v24 }
 0x6d3   : > { %v1232_v30 = vmul.f32 1.442695, %v1222_v26  ;;  %v1219_v31 = vpop.xlane.xlu1 %1218  ;;  %v604_v26 = vld [vmem:[#allocation2 + $0x10] sm:$0xff] }
 0x6d4   : > { %5550 = vpow2.f32 %v1238_v10  ;;  %v1227_v4 = vsub.f32 %v1193_v57, %v1219_v31  ;;  %v1210_v49 = vpop.xlane.xlu0 %1209  ;;  %v605_v10 = vld [vmem:[#allocation2 + $0x18] sm:$0xff] }
 0x6d5   : > { %5552 = vpow2.f32 %v1232_v30  ;;  %v1224_v3 = vsub.f32 %v1178_v21, %v1210_v49  ;;  %v5114_v49 = vpack.c.bf16 %v605_v10, %v604_v26 }
 0x6d6   : > { %v6388_v8 = vpop.eup %5544  ;;  %v1242_v14 = vmul.f32 1.442695, %v1227_v4 }
 0x6d7   : > { %v5547_v22 = vpop.eup %5546  ;;  %v1236_v15 = vmul.f32 1.442695, %v1224_v3  ;;  %v1247_v41 = vsel %vm776_vm3, %v6388_v8, 0.0  ;;  %v5403_v45 = vpop.permute.xlu1 %5402 }
 0x6d8   : > { %5554 = vpow2.f32 %v1242_v14  ;;  %1248 = vadd.xlane.f32.xlu1 %v1247_v41  ;;  %v1216_v42 = vpop.xlane.xlu0 %1215  ;;  %v1244_v43 = vsel %vm776_vm3, %v5547_v22, 0.0  ;;  %v5405_v53 = vunpack.i.h.bf16 %v5403_v45  ;;  %v5404_v28 = vunpack.i.l.bf16 %v5403_v45 }
 0x6d9   : > { %5556 = vpow2.f32 %v1236_v15  ;;  %v1226_v20 = vsub.f32 %v1188_v59, %v1216_v42  ;;  %1245 = vadd.xlane.f32.xlu0 %v1244_v43 }
 0x6da   : > { %v5102_v57 = vpack.c.bf16 %v5405_v53, %v5404_v28 }
 0x6db   : > { %v6393_v44 = vpop.eup %5548  ;;  %v1240_v5 = vmul.f32 1.442695, %v1226_v20 }
 0x6dc   : > { %v5398_v46 = vpop.permute.xlu0 %5397  ;;  %v1253_v11 = vsel %vm776_vm3, %v6393_v44, 0.0 }
 0x6dd   : > { %5558 = vpow2.f32 %v1240_v5  ;;  %v5400_v17 = vunpack.i.h.bf16 %v5398_v46  ;;  %v5399_v51 = vunpack.i.l.bf16 %v5398_v46  ;;  %1254 = vadd.xlane.f32.xlu1 %v1253_v11 }
 0x6de   : > { %v6397_v52 = vpop.eup %5550 }
 0x6df   : > { %v5553_v50 = vpop.eup %5552  ;;  %v1259_v47 = vsel %vm776_vm3, %v6397_v52, 0.0  ;;  %v5098_v21 = vpack.c.bf16 %v5400_v17, %v5399_v51  ;;  %v603_v51 = vld [vmem:[#allocation2 + $0x8] sm:$0xff] }
 0x6e0   : > { %v1250_v55 = vsel %vm776_vm3, %v5553_v50, 0.0 }
 0x6e1   : > { %1260 = vadd.xlane.f32.xlu1 %v1259_v47  ;;  %1251 = vadd.xlane.f32.xlu0 %v1250_v55 }
 0x6e2   : > { %v6402_v56 = vpop.eup %5554  ;;  %5099 = vmatprep.subr.bf16.mxu1 %v5098_v21 }
 0x6e3   : > { %v5557_v29 = vpop.eup %5556  ;;  %5101 = vmatpush3.bf16.msra.mxu1 %v5098_v21  ;;  %v1265_v58 = vsel %vm776_vm3, %v6402_v56, 0.0 }
 0x6e4   : > { %5103 = vmatprep.subr.bf16.mxu1 %v5102_v57  ;;  %v1256_v38 = vsel %vm776_vm3, %v5557_v29, 0.0 }
 0x6e5   : > { %1266 = vadd.xlane.f32.xlu1 %v1265_v58  ;;  %1257 = vadd.xlane.f32.xlu0 %v1256_v38  ;;  %v5722_v58 = vld [vmem:[%s6017_s21] sm:$0xff] }
 0x6e7   : > { %v5559_v59 = vpop.eup %5558  ;;  %5105 = vmatpush3.bf16.msra.mxu1 %v5102_v57 }
 0x6e8   : > { %v1262_v60 = vsel %vm776_vm3, %v5559_v59, 0.0 }
 0x6e9   : > { %1263 = vadd.xlane.f32.xlu1 %v1262_v60 }
 0x6fa   : > { %5412 = vrot.lane.b32.xlu1 %v6152_v23, %s5847_s10 }
 0x6fb   : > { %5407 = vrot.lane.b32.xlu0 %v6142_v16, %s5847_s10 }
 0x765   : > { %v1249_v54 = vpop.xlane.xlu1 %1248 }
 0x766   : > { %v1246_v61 = vpop.xlane.xlu0 %1245 }
 0x767   : > { %5560 = vrcp.f32 %v1246_v61  ;;  %v5723_v61 = vld [vmem:[%s6017_s21 + $0x18] sm:$0xff] }
 0x768   : > { %5562 = vrcp.f32 %v1249_v54 }
 0x76a   : > { %v1255_v62 = vpop.xlane.xlu1 %1254 }
 0x76e   : > { %v1261_v63 = vpop.xlane.xlu1 %1260  ;;  %v1252_v0 = vpop.xlane.xlu0 %1251 }
 0x76f   : > { %5564 = vrcp.f32 %v1252_v0 }
 0x770   : > { %5566 = vrcp.f32 %v1255_v62 }
 0x771   : > { %v5561_v39 = vpop.eup %5560 }
 0x772   : > { %v1267_v2 = vpop.xlane.xlu1 %1266  ;;  %v1258_v7 = vpop.xlane.xlu0 %1257  ;;  %v1276_v9 = vmul.f32 %v5561_v39, %v5547_v22 }
 0x773   : > { %5568 = vrcp.f32 %v1258_v7  ;;  %v5563_v3 = vpop.eup %5562 }
 0x774   : > { %4722 = vmatprep.mubr.msk.f32.mxu1 %vm776_vm3, %v1276_v9  ;;  %5570 = vrcp.f32 %v1261_v63  ;;  %v1277_v22 = vmul.f32 %v5563_v3, %v6388_v8  ;;  %v5724_v63 = vld [vmem:[%s6017_s21 + $0x10] sm:$0xff]  ;;  %v5725_v9 = vld [vmem:[%s6017_s21 + $0x28] sm:$0xff] }
 0x776   : > { %v1264_v12 = vpop.xlane.xlu1 %1263  ;;  %v5408_v18 = vpop.permute.xlu0 %5407 }
 0x777   : > { %v5410_v23 = vunpack.i.h.bf16 %v5408_v18  ;;  %v5409_v24 = vunpack.i.l.bf16 %v5408_v18  ;;  %5572 = vrcp.f32 %v1264_v12 }
 0x778   : > { %5574 = vrcp.f32 %v1267_v2 }
 0x779   : > { %v5106_v16 = vpack.c.bf16 %v5410_v23, %v5409_v24  ;;  %v5565_v14 = vpop.eup %5564  ;;  %v5726_v24 = vld [vmem:[%s6017_s21 + $0x20] sm:$0xff] }
 0x77a   : > { %v5413_v25 = vpop.permute.xlu1 %5412  ;;  %v5567_v15 = vpop.eup %5566  ;;  %v1278_v41 = vmul.f32 %v5565_v14, %v5553_v50  ;;  %v5728_v14 = vld [vmem:[%s6017_s21 + $0x30] sm:$0xff] }
 0x77b   : > { %v5415_v30 = vunpack.i.h.bf16 %v5413_v25  ;;  %v5414_v31 = vunpack.i.l.bf16 %v5413_v25  ;;  %5107 = vmatprep.subr.bf16.mxu1 %v5106_v16  ;;  %v1279_v43 = vmul.f32 %v5567_v15, %v6393_v44  ;;  %v602_v44 = vld [vmem:[#allocation2] sm:$0xff] }
 0x77c   : > { %5109 = vmatpush3.bf16.msra.mxu1 %v5106_v16  ;;  %v5118_v53 = vpack.c.bf16 %v603_v51, %v602_v44 }
 0x77d   : > { %v5110_v4 = vpack.c.bf16 %v5415_v30, %v5414_v31  ;;  %v5569_v42 = vpop.eup %5568  ;;  %v5727_v30 = vld [vmem:[%s6017_s21 + $0x38] sm:$0xff] }
 0x77e   : > { %v5571_v20 = vpop.eup %5570  ;;  %v1280_v45 = vmul.f32 %v5569_v42, %v5557_v29 }
 0x77f   : > { %5111 = vmatprep.subr.bf16.mxu1 %v5110_v4  ;;  %v1281_v8 = vmul.f32 %v5571_v20, %v6397_v52 }
 0x780   : > { %5113 = vmatpush3.bf16.msra.mxu1 %v5110_v4 }
 0x781   : > { %5115 = vmatprep.subr.bf16.mxu1 %v5114_v49  ;;  %v5573_v5 = vpop.eup %5572 }
 0x782   : > { %v5575_v46 = vpop.eup %5574  ;;  %v1282_v11 = vmul.f32 %v5573_v5, %v5559_v59 }
 0x783   : > { %4723 = vmatmul.mubr.msk.f32.vlgmr.msra.gmra.mrb[8].mxu1 %vm776_vm3, %v1277_v22  ;;  %v1283_v17 = vmul.f32 %v5575_v46, %v6402_v56 }
 0x784   : > { %4725 = vmatprep.mubr.msk.f32.mxu1 %vm776_vm3, %v1278_v41  ;;  %5117 = vmatpush3.bf16.msra.mxu1 %v5114_v49 }
 0x785   : > { %5119 = vmatprep.subr.bf16.mxu1 %v5118_v53 }
 0x787   : > { %4726 = vmatmul.mubr.msk.f32.gmra.mrb[10].mxu1 %vm776_vm3, %v1279_v43 }
 0x788   : > { %4728 = vmatprep.mubr.msk.f32.mxu1 %vm776_vm3, %v1280_v45 }
 0x78b   : > { %4729 = vmatmul.mubr.msk.f32.gmra.mrb[12].mxu1 %vm776_vm3, %v1281_v8 }
 0x78c   : > { %4731 = vmatprep.mubr.msk.f32.mxu1 %vm776_vm3, %v1282_v11 }
 0x78f   : > { %4732 = vmatmul.mubr.msk.f32.gmra.mrb[14].mxu1 %vm776_vm3, %v1283_v17 }
 0x856   : > { %v4724_v28 = vpop.f32.mrb[8].mxu1 }
 0x857   : > { %v1398_v50 = vpop.f32.mrb[9].mxu1 }
 0x858   : > { %4738 = vmatprep.mubr.msk.f32.mxu1 %vm638_vm1, %v1398_v50 }
 0x859   : > { %4739 = vmatmul.mubr.msk.f32.vlgmr.msra.gmra.mrb[16].mxu1 %vm638_vm1, %v4724_v28 }
 0x85a   : > { %v4727_v52 = vpop.f32.mrb[10].mxu1  ;;  %5121 = vmatpush3.bf16.msra.mxu1 %v5118_v53 }
 0x85b   : > { %v1408_v47 = vpop.f32.mrb[11].mxu1 }
 0x85c   : > { %4741 = vmatprep.mubr.msk.f32.mxu1 %vm638_vm1, %v1408_v47 }
 0x85d   : > { %4742 = vmatmul.mubr.msk.f32.gmra.mrb[18].mxu1 %vm638_vm1, %v4727_v52 }
 0x85e   : > { %v4730_v21 = vpop.f32.mrb[12].mxu1 }
 0x85f   : > { %v1418_v55 = vpop.f32.mrb[13].mxu1 }
 0x860   : > { %4744 = vmatprep.mubr.msk.f32.mxu1 %vm638_vm1, %v1418_v55 }
 0x861   : > { %4745 = vmatmul.mubr.msk.f32.gmra.mrb[20].mxu1 %vm638_vm1, %v4730_v21 }
 0x862   : > { %v4733_v56 = vpop.f32.mrb[14].mxu1 }
 0x863   : > { %v1428_v57 = vpop.f32.mrb[15].mxu1 }
 0x864   : > { %4747 = vmatprep.mubr.msk.f32.mxu1 %vm638_vm1, %v1428_v57 }
 0x865   : > { %4748 = vmatmul.mubr.msk.f32.gmra.mrb[22].mxu1 %vm638_vm1, %v4733_v56 }
 0x866   : > { %4754 = vmatprep.mubr.msk.f32.mxu1 %vm638_vm1, %v6338_v33  ;;  %v6449_v33 = vld [vmem:[#allocation6] sm:$0xff] }
 0x869   : > { %4755 = vmatmul.mubr.msk.f32.vlgmr.msra.gmra.mrb[16].mxu1 %vm638_vm1, %v6336_v32  ;;  %v1705_v32 = vsub.s32 5, %v6087_v6 }
 0x86a   : > { %4757 = vmatprep.mubr.msk.f32.mxu1 %vm638_vm1, %v6342_v35 }
 0x86d   : > { %4758 = vmatmul.mubr.msk.f32.gmra.mrb[18].mxu1 %vm638_vm1, %v6340_v34  ;;  %v1706_v34 = vrot.slane %v6449_v33, %v1705_v32 }
 0x86e   : > { %4760 = vmatprep.mubr.msk.f32.mxu1 %vm638_vm1, %v6346_v37  ;;  %v5721_v37 = vld [vmem:[%s6017_s21 + $0x8] sm:$0xff] }
 0x871   : > { %4761 = vmatmul.mubr.msk.f32.gmra.mrb[20].mxu1 %vm638_vm1, %v6344_v36 }
 0x872   : > { %4763 = vmatprep.mubr.msk.f32.mxu1 %vm638_vm1, %v6350_v1 }
 0x875   : > { %4764 = vmatmul.mubr.msk.f32.gmra.mrb[22].mxu1 %vm638_vm1, %v6348_v40 }
 0x93c   : > { %v4756_v35 = vpop.f32.mrb[16].mxu1 }
 0x93d   : > { %v1696_v29 = vadd.f32 %v5721_v37, %v4756_v35  ;;  %v1656_v36 = vpop.f32.mrb[17].mxu1 }
 0x93e   : > { %v1695_v1 = vadd.f32 %v5722_v58, %v1656_v36 }
 0x93f   : > { %v6456_v38 = vadd.f32 %v1706_v34, %v1696_v29 }
 0x940   : > { %v6458_v59 = vadd.f32 %v1706_v34, %v1695_v1  ;;  %v4759_v40 = vpop.f32.mrb[18].mxu1 }
 0x941   : > { %v1666_v60 = vpop.f32.mrb[19].mxu1  ;;  %v1718_v54 = vsel %vm335_vm0, %v6456_v38, 0.0  ;;  %v1698_v62 = vadd.f32 %v5723_v61, %v4759_v40 }
 0x942   : > { %v1697_v0 = vadd.f32 %v5724_v63, %v1666_v60  ;;  %1719 = vadd.xlane.f32.xlu1 %v1718_v54  ;;  %v1715_v39 = vsel %vm335_vm0, %v6458_v59, 0.0 }
 0x943   : > { %1716 = vadd.xlane.f32.xlu0 %v1715_v39  ;;  %v6469_v23 = vadd.f32 %v1706_v34, %v1698_v62 }
 0x944   : > { %v6466_v2 = vadd.f32 %v1706_v34, %v1697_v0  ;;  %v4762_v7 = vpop.f32.mrb[20].mxu1 }
 0x945   : > { %v1700_v12 = vadd.f32 %v5725_v9, %v4762_v7  ;;  %v1676_v18 = vpop.f32.mrb[21].mxu1  ;;  %v1724_v15 = vsel %vm335_vm0, %v6469_v23, 0.0 }
 0x946   : > { %v1699_v16 = vadd.f32 %v5726_v24, %v1676_v18  ;;  %v1721_v25 = vsel %vm335_vm0, %v6466_v2, 0.0 }
 0x947   : > { %v6474_v26 = vadd.f32 %v1706_v34, %v1700_v12  ;;  %1722 = vadd.xlane.f32.xlu0 %v1721_v25 }
 0x948   : > { %v4765_v10 = vpop.f32.mrb[22].mxu1  ;;  %v6479_v3 = vadd.f32 %v1706_v34, %v1699_v16 }
 0x949   : > { %v1702_v31 = vadd.f32 %v5727_v30, %v4765_v10  ;;  %v1686_v4 = vpop.f32.mrb[23].mxu1  ;;  %v1730_v49 = vsel %vm335_vm0, %v6474_v26, 0.0 }
 0x94a   : > { %v1701_v22 = vadd.f32 %v5728_v14, %v1686_v4  ;;  %1731 = vadd.xlane.f32.xlu1 %v1730_v49  ;;  %v1727_v20 = vsel %vm335_vm0, %v6479_v3, 0.0  ;;  %v1844_v4 = vld [vmem:[#allocation4 + $0x8] sm:$0xff]  ;;  %v1845_v14 = vld [vmem:[#allocation4 + $0x10] sm:$0xff] }
 0x94b   : > { %v6484_v41 = vadd.f32 %v1706_v34, %v1702_v31  ;;  %1725 = vadd.xlane.f32.xlu0 %v1724_v15  ;;  %v1843_v31 = vld [vmem:[#allocation4] sm:$0xff] }
 0x94c   : > { %v6488_v43 = vadd.f32 %v1706_v34, %v1701_v22  ;;  %v5122_v49 = vpack.c.bf16 %v1844_v4, %v1843_v31  ;;  %v1846_v22 = vld [vmem:[#allocation4 + $0x18] sm:$0xff] }
 0x94d   : > { %v1736_v42 = vsel %vm335_vm0, %v6484_v41, 0.0  ;;  %v5126_v15 = vpack.c.bf16 %v1846_v22, %v1845_v14 }
 0x94e   : > { %1737 = vadd.xlane.f32.xlu1 %v1736_v42  ;;  %v1733_v45 = vsel %vm335_vm0, %v6488_v43, 0.0  ;;  %5123 = vmatprep.subr.bf16.mxu0 %v5122_v49 }
 0x94f   : > { %1728 = vadd.xlane.f32.xlu0 %v1727_v20  ;;  %5125 = vmatpush3.bf16.msra.mxu0 %v5122_v49 }
 0x950   : > { %5127 = vmatprep.subr.bf16.mxu0 %v5126_v15 }
 0x953   : > { %1734 = vadd.xlane.f32.xlu0 %v1733_v45  ;;  %5129 = vmatpush3.bf16.msra.mxu0 %v5126_v15 }
 0x9cf   : > { %v1720_v5 = vpop.xlane.xlu1 %1719 }
 0x9d0   : > { %v1740_v8 = vmul.f32 0.03125, %v1720_v5  ;;  %v1717_v46 = vpop.xlane.xlu0 %1716 }
 0x9d1   : > { %v1739_v11 = vmul.f32 0.03125, %v1717_v46 }
 0x9d2   : > { %v6495_v17 = vsub.f32 %v6456_v38, %v1740_v8 }
 0x9d3   : > { %v6498_v44 = vsub.f32 %v6458_v59, %v1739_v11 }
 0x9d4   : > { %v1723_v51 = vpop.xlane.xlu0 %1722  ;;  %v1756_v53 = vmul.f32 %v6495_v17, %v6495_v17 }
 0x9d5   : > { %v1741_v28 = vmul.f32 0.03125, %v1723_v51  ;;  %v1755_v50 = vmul.f32 %v6498_v44, %v6498_v44 }
 0x9d6   : > { %v1766_v52 = vsel %vm335_vm0, %v1756_v53, 0.0 }
 0x9d7   : > { %v6506_v47 = vsub.f32 %v6466_v2, %v1741_v28  ;;  %v1732_v21 = vpop.xlane.xlu1 %1731  ;;  %1767 = vadd.xlane.f32.xlu1 %v1766_v52  ;;  %v1763_v55 = vsel %vm335_vm0, %v1755_v50, 0.0  ;;  %v1821_v50 = vsub.s32 2, %v6087_v6 }
 0x9d8   : > { %v1744_v56 = vmul.f32 0.03125, %v1732_v21  ;;  %v1726_v57 = vpop.xlane.xlu0 %1725  ;;  %1764 = vadd.xlane.f32.xlu0 %v1763_v55  ;;  %v1833_v55 = vsub.s32 3, %v6087_v6 }
 0x9d9   : > { %v1742_v34 = vmul.f32 0.03125, %v1726_v57  ;;  %v1757_v35 = vmul.f32 %v6506_v47, %v6506_v47 }
 0x9da   : > { %v6512_v37 = vsub.f32 %v6474_v26, %v1744_v56 }
 0x9db   : > { %v6515_v29 = vsub.f32 %v6469_v23, %v1742_v34  ;;  %v1738_v36 = vpop.xlane.xlu1 %1737  ;;  %v1769_v58 = vsel %vm335_vm0, %v1757_v35, 0.0  ;;  %v1822_v34 = vrot.slane %v6449_v33, %v1821_v50 }
 0x9dc   : > { %v1746_v1 = vmul.f32 0.03125, %v1738_v36  ;;  %v1729_v40 = vpop.xlane.xlu0 %1728  ;;  %1770 = vadd.xlane.f32.xlu0 %v1769_v58  ;;  %v1760_v0 = vmul.f32 %v6512_v37, %v6512_v37 }
 0x9dd   : > { %v1743_v60 = vmul.f32 0.03125, %v1729_v40  ;;  %v1758_v54 = vmul.f32 %v6515_v29, %v6515_v29 }
 0x9de   : > { %v6521_v61 = vsub.f32 %v6484_v41, %v1746_v1  ;;  %v1778_v18 = vsel %vm335_vm0, %v1760_v0, 0.0 }
 0x9df   : > { %v6524_v62 = vsub.f32 %v6479_v3, %v1743_v60  ;;  %v1772_v63 = vsel %vm335_vm0, %v1758_v54, 0.0 }
 0x9e0   : > { %1773 = vadd.xlane.f32.xlu1 %v1772_v63  ;;  %v1735_v39 = vpop.xlane.xlu0 %1734  ;;  %v1762_v16 = vmul.f32 %v6521_v61, %v6521_v61  ;;  %v1834_v63 = vrot.slane %v6449_v33, %v1833_v55 }
 0x9e1   : > { %v1745_v7 = vmul.f32 0.03125, %v1735_v39  ;;  %v1759_v9 = vmul.f32 %v6524_v62, %v6524_v62 }
 0x9e2   : > { %v1784_v10 = vsel %vm335_vm0, %v1762_v16, 0.0 }
 0x9e3   : > { %v6532_v12 = vsub.f32 %v6488_v43, %v1745_v7  ;;  %v1775_v24 = vsel %vm335_vm0, %v1759_v9, 0.0 }
 0x9e4   : > { %1779 = vadd.xlane.f32.xlu1 %v1778_v18  ;;  %1776 = vadd.xlane.f32.xlu0 %v1775_v24 }
 0x9e5   : > { %v1761_v25 = vmul.f32 %v6532_v12, %v6532_v12 }
 0x9e7   : > { %v1781_v30 = vsel %vm335_vm0, %v1761_v25, 0.0 }
 0x9e8   : > { %1785 = vadd.xlane.f32.xlu1 %v1784_v10  ;;  %1782 = vadd.xlane.f32.xlu0 %v1781_v30 }
 0xa64   : > { %v1768_v42 = vpop.xlane.xlu1 %1767 }
 0xa65   : > { %v1788_v20 = vmul.f32 0.03125, %v1768_v42  ;;  %v1765_v45 = vpop.xlane.xlu0 %1764 }
 0xa66   : > { %v1787_v5 = vmul.f32 0.03125, %v1765_v45 }
 0xa67   : > { %v1796_v8 = vadd.f32 1e-05, %v1788_v20 }
 0xa68   : > { %v1795_v46 = vadd.f32 1e-05, %v1787_v5 }
 0xa69   : > { %5576 = vrsqrt.f32 %v1796_v8  ;;  %v1771_v11 = vpop.xlane.xlu0 %1770 }
 0xa6a   : > { %5578 = vrsqrt.f32 %v1795_v46  ;;  %v1789_v51 = vmul.f32 0.03125, %v1771_v11 }
 0xa6c   : > { %v1797_v53 = vadd.f32 1e-05, %v1789_v51 }
 0xa6d   : > { %v1774_v28 = vpop.xlane.xlu1 %1773 }
 0xa6e   : > { %5580 = vrsqrt.f32 %v1797_v53  ;;  %v1790_v52 = vmul.f32 0.03125, %v1774_v28 }
 0xa70   : > { %v1798_v21 = vadd.f32 1e-05, %v1790_v52 }
 0xa71   : > { %v1780_v56 = vpop.xlane.xlu1 %1779  ;;  %v1777_v57 = vpop.xlane.xlu0 %1776 }
 0xa72   : > { %5582 = vrsqrt.f32 %v1798_v21  ;;  %v1792_v35 = vmul.f32 0.03125, %v1780_v56  ;;  %v1791_v36 = vmul.f32 0.03125, %v1777_v57  ;;  %v2020_v57 = vld [vmem:[%s7256_s5] sm:$0xff] }
 0xa73   : > { %v5577_v58 = vpop.eup %5576 }
 0xa74   : > { %v5579_v1 = vpop.eup %5578  ;;  %v1812_v40 = vmul.f32 %v5577_v58, %v6495_v17  ;;  %v1800_v60 = vadd.f32 1e-05, %v1792_v35  ;;  %v1799_v54 = vadd.f32 1e-05, %v1791_v36  ;;  %v2023_v35 = vld [vmem:[%s7256_s5 + $0x18] sm:$0xff]  ;;  %v2024_v58 = vld [vmem:[%s7256_s5 + $0x20] sm:$0xff] }
 0xa75   : > { %v1786_v0 = vpop.xlane.xlu1 %1785  ;;  %v1783_v39 = vpop.xlane.xlu0 %1782  ;;  %v1811_v7 = vmul.f32 %v5579_v1, %v6498_v44  ;;  %v2025_v1 = vld [vmem:[%s7256_s5 + $0x28] sm:$0xff] }
 0xa76   : > { %v1824_v9 = vmul.f32 %v1822_v34, %v1812_v40  ;;  %5584 = vrsqrt.f32 %v1800_v60  ;;  %v1794_v18 = vmul.f32 0.03125, %v1786_v0  ;;  %v1793_v24 = vmul.f32 0.03125, %v1783_v39  ;;  %v2026_v60 = vld [vmem:[%s7256_s5 + $0x30] sm:$0xff] }
 0xa77   : > { %5586 = vrsqrt.f32 %v1799_v54  ;;  %v1823_v16 = vmul.f32 %v1822_v34, %v1811_v7  ;;  %v5138_v40 = vpack.c.bf16 %v2025_v1, %v2024_v58  ;;  %v2027_v54 = vld [vmem:[%s7256_s5 + $0x38] sm:$0xff]  ;;  %v1849_v0 = vsub.s32 6, %v6087_v6 }
 0xa78   : > { %v5581_v25 = vpop.eup %5580  ;;  %v1802_v10 = vadd.f32 1e-05, %v1794_v18  ;;  %v1801_v30 = vadd.f32 1e-05, %v1793_v24  ;;  %v1836_v4 = vadd.f32 %v1834_v63, %v1824_v9 }
 0xa79   : > { %v1835_v17 = vadd.f32 %v1834_v63, %v1823_v16  ;;  %v1813_v31 = vmul.f32 %v5581_v25, %v6506_v47  ;;  %v1850_v39 = vrot.slane %v6449_v33, %v1849_v0 }
 0xa7a   : > { %5588 = vrsqrt.f32 %v1802_v10 }
 0xa7b   : > { %5590 = vrsqrt.f32 %v1801_v30  ;;  %4774 = vmatprep.mubr.msk.f32.mxu0 %vm335_vm0, %v1835_v17  ;;  %v1825_v49 = vmul.f32 %v1822_v34, %v1813_v31 }
 0xa7c   : > { %v5583_v14 = vpop.eup %5582  ;;  %4775 = vmatmul.mubr.msk.f32.vlgmr.msra.gmra.mrb[24].mxu0 %vm335_vm0, %v1836_v4 }
 0xa7d   : > { %v1837_v44 = vadd.f32 %v1834_v63, %v1825_v49  ;;  %v1814_v22 = vmul.f32 %v5583_v14, %v6515_v29 }
 0xa7f   : > { %4777 = vmatprep.mubr.msk.f32.mxu0 %vm335_vm0, %v1837_v44  ;;  %v1826_v15 = vmul.f32 %v1822_v34, %v1814_v22 }
 0xa80   : > { %v5585_v42 = vpop.eup %5584 }
 0xa81   : > { %v5587_v20 = vpop.eup %5586  ;;  %v1838_v45 = vadd.f32 %v1834_v63, %v1826_v15  ;;  %v1816_v47 = vmul.f32 %v5585_v42, %v6512_v37 }
 0xa82   : > { %v1815_v5 = vmul.f32 %v5587_v20, %v6524_v62 }
 0xa83   : > { %4778 = vmatmul.mubr.msk.f32.gmra.mrb[26].mxu0 %vm335_vm0, %v1838_v45  ;;  %v1828_v8 = vmul.f32 %v1822_v34, %v1816_v47 }
 0xa84   : > { %v5589_v46 = vpop.eup %5588  ;;  %v1827_v11 = vmul.f32 %v1822_v34, %v1815_v5 }
 0xa85   : > { %v5591_v51 = vpop.eup %5590  ;;  %v1840_v53 = vadd.f32 %v1834_v63, %v1828_v8  ;;  %v1818_v28 = vmul.f32 %v5589_v46, %v6521_v61  ;;  %v2021_v61 = vld [vmem:[%s7256_s5 + $0x8] sm:$0xff] }
 0xa86   : > { %v1839_v29 = vadd.f32 %v1834_v63, %v1827_v11  ;;  %v1817_v52 = vmul.f32 %v5591_v51, %v6532_v12  ;;  %v5130_v12 = vpack.c.bf16 %v2021_v61, %v2020_v57 }
 0xa87   : > { %v1830_v21 = vmul.f32 %v1822_v34, %v1818_v28 }
 0xa88   : > { %4780 = vmatprep.mubr.msk.f32.mxu0 %vm335_vm0, %v1839_v29  ;;  %v1829_v56 = vmul.f32 %v1822_v34, %v1817_v52  ;;  %5131 = vmatprep.subr.bf16.mxu0 %v5130_v12  ;;  %v2022_v34 = vld [vmem:[%s7256_s5 + $0x10] sm:$0xff] }
 0xa89   : > { %4781 = vmatmul.mubr.msk.f32.gmra.mrb[28].mxu0 %vm335_vm0, %v1840_v53  ;;  %v1842_v37 = vadd.f32 %v1834_v63, %v1830_v21  ;;  %v5134_v36 = vpack.c.bf16 %v2023_v35, %v2022_v34 }
 0xa8a   : > { %v1841_v62 = vadd.f32 %v1834_v63, %v1829_v56  ;;  %5133 = vmatpush3.bf16.msra.mxu0 %v5130_v12  ;;  %v5142_v63 = vpack.c.bf16 %v2027_v54, %v2026_v60 }
 0xa8b   : > { %5135 = vmatprep.subr.bf16.mxu0 %v5134_v36 }
 0xa8c   : > { %4783 = vmatprep.mubr.msk.f32.mxu0 %vm335_vm0, %v1841_v62 }
 0xa8d   : > { %4784 = vmatmul.mubr.msk.f32.gmra.mrb[30].mxu0 %vm335_vm0, %v1842_v37 }
 0xa8e   : > { %5137 = vmatpush3.bf16.msra.mxu0 %v5134_v36 }
 0xa8f   : > { %5139 = vmatprep.subr.bf16.mxu0 %v5138_v40 }
 0xa92   : > { %5141 = vmatpush3.bf16.msra.mxu0 %v5138_v40 }
 0xa93   : > { %5143 = vmatprep.subr.bf16.mxu0 %v5142_v63 }
 0xa96   : > { %5145 = vmatpush3.bf16.msra.mxu0 %v5142_v63 }
 0xb4f   : > { %v4776_v7 = vpop.f32.mrb[24].mxu0 }
 0xb50   : > { %v1947_v9 = vadd.f32 %v4776_v7, %v1850_v39  ;;  %v1941_v18 = vpop.f32.mrb[25].mxu0 }
 0xb51   : > { %v1942_v24 = vadd.f32 %v1941_v18, %v1850_v39 }
 0xb52   : > { %v1989_v16 = vmul.f32 0.70710677, %v1947_v9  ;;  %v1981_v51 = vmul.f32 0.5, %v1947_v9 }
 0xb53   : > { %v1988_v25 = vmul.f32 0.70710677, %v1942_v24  ;;  %v1980_v5 = vmul.f32 0.5, %v1942_v24 }
 0xb54   : > { %5592 = verf.f32 %v1989_v16 }
 0xb55   : > { %5594 = verf.f32 %v1988_v25 }
 0xb56   : > { %v4779_v10 = vpop.f32.mrb[26].mxu0 }
 0xb57   : > { %v1957_v30 = vadd.f32 %v4779_v10, %v1850_v39  ;;  %v1951_v17 = vpop.f32.mrb[27].mxu0 }
 0xb58   : > { %v1952_v31 = vadd.f32 %v1951_v17, %v1850_v39 }
 0xb59   : > { %v1991_v4 = vmul.f32 0.70710677, %v1957_v30  ;;  %v1983_v35 = vmul.f32 0.5, %v1957_v30 }
 0xb5a   : > { %v1990_v49 = vmul.f32 0.70710677, %v1952_v31  ;;  %v1982_v12 = vmul.f32 0.5, %v1952_v31 }
 0xb5b   : > { %5596 = verf.f32 %v1991_v4  ;;  %v2167_v4 = vsub.s32 7, %v6087_v6  ;;  %v5730_v6 = vld [vmem:[%s6017_s21 + $0x8] sm:$0xff] }
 0xb5c   : > { %5598 = verf.f32 %v1990_v49  ;;  %v4782_v14 = vpop.f32.mrb[28].mxu0 }
 0xb5d   : > { %v1967_v44 = vadd.f32 %v4782_v14, %v1850_v39  ;;  %v1961_v22 = vpop.f32.mrb[29].mxu0  ;;  %v2168_v49 = vrot.slane %v6449_v33, %v2167_v4 }
 0xb5e   : > { %v5593_v15 = vpop.eup %5592  ;;  %v1962_v42 = vadd.f32 %v1961_v22, %v1850_v39 }
 0xb5f   : > { %v5595_v20 = vpop.eup %5594  ;;  %v2005_v45 = vadd.f32 1.0, %v5593_v15  ;;  %v1993_v47 = vmul.f32 0.70710677, %v1967_v44 }
 0xb60   : > { %v2004_v8 = vadd.f32 1.0, %v5595_v20  ;;  %v1992_v46 = vmul.f32 0.70710677, %v1962_v42  ;;  %v4785_v11 = vpop.f32.mrb[30].mxu0  ;;  %v1984_v54 = vmul.f32 0.5, %v1962_v42 }
 0xb61   : > { %5600 = verf.f32 %v1993_v47  ;;  %v1977_v53 = vadd.f32 %v4785_v11, %v1850_v39  ;;  %v1971_v28 = vpop.f32.mrb[31].mxu0  ;;  %v2013_v21 = vmul.f32 %v2005_v45, %v1981_v51 }
 0xb62   : > { %v2012_v29 = vmul.f32 %v2004_v8, %v1980_v5  ;;  %5602 = verf.f32 %v1992_v46  ;;  %v1972_v52 = vadd.f32 %v1971_v28, %v1850_v39  ;;  %v1985_v39 = vmul.f32 0.5, %v1967_v44 }
 0xb63   : > { %v1995_v56 = vmul.f32 0.70710677, %v1977_v53  ;;  %v1987_v30 = vmul.f32 0.5, %v1977_v53 }
 0xb64   : > { %v1994_v37 = vmul.f32 0.70710677, %v1972_v52  ;;  %4802 = vmatprep.mubr.msk.f32.mxu0 %vm776_vm3, %v2012_v29  ;;  %v1986_v25 = vmul.f32 0.5, %v1972_v52 }
 0xb65   : > { %v5597_v62 = vpop.eup %5596  ;;  %5604 = verf.f32 %v1995_v56  ;;  %4803 = vmatmul.mubr.msk.f32.vlgmr.msra.gmra.mrb[32].mxu0 %vm776_vm3, %v2013_v21 }
 0xb66   : > { %v5599_v57 = vpop.eup %5598  ;;  %v2007_v61 = vadd.f32 1.0, %v5597_v62  ;;  %5606 = verf.f32 %v1994_v37 }
 0xb67   : > { %v2006_v34 = vadd.f32 1.0, %v5599_v57 }
 0xb68   : > { %v2015_v58 = vmul.f32 %v2007_v61, %v1983_v35 }
 0xb69   : > { %v2014_v36 = vmul.f32 %v2006_v34, %v1982_v12 }
 0xb6b   : > { %v5601_v1 = vpop.eup %5600  ;;  %4805 = vmatprep.mubr.msk.f32.mxu0 %vm776_vm3, %v2014_v36 }
 0xb6c   : > { %v5603_v40 = vpop.eup %5602  ;;  %v2009_v60 = vadd.f32 1.0, %v5601_v1  ;;  %4806 = vmatmul.mubr.msk.f32.gmra.mrb[34].mxu0 %vm776_vm3, %v2015_v58 }
 0xb6d   : > { %v2008_v63 = vadd.f32 1.0, %v5603_v40 }
 0xb6e   : > { %v2017_v24 = vmul.f32 %v2009_v60, %v1985_v39 }
 0xb6f   : > { %v5605_v7 = vpop.eup %5604  ;;  %v2016_v9 = vmul.f32 %v2008_v63, %v1984_v54 }
 0xb70   : > { %v5607_v18 = vpop.eup %5606  ;;  %v2011_v16 = vadd.f32 1.0, %v5605_v7 }
 0xb71   : > { %v2010_v10 = vadd.f32 1.0, %v5607_v18  ;;  %4808 = vmatprep.mubr.msk.f32.mxu0 %vm776_vm3, %v2016_v9 }
 0xb72   : > { %4809 = vmatmul.mubr.msk.f32.gmra.mrb[36].mxu0 %vm776_vm3, %v2017_v24  ;;  %v2019_v31 = vmul.f32 %v2011_v16, %v1987_v30 }
 0xb73   : > { %v2018_v17 = vmul.f32 %v2010_v10, %v1986_v25 }
 0xb75   : > { %4811 = vmatprep.mubr.msk.f32.mxu0 %vm776_vm3, %v2018_v17 }
 0xb76   : > { %4812 = vmatmul.mubr.msk.f32.gmra.mrb[38].mxu0 %vm776_vm3, %v2019_v31 }
 0xc38   : > { %v4804_v14 = vpop.f32.mrb[32].mxu0 }
 0xc39   : > { %v2158_v44 = vadd.f32 %v4804_v14, %v6456_v38  ;;  %v2118_v22 = vpop.f32.mrb[33].mxu0 }
 0xc3a   : > { %v2157_v15 = vadd.f32 %v2118_v22, %v6458_v59 }
 0xc3b   : > { %v6608_v42 = vadd.f32 %v2168_v49, %v2158_v44 }
 0xc3c   : > { %v6610_v20 = vadd.f32 %v2168_v49, %v2157_v15 }
 0xc3d   : > { %v2182_v45 = vsel %vm335_vm0, %v6608_v42, 0.0 }
 0xc3e   : > { %2183 = vadd.xlane.f32.xlu1 %v2182_v45  ;;  %v2179_v47 = vsel %vm335_vm0, %v6610_v20, 0.0 }
 0xc3f   : > { %2180 = vadd.xlane.f32.xlu0 %v2179_v47  ;;  %v4807_v5 = vpop.f32.mrb[34].mxu0 }
 0xc40   : > { %v2160_v33 = vadd.f32 %v4807_v5, %v6469_v23  ;;  %v2128_v8 = vpop.f32.mrb[35].mxu0 }
 0xc41   : > { %v2159_v38 = vadd.f32 %v2128_v8, %v6466_v2 }
 0xc42   : > { %v6618_v46 = vadd.f32 %v2168_v49, %v2160_v33 }
 0xc43   : > { %v6620_v59 = vadd.f32 %v2168_v49, %v2159_v38 }
 0xc44   : > { %v2188_v11 = vsel %vm335_vm0, %v6618_v46, 0.0 }
 0xc45   : > { %v4810_v51 = vpop.f32.mrb[36].mxu0  ;;  %2189 = vadd.xlane.f32.xlu1 %v2188_v11  ;;  %v2185_v53 = vsel %vm335_vm0, %v6620_v59, 0.0 }
 0xc46   : > { %v2162_v28 = vadd.f32 %v4810_v51, %v6474_v26  ;;  %v2138_v29 = vpop.f32.mrb[37].mxu0  ;;  %2186 = vadd.xlane.f32.xlu0 %v2185_v53 }
 0xc47   : > { %v2161_v23 = vadd.f32 %v2138_v29, %v6479_v3 }
 0xc48   : > { %v6628_v52 = vadd.f32 %v2168_v49, %v2162_v28 }
 0xc49   : > { %v6630_v2 = vadd.f32 %v2168_v49, %v2161_v23  ;;  %v4813_v21 = vpop.f32.mrb[38].mxu0 }
 0xc4a   : > { %v2164_v56 = vadd.f32 %v4813_v21, %v6484_v41  ;;  %v2148_v37 = vpop.f32.mrb[39].mxu0  ;;  %v2194_v62 = vsel %vm335_vm0, %v6628_v52, 0.0 }
 0xc4b   : > { %v2163_v57 = vadd.f32 %v2148_v37, %v6488_v43  ;;  %2195 = vadd.xlane.f32.xlu1 %v2194_v62  ;;  %v2191_v26 = vsel %vm335_vm0, %v6630_v2, 0.0  ;;  %v4236_v37 = vld [vmem:[%s7253_s2 + $0x20] sm:$0xff]  ;;  %v4237_v62 = vld [vmem:[%s7253_s2 + $0x28] sm:$0xff] }
 0xc4c   : > { %v6638_v61 = vadd.f32 %v2168_v49, %v2164_v56  ;;  %2192 = vadd.xlane.f32.xlu0 %v2191_v26  ;;  %v4238_v26 = vld [vmem:[%s7253_s2 + $0x30] sm:$0xff] }
 0xc4d   : > { %v6640_v3 = vadd.f32 %v2168_v49, %v2163_v57  ;;  %v5146_v57 = vpack.c.bf16 %v4237_v62, %v4236_v37 }
 0xc4e   : > { %v2200_v12 = vsel %vm335_vm0, %v6638_v61, 0.0 }
 0xc4f   : > { %2201 = vadd.xlane.f32.xlu1 %v2200_v12  ;;  %v2197_v41 = vsel %vm335_vm0, %v6640_v3, 0.0  ;;  %5147 = vmatprep.subr.bf16.mxu1 %v5146_v57  ;;  %v4239_v12 = vld [vmem:[%s7253_s2 + $0x38] sm:$0xff] }
 0xc50   : > { %2198 = vadd.xlane.f32.xlu0 %v2197_v41  ;;  %5149 = vmatpush3.bf16.msra.mxu1 %v5146_v57  ;;  %v5150_v41 = vpack.c.bf16 %v4239_v12, %v4238_v26 }
 0xc52   : > { %5151 = vmatprep.subr.bf16.mxu1 %v5150_v41 }
 0xc54   : > { %5153 = vmatpush3.bf16.msra.mxu1 %v5150_v41 }
 0xccb   : > { %v2184_v34 = vpop.xlane.xlu1 %2183 }
 0xccc   : > { %v2204_v35 = vmul.f32 0.03125, %v2184_v34  ;;  %v2181_v43 = vpop.xlane.xlu0 %2180 }
 0xccd   : > { %v2203_v36 = vmul.f32 0.03125, %v2181_v43 }
 0xcce   : > { %v6647_v58 = vsub.f32 %v6608_v42, %v2204_v35 }
 0xccf   : > { %v6650_v1 = vsub.f32 %v6610_v20, %v2203_v36 }
 0xcd0   : > { %v2220_v40 = vmul.f32 %v6647_v58, %v6647_v58 }
 0xcd1   : > { %v2219_v60 = vmul.f32 %v6650_v1, %v6650_v1 }
 0xcd2   : > { %v2190_v54 = vpop.xlane.xlu1 %2189  ;;  %v2230_v63 = vsel %vm335_vm0, %v2220_v40, 0.0 }
 0xcd3   : > { %v2206_v39 = vmul.f32 0.03125, %v2190_v54  ;;  %v2187_v7 = vpop.xlane.xlu0 %2186  ;;  %2231 = vadd.xlane.f32.xlu1 %v2230_v63  ;;  %v2227_v9 = vsel %vm335_vm0, %v2219_v60, 0.0 }
 0xcd4   : > { %v2205_v18 = vmul.f32 0.03125, %v2187_v7  ;;  %2228 = vadd.xlane.f32.xlu0 %v2227_v9 }
 0xcd5   : > { %v6659_v24 = vsub.f32 %v6618_v46, %v2206_v39 }
 0xcd6   : > { %v6662_v16 = vsub.f32 %v6620_v59, %v2205_v18  ;;  %v2178_v18 = vld [vmem:[#allocation6 + $0x8] sm:$0xff] }
 0xcd7   : > { %v2222_v25 = vmul.f32 %v6659_v24, %v6659_v24 }
 0xcd8   : > { %v2196_v10 = vpop.xlane.xlu1 %2195  ;;  %v2221_v30 = vmul.f32 %v6662_v16, %v6662_v16 }
 0xcd9   : > { %v2208_v17 = vmul.f32 0.03125, %v2196_v10  ;;  %v2193_v31 = vpop.xlane.xlu0 %2192  ;;  %v2236_v49 = vsel %vm335_vm0, %v2222_v25, 0.0 }
 0xcda   : > { %v2207_v14 = vmul.f32 0.03125, %v2193_v31  ;;  %2237 = vadd.xlane.f32.xlu1 %v2236_v49  ;;  %v2233_v44 = vsel %vm335_vm0, %v2221_v30, 0.0  ;;  %v2286_v30 = vrot.slane %v2178_v18, %v443_v13 }
 0xcdb   : > { %v6671_v22 = vsub.f32 %v6628_v52, %v2208_v17  ;;  %2234 = vadd.xlane.f32.xlu0 %v2233_v44 }
 0xcdc   : > { %v6674_v15 = vsub.f32 %v6630_v2, %v2207_v14  ;;  %v2202_v45 = vpop.xlane.xlu1 %2201 }
 0xcdd   : > { %v2210_v47 = vmul.f32 0.03125, %v2202_v45  ;;  %v2199_v5 = vpop.xlane.xlu0 %2198  ;;  %v2224_v33 = vmul.f32 %v6671_v22, %v6671_v22  ;;  %v2298_v45 = vrot.slane %v2178_v18, %v455_v19 }
 0xcde   : > { %v2209_v8 = vmul.f32 0.03125, %v2199_v5  ;;  %v2223_v38 = vmul.f32 %v6674_v15, %v6674_v15 }
 0xcdf   : > { %v6681_v11 = vsub.f32 %v6638_v61, %v2210_v47  ;;  %v2242_v51 = vsel %vm335_vm0, %v2224_v33, 0.0 }
 0xce0   : > { %v6685_v53 = vsub.f32 %v6640_v3, %v2209_v8  ;;  %2243 = vadd.xlane.f32.xlu1 %v2242_v51  ;;  %v2239_v28 = vsel %vm335_vm0, %v2223_v38, 0.0 }
 0xce1   : > { %2240 = vadd.xlane.f32.xlu0 %v2239_v28  ;;  %v2226_v29 = vmul.f32 %v6681_v11, %v6681_v11 }
 0xce2   : > { %v2225_v23 = vmul.f32 %v6685_v53, %v6685_v53 }
 0xce3   : > { %v2248_v21 = vsel %vm335_vm0, %v2226_v29, 0.0 }
 0xce4   : > { %2249 = vadd.xlane.f32.xlu1 %v2248_v21  ;;  %v2245_v56 = vsel %vm335_vm0, %v2225_v23, 0.0 }
 0xce5   : > { %2246 = vadd.xlane.f32.xlu0 %v2245_v56 }
 0xd60   : > { %v2232_v34 = vpop.xlane.xlu1 %2231 }
 0xd61   : > { %v2252_v35 = vmul.f32 0.03125, %v2232_v34  ;;  %v2229_v43 = vpop.xlane.xlu0 %2228 }
 0xd62   : > { %v2251_v36 = vmul.f32 0.03125, %v2229_v43 }
 0xd63   : > { %v2260_v40 = vadd.f32 1e-05, %v2252_v35 }
 0xd64   : > { %v2259_v60 = vadd.f32 1e-05, %v2251_v36 }
 0xd65   : > { %5608 = vrsqrt.f32 %v2260_v40 }
 0xd66   : > { %5610 = vrsqrt.f32 %v2259_v60 }
 0xd67   : > { %v2238_v54 = vpop.xlane.xlu1 %2237 }
 0xd68   : > { %v2254_v63 = vmul.f32 0.03125, %v2238_v54  ;;  %v2235_v39 = vpop.xlane.xlu0 %2234 }
 0xd69   : > { %v2253_v7 = vmul.f32 0.03125, %v2235_v39 }
 0xd6a   : > { %v2262_v9 = vadd.f32 1e-05, %v2254_v63 }
 0xd6b   : > { %v2261_v25 = vadd.f32 1e-05, %v2253_v7 }
 0xd6c   : > { %5612 = vrsqrt.f32 %v2262_v9 }
 0xd6d   : > { %5614 = vrsqrt.f32 %v2261_v25  ;;  %v2244_v10 = vpop.xlane.xlu1 %2243 }
 0xd6e   : > { %v2256_v17 = vmul.f32 0.03125, %v2244_v10  ;;  %v2241_v31 = vpop.xlane.xlu0 %2240 }
 0xd6f   : > { %v5609_v49 = vpop.eup %5608  ;;  %v2255_v14 = vmul.f32 0.03125, %v2241_v31 }
 0xd70   : > { %v5611_v44 = vpop.eup %5610  ;;  %v2276_v47 = vmul.f32 %v5609_v49, %v6647_v58  ;;  %v2264_v5 = vadd.f32 1e-05, %v2256_v17  ;;  %v2315_v17 = vrot.slane %v2178_v18, %v471_v48 }
 0xd71   : > { %v2263_v33 = vadd.f32 1e-05, %v2255_v14  ;;  %v2250_v8 = vpop.xlane.xlu1 %2249  ;;  %v2275_v38 = vmul.f32 %v5611_v44, %v6650_v1 }
 0xd72   : > { %v2288_v51 = vmul.f32 %v2286_v30, %v2276_v47  ;;  %5616 = vrsqrt.f32 %v2264_v5  ;;  %v2258_v28 = vmul.f32 0.03125, %v2250_v8  ;;  %v2247_v29 = vpop.xlane.xlu0 %2246 }
 0xd73   : > { %5618 = vrsqrt.f32 %v2263_v33  ;;  %v2257_v13 = vmul.f32 0.03125, %v2247_v29  ;;  %v2287_v23 = vmul.f32 %v2286_v30, %v2275_v38 }
 0xd74   : > { %v2300_v21 = vadd.f32 %v2298_v45, %v2288_v51  ;;  %v2266_v56 = vadd.f32 1e-05, %v2258_v28 }
 0xd75   : > { %v2265_v37 = vadd.f32 1e-05, %v2257_v13  ;;  %v2299_v62 = vadd.f32 %v2298_v45, %v2287_v23 }
 0xd76   : > { %v5613_v57 = vpop.eup %5612  ;;  %5620 = vrsqrt.f32 %v2266_v56 }
 0xd77   : > { %v5615_v19 = vpop.eup %5614  ;;  %5622 = vrsqrt.f32 %v2265_v37  ;;  %4822 = vmatprep.mubr.msk.f32.mxu1 %vm335_vm0, %v2299_v62  ;;  %v2278_v58 = vmul.f32 %v5613_v57, %v6659_v24 }
 0xd78   : > { %4823 = vmatmul.mubr.msk.f32.vlgmr.msra.gmra.mrb[24].mxu1 %vm335_vm0, %v2300_v21  ;;  %v2277_v1 = vmul.f32 %v5615_v19, %v6662_v16 }
 0xd79   : > { %v2290_v26 = vmul.f32 %v2286_v30, %v2278_v58 }
 0xd7a   : > { %v2289_v12 = vmul.f32 %v2286_v30, %v2277_v1 }
 0xd7b   : > { %v2302_v41 = vadd.f32 %v2298_v45, %v2290_v26 }
 0xd7c   : > { %v5617_v34 = vpop.eup %5616  ;;  %v2301_v35 = vadd.f32 %v2298_v45, %v2289_v12 }
 0xd7d   : > { %v5619_v43 = vpop.eup %5618  ;;  %v2280_v36 = vmul.f32 %v5617_v34, %v6671_v22 }
 0xd7e   : > { %4825 = vmatprep.mubr.msk.f32.mxu1 %vm335_vm0, %v2301_v35  ;;  %v2279_v40 = vmul.f32 %v5619_v43, %v6674_v15 }
 0xd7f   : > { %4826 = vmatmul.mubr.msk.f32.gmra.mrb[26].mxu1 %vm335_vm0, %v2302_v41  ;;  %v2292_v60 = vmul.f32 %v2286_v30, %v2280_v36 }
 0xd80   : > { %v5621_v24 = vpop.eup %5620  ;;  %v2291_v54 = vmul.f32 %v2286_v30, %v2279_v40 }
 0xd81   : > { %v5623_v63 = vpop.eup %5622  ;;  %v2304_v39 = vadd.f32 %v2298_v45, %v2292_v60  ;;  %v2282_v16 = vmul.f32 %v5621_v24, %v6681_v11  ;;  %v4249_v60 = vld [vmem:[%s7252_s1 + $0x88] sm:$0xff]  ;;  %v4248_v24 = vld [vmem:[%s7252_s1 + $0x80] sm:$0xff] }
 0xd82   : > { %v2303_v7 = vadd.f32 %v2298_v45, %v2291_v54  ;;  %v2281_v9 = vmul.f32 %v5623_v63, %v6685_v53 }
 0xd83   : > { %v2294_v25 = vmul.f32 %v2286_v30, %v2282_v16 }
 0xd84   : > { %4828 = vmatprep.mubr.msk.f32.mxu1 %vm335_vm0, %v2303_v7  ;;  %v2293_v22 = vmul.f32 %v2286_v30, %v2281_v9  ;;  %v4251_v7 = vld [vmem:[%s7252_s1 + $0x98] sm:$0xff] }
 0xd85   : > { %4829 = vmatmul.mubr.msk.f32.gmra.mrb[28].mxu1 %vm335_vm0, %v2304_v39  ;;  %v2306_v10 = vadd.f32 %v2298_v45, %v2294_v25 }
 0xd86   : > { %v2305_v15 = vadd.f32 %v2298_v45, %v2293_v22 }
 0xd88   : > { %4831 = vmatprep.mubr.msk.f32.mxu1 %vm335_vm0, %v2305_v15 }
 0xd89   : > { %4832 = vmatmul.mubr.msk.f32.gmra.mrb[30].mxu1 %vm335_vm0, %v2306_v10 }
 0xe4b   : > { %v4824_v31 = vpop.f32.mrb[24].mxu1 }
 0xe4c   : > { %v6728_v11 = vadd.f32 %v4824_v31, %v2315_v17  ;;  %v2406_v49 = vpop.f32.mrb[25].mxu1  ;;  %v4253_v31 = vld [vmem:[%s7252_s1 + $0xa8] sm:$0xff] }
 0xe4d   : > { %v6730_v53 = vadd.f32 %v2406_v49, %v2315_v17 }
 0xe4f   : > { %4850 = vmatprep.mubr.msk.f32.mxu0 %vm638_vm1, %v6730_v53  ;;  %v6736_v30 = vpack.i.bf16 %v6728_v11, %v6730_v53 }
 0xe51   : > { %5417 = vrot.lane.b32.xlu0 %v6736_v30, %s5843_s23 }
 0xe52   : > { %v4827_v14 = vpop.f32.mrb[26].mxu1 }
 0xe53   : > { %v6740_v44 = vadd.f32 %v4827_v14, %v2315_v17  ;;  %v2416_v48 = vpop.f32.mrb[27].mxu1 }
 0xe54   : > { %v6742_v18 = vadd.f32 %v2416_v48, %v2315_v17 }
 0xe56   : > { %v6746_v45 = vpack.i.bf16 %v6740_v44, %v6742_v18 }
 0xe58   : > { %v4830_v47 = vpop.f32.mrb[28].mxu1  ;;  %5422 = vrot.lane.b32.xlu1 %v6746_v45, %s5843_s23 }
 0xe59   : > { %v6750_v5 = vadd.f32 %v4830_v47, %v2315_v17  ;;  %v2426_v33 = vpop.f32.mrb[29].mxu1 }
 0xe5a   : > { %v6752_v8 = vadd.f32 %v2426_v33, %v2315_v17 }
 0xe5c   : > { %v4833_v38 = vpop.f32.mrb[30].mxu1  ;;  %v6756_v51 = vpack.i.bf16 %v6750_v5, %v6752_v8 }
 0xe5d   : > { %v6758_v28 = vadd.f32 %v4833_v38, %v2315_v17  ;;  %v2436_v29 = vpop.f32.mrb[31].mxu1  ;;  %v4252_v38 = vld [vmem:[%s7252_s1 + $0xa0] sm:$0xff] }
 0xe5e   : > { %v6760_v13 = vadd.f32 %v2436_v29, %v2315_v17  ;;  %5427 = vrot.lane.b32.xlu1 %v6756_v51, %s5843_s23  ;;  %v4250_v17 = vld [vmem:[%s7252_s1 + $0x90] sm:$0xff]  ;;  %v4255_v29 = vld [vmem:[%s7252_s1 + $0xb8] sm:$0xff] }
 0xe60   : > { %v6766_v23 = vpack.i.bf16 %v6758_v28, %v6760_v13 }
 0xe62   : > { %5432 = vrot.lane.b32.xlu1 %v6766_v23, %s5843_s23 }
 0xec3   : > { %v5418_v21 = vpop.permute.xlu0 %5417 }
 0xec4   : > { %v5420_v56 = vunpack.i.h.bf16 %v5418_v21  ;;  %v5419_v37 = vunpack.i.l.bf16 %v5418_v21 }
 0xec6   : > { %v5154_v62 = vpack.c.bf16 %v5420_v56, %v5419_v37 }
 0xec8   : > { %5156 = vmatprep.subr.msk.bf16.mxu0 %vm6158_vm2, %v5154_v62 }
 0xec9   : > { %5159 = vmatpush3.bf16.xpose.msk.msra.mxu0 %vm6158_vm2, %v5154_v62 }
 0xeca   : > { %v5423_v57 = vpop.permute.xlu1 %5422 }
 0xecb   : > { %v5425_v19 = vunpack.i.h.bf16 %v5423_v57  ;;  %v5424_v58 = vunpack.i.l.bf16 %v5423_v57 }
 0xecd   : > { %v5160_v1 = vpack.c.bf16 %v5425_v19, %v5424_v58  ;;  %v4254_v58 = vld [vmem:[%s7252_s1 + $0xb0] sm:$0xff] }
 0xecf   : > { %5162 = vmatprep.subr.msk.bf16.mxu0 %vm6158_vm2, %v5160_v1 }
 0xed0   : > { %v5428_v26 = vpop.permute.xlu1 %5427 }
 0xed1   : > { %v5430_v12 = vunpack.i.h.bf16 %v5428_v26  ;;  %v5429_v41 = vunpack.i.l.bf16 %v5428_v26  ;;  %5165 = vmatpush3.bf16.xpose.msk.msra.mxu0 %vm6158_vm2, %v5160_v1 }
 0xed3   : > { %v5166_v34 = vpack.c.bf16 %v5430_v12, %v5429_v41 }
 0xed4   : > { %v5433_v35 = vpop.permute.xlu1 %5432 }
 0xed5   : > { %v5435_v43 = vunpack.i.h.bf16 %v5433_v35  ;;  %v5434_v36 = vunpack.i.l.bf16 %v5433_v35  ;;  %5168 = vmatprep.subr.msk.bf16.mxu0 %vm6158_vm2, %v5166_v34 }
 0xed7   : > { %v5172_v40 = vpack.c.bf16 %v5435_v43, %v5434_v36 }
 0xed9   : > { %5171 = vmatpush3.bf16.xpose.msk.msra.mxu0 %vm6158_vm2, %v5166_v34 }
 0xeda   : > { %5174 = vmatprep.subr.msk.bf16.mxu0 %vm6158_vm2, %v5172_v40 }
 0xee1   : > { %5177 = vmatpush3.bf16.xpose.msk.msra.mxu0 %vm6158_vm2, %v5172_v40 }
 0xee8   : > { %4851 = vmatmul.mubr.msk.f32.vlgmr.msra.gmra.mrb[40].mxu0 %vm638_vm1, %v6728_v11 }
 0xee9   : > { %4853 = vmatprep.mubr.msk.f32.mxu0 %vm638_vm1, %v6742_v18 }
 0xeec   : > { %4854 = vmatmul.mubr.msk.f32.gmra.mrb[42].mxu0 %vm638_vm1, %v6740_v44 }
 0xeed   : > { %4856 = vmatprep.mubr.msk.f32.mxu0 %vm638_vm1, %v6752_v8 }
 0xef0   : > { %4857 = vmatmul.mubr.msk.f32.gmra.mrb[44].mxu0 %vm638_vm1, %v6750_v5 }
 0xef1   : > { %4859 = vmatprep.mubr.msk.f32.mxu0 %vm638_vm1, %v6760_v13 }
 0xef4   : > { %4860 = vmatmul.mubr.msk.f32.gmra.mrb[46].mxu0 %vm638_vm1, %v6758_v28 }
 0xfbb   : > { %v4852_v54 = vpop.f32.mrb[40].mxu0 }
 0xfbc   : > { %v2587_v63 = vadd.f32 %v4852_v54, %v4249_v60  ;;  %v2581_v39 = vpop.f32.mrb[41].mxu0 }
 0xfbd   : > { %v2582_v16 = vadd.f32 %v4248_v24, %v2581_v39 }
 0xfbe   : > { %v2623_v9 = vsel %vm776_vm3, %v2587_v63, -inf }
 0xfbf   : > { %2624 = vmax.xlane.f32.xlu1 %v2623_v9  ;;  %v4855_v25 = vpop.f32.mrb[42].mxu0  ;;  %v2620_v22 = vsel %vm776_vm3, %v2582_v16, -inf }
 0xfc0   : > { %v2597_v10 = vadd.f32 %v4855_v25, %v4251_v7  ;;  %v2591_v15 = vpop.f32.mrb[43].mxu0  ;;  %2621 = vmax.xlane.f32.xlu0 %v2620_v22 }
 0xfc1   : > { %v2592_v14 = vadd.f32 %v4250_v17, %v2591_v15 }
 0xfc2   : > { %v2629_v49 = vsel %vm776_vm3, %v2597_v10, -inf }
 0xfc3   : > { %v4858_v48 = vpop.f32.mrb[44].mxu0  ;;  %v2626_v62 = vsel %vm776_vm3, %v2592_v14, -inf }
 0xfc4   : > { %v2607_v47 = vadd.f32 %v4858_v48, %v4253_v31  ;;  %v2601_v33 = vpop.f32.mrb[45].mxu0  ;;  %2630 = vmax.xlane.f32.xlu0 %v2629_v49 }
 0xfc5   : > { %v2602_v56 = vadd.f32 %v4252_v38, %v2601_v33 }
 0xfc6   : > { %v2635_v21 = vsel %vm776_vm3, %v2607_v47, -inf }
 0xfc7   : > { %2636 = vmax.xlane.f32.xlu1 %v2635_v21  ;;  %v4861_v37 = vpop.f32.mrb[46].mxu0  ;;  %v2632_v12 = vsel %vm776_vm3, %v2602_v56, -inf }
 0xfc8   : > { %v6826_v57 = vadd.f32 %v4861_v37, %v4255_v29  ;;  %v2611_v19 = vpop.f32.mrb[47].mxu0  ;;  %2627 = vmax.xlane.f32.xlu0 %v2626_v62 }
 0xfc9   : > { %v6833_v26 = vadd.f32 %v4254_v58, %v2611_v19 }
 0xfca   : > { %v2641_v1 = vsel %vm776_vm3, %v6826_v57, -inf }
 0xfcb   : > { %2642 = vmax.xlane.f32.xlu1 %v2641_v1  ;;  %v2638_v41 = vsel %vm776_vm3, %v6833_v26, -inf }
 0xfcc   : > { %2633 = vmax.xlane.f32.xlu0 %v2632_v12 }
 0xfd0   : > { %2639 = vmax.xlane.f32.xlu0 %v2638_v41 }
 0xfdc   : > { %5442 = vrot.lane.b32.xlu1 %v6746_v45, %s5844_s19 }
 0xfe0   : > { %5447 = vrot.lane.b32.xlu1 %v6756_v51, %s5844_s19 }
 0xfe4   : > { %5452 = vrot.lane.b32.xlu1 %v6766_v23, %s5844_s19 }
 0xfe6   : > { %5437 = vrot.lane.b32.xlu0 %v6736_v30, %s5844_s19 }
 0xfe8   : > { %5462 = vrot.lane.b32.xlu1 %v6746_v45, %s5845_s20 }
 0xfea   : > { %5457 = vrot.lane.b32.xlu0 %v6736_v30, %s5845_s20 }
0x104c   : > { %v2625_v34 = vpop.xlane.xlu1 %2624 }
0x104d   : > { %v2645_v35 = vsub.f32 %v2587_v63, %v2625_v34  ;;  %v2622_v43 = vpop.xlane.xlu0 %2621 }
0x104e   : > { %v2644_v36 = vsub.f32 %v2582_v16, %v2622_v43 }
0x104f   : > { %v2654_v40 = vmul.f32 1.442695, %v2645_v35 }
0x1050   : > { %v2652_v60 = vmul.f32 1.442695, %v2644_v36 }
0x1051   : > { %5624 = vpow2.f32 %v2654_v40  ;;  %v2631_v24 = vpop.xlane.xlu0 %2630 }
0x1052   : > { %5626 = vpow2.f32 %v2652_v60  ;;  %v2647_v54 = vsub.f32 %v2597_v10, %v2631_v24 }
0x1054   : > { %v2658_v39 = vmul.f32 1.442695, %v2647_v54  ;;  %v2637_v7 = vpop.xlane.xlu1 %2636 }
0x1055   : > { %v2649_v9 = vsub.f32 %v2607_v47, %v2637_v7  ;;  %v2628_v25 = vpop.xlane.xlu0 %2627 }
0x1056   : > { %5628 = vpow2.f32 %v2658_v39  ;;  %v2646_v22 = vsub.f32 %v2592_v14, %v2628_v25 }
0x1057   : > { %v2662_v15 = vmul.f32 1.442695, %v2649_v9 }
0x1058   : > { %v2656_v17 = vmul.f32 1.442695, %v2646_v22  ;;  %v2643_v31 = vpop.xlane.xlu1 %2642 }
0x1059   : > { %v2634_v49 = vpop.xlane.xlu0 %2633 }
0x105a   : > { %5630 = vpow2.f32 %v2656_v17  ;;  %v2648_v63 = vsub.f32 %v2602_v56, %v2634_v49 }
0x105b   : > { %v6850_v48 = vpop.eup %5624  ;;  %5632 = vpow2.f32 %v2662_v15 }
0x105c   : > { %v6852_v16 = vpop.eup %5626  ;;  %v2660_v33 = vmul.f32 1.442695, %v2648_v63  ;;  %v5443_v38 = vpop.permute.xlu1 %5442  ;;  %v2671_v10 = vsel %vm776_vm3, %v6850_v48, 0.0 }
0x105d   : > { %2672 = vadd.xlane.f32.xlu1 %v2671_v10  ;;  %v2640_v47 = vpop.xlane.xlu0 %2639  ;;  %v2668_v14 = vsel %vm776_vm3, %v6852_v16, 0.0  ;;  %v5445_v62 = vunpack.i.h.bf16 %v5443_v38  ;;  %v5444_v19 = vunpack.i.l.bf16 %v5443_v38 }
0x105e   : > { %2669 = vadd.xlane.f32.xlu0 %v2668_v14  ;;  %5634 = vpow2.f32 %v2660_v33  ;;  %v2651_v33 = vsub.f32 %v6826_v57, %v2643_v31  ;;  %v2650_v10 = vsub.f32 %v6833_v26, %v2640_v47 }
0x105f   : > { %v5182_v43 = vpack.c.bf16 %v5445_v62, %v5444_v19 }
0x1060   : > { %v6858_v29 = vpop.eup %5628  ;;  %v5448_v21 = vpop.permute.xlu1 %5447  ;;  %v2666_v38 = vmul.f32 1.442695, %v2651_v33  ;;  %v2664_v14 = vmul.f32 1.442695, %v2650_v10 }
0x1061   : > { %v5438_v56 = vpop.permute.xlu0 %5437  ;;  %v2677_v37 = vsel %vm776_vm3, %v6858_v29, 0.0  ;;  %v5450_v36 = vunpack.i.h.bf16 %v5448_v21  ;;  %v5449_v40 = vunpack.i.l.bf16 %v5448_v21 }
0x1062   : > { %v5440_v58 = vunpack.i.h.bf16 %v5438_v56  ;;  %v5439_v1 = vunpack.i.l.bf16 %v5438_v56  ;;  %2678 = vadd.xlane.f32.xlu1 %v2677_v37  ;;  %5636 = vpow2.f32 %v2666_v38 }
0x1063   : > { %v5186_v39 = vpack.c.bf16 %v5450_v36, %v5449_v40  ;;  %5638 = vpow2.f32 %v2664_v14 }
0x1064   : > { %v6862_v12 = vpop.eup %5630  ;;  %v5178_v41 = vpack.c.bf16 %v5440_v58, %v5439_v1  ;;  %v5453_v60 = vpop.permute.xlu1 %5452 }
0x1065   : > { %v2674_v34 = vsel %vm776_vm3, %v6862_v12, 0.0  ;;  %v6866_v35 = vpop.eup %5632  ;;  %v5455_v7 = vunpack.i.h.bf16 %v5453_v60  ;;  %v5454_v9 = vunpack.i.l.bf16 %v5453_v60  ;;  %v5458_v25 = vpop.permute.xlu0 %5457 }
0x1066   : > { %2675 = vadd.xlane.f32.xlu0 %v2674_v34  ;;  %5179 = vmatprep.subr.bf16.mxu1 %v5178_v41  ;;  %v2683_v24 = vsel %vm776_vm3, %v6866_v35, 0.0  ;;  %v5460_v17 = vunpack.i.h.bf16 %v5458_v25  ;;  %v5459_v49 = vunpack.i.l.bf16 %v5458_v25 }
0x1067   : > { %5181 = vmatpush3.bf16.msra.mxu1 %v5178_v41  ;;  %v5190_v15 = vpack.c.bf16 %v5455_v7, %v5454_v9 }
0x1068   : > { %5183 = vmatprep.subr.bf16.mxu1 %v5182_v43  ;;  %v6870_v54 = vpop.eup %5634  ;;  %v5194_v63 = vpack.c.bf16 %v5460_v17, %v5459_v49 }
0x1069   : > { %v2680_v22 = vsel %vm776_vm3, %v6870_v54, 0.0 }
0x106a   : > { %2684 = vadd.xlane.f32.xlu0 %v2683_v24 }
0x106b   : > { %5185 = vmatpush3.bf16.msra.mxu1 %v5182_v43 }
0x106c   : > { %5187 = vmatprep.subr.bf16.mxu1 %v5186_v39 }
0x106e   : > { %2681 = vadd.xlane.f32.xlu0 %v2680_v22 }
0x106f   : > { %5189 = vmatpush3.bf16.msra.mxu1 %v5186_v39 }
0x1070   : > { %5191 = vmatprep.subr.bf16.mxu1 %v5190_v15 }
0x1073   : > { %5472 = vrot.lane.b32.xlu1 %v6766_v23, %s5845_s20  ;;  %5193 = vmatpush3.bf16.msra.mxu1 %v5190_v15 }
0x1074   : > { %5196 = vmatprep.subr.msk.bf16.mxu1 %vm6158_vm2, %v5194_v63 }
0x1077   : > { %2872 = vrot.lane.b32.xlu1 %v6728_v11, %s5846_s28  ;;  %v6892_v11 = vpop.eup %5636 }
0x1078   : > { %v6896_v57 = vpop.eup %5638 }
0x1084   : > { %5467 = vrot.lane.b32.xlu0 %v6756_v51, %s5845_s20 }
0x1088   : > { %2870 = vrot.lane.b32.xlu0 %v6730_v53, %s5846_s28  ;;  %v2689_v53 = vsel %vm776_vm3, %v6892_v11, 0.0 }
0x108c   : > { %2874 = vrot.lane.b32.xlu0 %v6742_v18, %s5846_s28  ;;  %v2686_v18 = vsel %vm776_vm3, %v6896_v57, 0.0 }
0x1090   : > { %2878 = vrot.lane.b32.xlu0 %v6752_v8, %s5846_s28  ;;  %v5463_v8 = vpop.permute.xlu1 %5462 }
0x1091   : > { %v5465_v37 = vunpack.i.h.bf16 %v5463_v8  ;;  %v5464_v62 = vunpack.i.l.bf16 %v5463_v8 }
0x1094   : > { %2882 = vrot.lane.b32.xlu0 %v6760_v13, %s5846_s28 }
0x109b   : > { %2690 = vadd.xlane.f32.xlu1 %v2689_v53 }
0x109f   : > { %2687 = vadd.xlane.f32.xlu1 %v2686_v18 }
0x10b0   : > { %2876 = vrot.lane.b32.xlu1 %v6740_v44, %s5846_s28 }
0x10b4   : > { %2880 = vrot.lane.b32.xlu1 %v6750_v5, %s5846_s28 }
0x10b8   : > { %2884 = vrot.lane.b32.xlu1 %v6758_v28, %s5846_s28  ;;  %v5200_v28 = vpack.c.bf16 %v5465_v37, %v5464_v62  ;;  %v4280_v37 = vld [vmem:[%s7252_s1 + $0xc0] sm:$0xff] }
0x10ea   : > { %v2673_v13 = vpop.xlane.xlu1 %2672 }
0x10eb   : > { %5640 = vrcp.f32 %v2673_v13  ;;  %v2670_v26 = vpop.xlane.xlu0 %2669 }
0x10ec   : > { %5642 = vrcp.f32 %v2670_v26 }
0x10ef   : > { %v2679_v31 = vpop.xlane.xlu1 %2678 }
0x10f0   : > { %5644 = vrcp.f32 %v2679_v31 }
0x10f3   : > { %v2676_v47 = vpop.xlane.xlu0 %2675  ;;  %v5473_v60 = vpop.permute.xlu1 %5472 }
0x10f4   : > { %5646 = vrcp.f32 %v2676_v47  ;;  %v5475_v7 = vunpack.i.h.bf16 %v5473_v60 }
0x10f5   : > { %v5641_v21 = vpop.eup %5640 }
0x10f6   : > { %v5643_v56 = vpop.eup %5642  ;;  %v2701_v5 = vmul.f32 %v5641_v21, %v6850_v48 }
0x10f7   : > { %v2685_v44 = vpop.xlane.xlu0 %2684  ;;  %v2700_v19 = vmul.f32 %v5643_v56, %v6852_v16  ;;  %v2873_v22 = vpop.permute.xlu1 %2872  ;;  %v4281_v56 = vld [vmem:[%s7252_s1 + $0xc8] sm:$0xff] }
0x10f8   : > { %5648 = vrcp.f32 %v2685_v44 }
0x10f9   : > { %4878 = vmatprep.mubr.msk.f32.mxu1 %vm776_vm3, %v2700_v19 }
0x10fa   : > { %4879 = vmatmul.mubr.msk.f32.vlgmr.msra.gmra.mrb[32].mxu1 %vm776_vm3, %v2701_v5  ;;  %v5645_v1 = vpop.eup %5644 }
0x10fb   : > { %5199 = vmatpush3.bf16.xpose.msk.msra.mxu1 %vm6158_vm2, %v5194_v63  ;;  %v2682_v58 = vpop.xlane.xlu0 %2681  ;;  %v2703_v36 = vmul.f32 %v5645_v1, %v6858_v29 }
0x10fc   : > { %5650 = vrcp.f32 %v2682_v58  ;;  %5202 = vmatprep.subr.msk.bf16.mxu1 %vm6158_vm2, %v5200_v28 }
0x10fe   : > { %v5647_v41 = vpop.eup %5646 }
0x10ff   : > { %v5468_v34 = vpop.permute.xlu0 %5467  ;;  %v2702_v16 = vmul.f32 %v5647_v41, %v6862_v12  ;;  %v5474_v12 = vunpack.i.l.bf16 %v5473_v60 }
0x1100   : > { %v5470_v48 = vunpack.i.h.bf16 %v5468_v34  ;;  %v5469_v43 = vunpack.i.l.bf16 %v5468_v34 }
0x1101   : > { %4881 = vmatprep.mubr.msk.f32.mxu1 %vm776_vm3, %v2702_v16  ;;  %v5212_v25 = vpack.c.bf16 %v5475_v7, %v5474_v12  ;;  %v4284_v7 = vld [vmem:[%s7252_s1 + $0xe0] sm:$0xff]  ;;  %v4287_v12 = vld [vmem:[%s7252_s1 + $0xf8] sm:$0xff] }
0x1102   : > { %v5206_v40 = vpack.c.bf16 %v5470_v48, %v5469_v43  ;;  %4882 = vmatmul.mubr.msk.f32.gmra.mrb[34].mxu1 %vm776_vm3, %v2703_v36  ;;  %v5649_v24 = vpop.eup %5648  ;;  %v4282_v48 = vld [vmem:[%s7252_s1 + $0xd0] sm:$0xff]  ;;  %v4285_v43 = vld [vmem:[%s7252_s1 + $0xe8] sm:$0xff] }
0x1103   : > { %5205 = vmatpush3.bf16.xpose.msk.msra.mxu1 %vm6158_vm2, %v5200_v28  ;;  %v2705_v29 = vmul.f32 %v5649_v24, %v6866_v35  ;;  %v2871_v35 = vpop.permute.xlu0 %2870  ;;  %v4283_v28 = vld [vmem:[%s7252_s1 + $0xd8] sm:$0xff] }
0x1104   : > { %5208 = vmatprep.subr.msk.bf16.mxu1 %vm6158_vm2, %v5206_v40 }
0x1106   : > { %v5651_v39 = vpop.eup %5650 }
0x1107   : > { %v2704_v9 = vmul.f32 %v5651_v39, %v6870_v54  ;;  %v2875_v38 = vpop.permute.xlu0 %2874 }
0x1109   : > { %4884 = vmatprep.mubr.msk.f32.mxu1 %vm776_vm3, %v2704_v9 }
0x110a   : > { %4885 = vmatmul.mubr.msk.f32.gmra.mrb[36].mxu1 %vm776_vm3, %v2705_v29 }
0x110b   : > { %5211 = vmatpush3.bf16.xpose.msk.msra.mxu1 %vm6158_vm2, %v5206_v40  ;;  %v2879_v10 = vpop.permute.xlu0 %2878 }
0x110c   : > { %5214 = vmatprep.subr.msk.bf16.mxu1 %vm6158_vm2, %v5212_v25 }
0x110f   : > { %v2883_v53 = vpop.permute.xlu0 %2882 }
0x1113   : > { %5217 = vmatpush3.bf16.xpose.msk.msra.mxu1 %vm6158_vm2, %v5212_v25 }
0x1128   : > { %v2691_v15 = vpop.xlane.xlu1 %2690 }
0x1129   : > { %5652 = vrcp.f32 %v2691_v15 }
0x112c   : > { %v2688_v54 = vpop.xlane.xlu1 %2687 }
0x112d   : > { %5654 = vrcp.f32 %v2688_v54 }
0x1130   : > { %v2877_v27 = vpop.permute.xlu1 %2876 }
0x1133   : > { %v5653_v17 = vpop.eup %5652 }
0x1134   : > { %v2707_v33 = vmul.f32 %v5653_v17, %v6892_v11  ;;  %v2881_v14 = vpop.permute.xlu1 %2880 }
0x1137   : > { %v5655_v49 = vpop.eup %5654 }
0x1138   : > { %v2706_v63 = vmul.f32 %v5655_v49, %v6896_v57  ;;  %v2885_v11 = vpop.permute.xlu1 %2884 }
0x113a   : > { %4887 = vmatprep.mubr.msk.f32.mxu1 %vm776_vm3, %v2706_v63 }
0x113b   : > { %4888 = vmatmul.mubr.msk.f32.gmra.mrb[38].mxu1 %vm776_vm3, %v2707_v33 }
0x113c   : > { %4906 = vmatprep.mubr.msk.f32.mxu1 %vm638_vm1, %v2871_v35  ;;  %v4286_v35 = vld [vmem:[%s7252_s1 + $0xf0] sm:$0xff] }
0x113f   : > { %4907 = vmatmul.mubr.msk.f32.vlgmr.msra.gmra.mrb[40].mxu1 %vm638_vm1, %v2873_v22 }
0x1140   : > { %4909 = vmatprep.mubr.msk.f32.mxu1 %vm638_vm1, %v2875_v38 }
0x1143   : > { %4910 = vmatmul.mubr.msk.f32.gmra.mrb[42].mxu1 %vm638_vm1, %v2877_v27 }
0x1144   : > { %4912 = vmatprep.mubr.msk.f32.mxu1 %vm638_vm1, %v2879_v10 }
0x1147   : > { %4913 = vmatmul.mubr.msk.f32.gmra.mrb[44].mxu1 %vm638_vm1, %v2881_v14 }
0x1148   : > { %4915 = vmatprep.mubr.msk.f32.mxu1 %vm638_vm1, %v2883_v53 }
0x114b   : > { %4916 = vmatmul.mubr.msk.f32.gmra.mrb[46].mxu1 %vm638_vm1, %v2885_v11 }
0x11cd   : > { %v6944_v57 = vpop.f32.mrb[32].mxu1 }
0x11ce   : > { %v6946_v18 = vpop.f32.mrb[33].mxu1 }
0x11d5   : > { %v6948_v8 = vpop.f32.mrb[34].mxu1 }
0x11d6   : > { %v6950_v13 = vpop.f32.mrb[35].mxu1 }
0x11dd   : > { %v6952_v26 = vpop.f32.mrb[36].mxu1 }
0x11de   : > { %v6954_v31 = vpop.f32.mrb[37].mxu1 }
0x120e   : > { %v6956_v47 = vpop.f32.mrb[38].mxu1 }
0x120f   : > { %v6958_v21 = vpop.f32.mrb[39].mxu1 }
0x1212   : > { %v4908_v62 = vpop.f32.mrb[40].mxu1 }
0x1213   : > { %v3006_v44 = vadd.f32 %v4908_v62, %v4281_v56  ;;  %v3000_v19 = vpop.f32.mrb[41].mxu1 }
0x1214   : > { %v3001_v5 = vadd.f32 %v4280_v37, %v3000_v19 }
0x1215   : > { %v3042_v58 = vsel %vm776_vm3, %v3006_v44, -inf }
0x1216   : > { %3043 = vmax.xlane.f32.xlu1 %v3042_v58  ;;  %v4911_v1 = vpop.f32.mrb[42].mxu1  ;;  %v3039_v41 = vsel %vm776_vm3, %v3001_v5, -inf }
0x1217   : > { %v3016_v34 = vadd.f32 %v4911_v1, %v4283_v28  ;;  %v3010_v16 = vpop.f32.mrb[43].mxu1  ;;  %3040 = vmax.xlane.f32.xlu0 %v3039_v41 }
0x1218   : > { %v3011_v40 = vadd.f32 %v4282_v48, %v3010_v16 }
0x1219   : > { %v3048_v36 = vsel %vm776_vm3, %v3016_v34, -inf }
0x121a   : > { %v4914_v60 = vpop.f32.mrb[44].mxu1  ;;  %v3045_v22 = vsel %vm776_vm3, %v3011_v40, -inf }
0x121b   : > { %v3026_v24 = vadd.f32 %v4914_v60, %v4285_v43  ;;  %v3020_v39 = vpop.f32.mrb[45].mxu1  ;;  %3049 = vmax.xlane.f32.xlu0 %v3048_v36 }
0x121c   : > { %v3021_v29 = vadd.f32 %v4284_v7, %v3020_v39 }
0x121d   : > { %v3054_v9 = vsel %vm776_vm3, %v3026_v24, -inf }
0x121e   : > { %3055 = vmax.xlane.f32.xlu1 %v3054_v9  ;;  %v4917_v25 = vpop.f32.mrb[46].mxu1  ;;  %v3051_v63 = vsel %vm776_vm3, %v3021_v29, -inf }
0x121f   : > { %v3036_v15 = vadd.f32 %v4917_v25, %v4287_v12  ;;  %v3030_v54 = vpop.f32.mrb[47].mxu1  ;;  %3046 = vmax.xlane.f32.xlu0 %v3045_v22 }
0x1220   : > { %v3031_v49 = vadd.f32 %v4286_v35, %v3030_v54 }
0x1221   : > { %v3060_v17 = vsel %vm776_vm3, %v3036_v15, -inf }
0x1222   : > { %3061 = vmax.xlane.f32.xlu1 %v3060_v17  ;;  %v3057_v33 = vsel %vm776_vm3, %v3031_v49, -inf }
0x1223   : > { %3052 = vmax.xlane.f32.xlu0 %v3051_v63 }
0x1227   : > { %3058 = vmax.xlane.f32.xlu0 %v3057_v33 }
0x1233   : > { %5482 = vrot.lane.b32.xlu1 %v6746_v45, %s5847_s10 }
0x123d   : > { %5477 = vrot.lane.b32.xlu0 %v6736_v30, %s5847_s10 }
0x12a3   : > { %v3044_v38 = vpop.xlane.xlu1 %3043 }
0x12a4   : > { %v3064_v27 = vsub.f32 %v3006_v44, %v3044_v38  ;;  %v3041_v10 = vpop.xlane.xlu0 %3040 }
0x12a5   : > { %v3063_v14 = vsub.f32 %v3001_v5, %v3041_v10 }
0x12a6   : > { %v3073_v53 = vmul.f32 1.442695, %v3064_v27 }
0x12a7   : > { %v3071_v11 = vmul.f32 1.442695, %v3063_v14 }
0x12a8   : > { %5656 = vpow2.f32 %v3073_v53  ;;  %v3050_v56 = vpop.xlane.xlu0 %3049 }
0x12a9   : > { %5658 = vpow2.f32 %v3071_v11  ;;  %v3066_v37 = vsub.f32 %v3016_v34, %v3050_v56 }
0x12ab   : > { %v3077_v62 = vmul.f32 1.442695, %v3066_v37  ;;  %v3056_v19 = vpop.xlane.xlu1 %3055 }
0x12ac   : > { %v3068_v28 = vsub.f32 %v3026_v24, %v3056_v19  ;;  %v3047_v58 = vpop.xlane.xlu0 %3046 }
0x12ad   : > { %5660 = vpow2.f32 %v3077_v62  ;;  %v3065_v1 = vsub.f32 %v3011_v40, %v3047_v58 }
0x12ae   : > { %v3081_v45 = vmul.f32 1.442695, %v3068_v28 }
0x12af   : > { %v3075_v41 = vmul.f32 1.442695, %v3065_v1  ;;  %v3062_v16 = vpop.xlane.xlu1 %3061 }
0x12b0   : > { %5662 = vpow2.f32 %v3081_v45  ;;  %v3070_v30 = vsub.f32 %v3036_v15, %v3062_v16  ;;  %v3053_v44 = vpop.xlane.xlu0 %3052 }
0x12b1   : > { %5664 = vpow2.f32 %v3075_v41  ;;  %v3067_v5 = vsub.f32 %v3021_v29, %v3053_v44 }
0x12b2   : > { %v6996_v48 = vpop.eup %5656  ;;  %v3085_v43 = vmul.f32 1.442695, %v3070_v30 }
0x12b3   : > { %v5659_v36 = vpop.eup %5658  ;;  %v3079_v60 = vmul.f32 1.442695, %v3067_v5  ;;  %v3090_v34 = vsel %vm776_vm3, %v6996_v48, 0.0  ;;  %v5483_v12 = vpop.permute.xlu1 %5482 }
0x12b4   : > { %5666 = vpow2.f32 %v3085_v43  ;;  %3091 = vadd.xlane.f32.xlu1 %v3090_v34  ;;  %v3059_v24 = vpop.xlane.xlu0 %3058  ;;  %v3087_v40 = vsel %vm776_vm3, %v5659_v36, 0.0  ;;  %v5485_v35 = vunpack.i.h.bf16 %v5483_v12  ;;  %v5484_v17 = vunpack.i.l.bf16 %v5483_v12  ;;  %v2448_v34 = vld [vmem:[#allocation2 + $0x30] sm:$0xff] }
0x12b5   : > { %5668 = vpow2.f32 %v3079_v60  ;;  %v3069_v39 = vsub.f32 %v3031_v49, %v3059_v24  ;;  %3088 = vadd.xlane.f32.xlu0 %v3087_v40  ;;  %v2449_v24 = vld [vmem:[#allocation2 + $0x38] sm:$0xff] }
0x12b6   : > { %v5222_v10 = vpack.c.bf16 %v5485_v35, %v5484_v17  ;;  %v5234_v12 = vpack.c.bf16 %v2449_v24, %v2448_v34 }
0x12b7   : > { %v7001_v7 = vpop.eup %5660  ;;  %v3083_v9 = vmul.f32 1.442695, %v3069_v39 }
0x12b8   : > { %v5478_v29 = vpop.permute.xlu0 %5477  ;;  %v3096_v25 = vsel %vm776_vm3, %v7001_v7, 0.0 }
0x12b9   : > { %5670 = vpow2.f32 %v3083_v9  ;;  %v5480_v22 = vunpack.i.h.bf16 %v5478_v29  ;;  %v5479_v15 = vunpack.i.l.bf16 %v5478_v29  ;;  %3097 = vadd.xlane.f32.xlu1 %v3096_v25 }
0x12ba   : > { %v7005_v54 = vpop.eup %5662 }
0x12bb   : > { %v5665_v63 = vpop.eup %5664  ;;  %v5218_v33 = vpack.c.bf16 %v5480_v22, %v5479_v15  ;;  %v3102_v49 = vsel %vm776_vm3, %v7005_v54, 0.0 }
0x12bc   : > { %v3093_v38 = vsel %vm776_vm3, %v5665_v63, 0.0 }
0x12bd   : > { %3103 = vadd.xlane.f32.xlu1 %v3102_v49  ;;  %3094 = vadd.xlane.f32.xlu0 %v3093_v38 }
0x12be   : > { %v7010_v27 = vpop.eup %5666  ;;  %5219 = vmatprep.subr.bf16.mxu0 %v5218_v33 }
0x12bf   : > { %v5669_v14 = vpop.eup %5668  ;;  %5221 = vmatpush3.bf16.msra.mxu0 %v5218_v33  ;;  %v3108_v53 = vsel %vm776_vm3, %v7010_v27, 0.0 }
0x12c0   : > { %5223 = vmatprep.subr.bf16.mxu0 %v5222_v10  ;;  %v3099_v11 = vsel %vm776_vm3, %v5669_v14, 0.0 }
0x12c1   : > { %3109 = vadd.xlane.f32.xlu1 %v3108_v53  ;;  %3100 = vadd.xlane.f32.xlu0 %v3099_v11  ;;  %v2447_v11 = vld [vmem:[#allocation2 + $0x28] sm:$0xff] }
0x12c3   : > { %v5671_v56 = vpop.eup %5670  ;;  %5225 = vmatpush3.bf16.msra.mxu0 %v5222_v10 }
0x12c4   : > { %v3105_v37 = vsel %vm776_vm3, %v5671_v56, 0.0 }
0x12c5   : > { %3106 = vadd.xlane.f32.xlu1 %v3105_v37 }
0x12d6   : > { %5492 = vrot.lane.b32.xlu1 %v6766_v23, %s5847_s10 }
0x12d7   : > { %5487 = vrot.lane.b32.xlu0 %v6756_v51, %s5847_s10 }
0x1341   : > { %v3092_v62 = vpop.xlane.xlu1 %3091 }
0x1342   : > { %v3089_v19 = vpop.xlane.xlu0 %3088 }
0x1343   : > { %5672 = vrcp.f32 %v3089_v19 }
0x1344   : > { %5674 = vrcp.f32 %v3092_v62 }
0x1346   : > { %v3098_v28 = vpop.xlane.xlu1 %3097 }
0x134a   : > { %v3104_v58 = vpop.xlane.xlu1 %3103  ;;  %v3095_v1 = vpop.xlane.xlu0 %3094 }
0x134b   : > { %5676 = vrcp.f32 %v3095_v1 }
0x134c   : > { %5678 = vrcp.f32 %v3098_v28 }
0x134d   : > { %v5673_v45 = vpop.eup %5672 }
0x134e   : > { %v3110_v41 = vpop.xlane.xlu1 %3109  ;;  %v3101_v16 = vpop.xlane.xlu0 %3100  ;;  %v3119_v30 = vmul.f32 %v5673_v45, %v5659_v36 }
0x134f   : > { %5680 = vrcp.f32 %v3101_v16  ;;  %v5675_v9 = vpop.eup %5674 }
0x1350   : > { %4934 = vmatprep.mubr.msk.f32.mxu0 %vm776_vm3, %v3119_v30  ;;  %5682 = vrcp.f32 %v3104_v58  ;;  %v3120_v25 = vmul.f32 %v5675_v9, %v6996_v48 }
0x1352   : > { %v3107_v44 = vpop.xlane.xlu1 %3106  ;;  %v5488_v5 = vpop.permute.xlu0 %5487 }
0x1353   : > { %v5490_v23 = vunpack.i.h.bf16 %v5488_v5  ;;  %v5489_v43 = vunpack.i.l.bf16 %v5488_v5  ;;  %5684 = vrcp.f32 %v3107_v44 }
0x1354   : > { %5686 = vrcp.f32 %v3110_v41 }
0x1355   : > { %v5226_v51 = vpack.c.bf16 %v5490_v23, %v5489_v43  ;;  %v5677_v29 = vpop.eup %5676 }
0x1356   : > { %v5493_v60 = vpop.permute.xlu1 %5492  ;;  %v5679_v22 = vpop.eup %5678  ;;  %v3121_v15 = vmul.f32 %v5677_v29, %v5665_v63 }
0x1357   : > { %v5495_v40 = vunpack.i.h.bf16 %v5493_v60  ;;  %v5494_v39 = vunpack.i.l.bf16 %v5493_v60  ;;  %5227 = vmatprep.subr.bf16.mxu0 %v5226_v51  ;;  %v3122_v17 = vmul.f32 %v5679_v22, %v7001_v7  ;;  %v2446_v7 = vld [vmem:[#allocation2 + $0x20] sm:$0xff] }
0x1358   : > { %5229 = vmatpush3.bf16.msra.mxu0 %v5226_v51 }
0x1359   : > { %v5230_v36 = vpack.c.bf16 %v5495_v40, %v5494_v39  ;;  %v5681_v35 = vpop.eup %5680 }
0x135a   : > { %v5683_v33 = vpop.eup %5682  ;;  %v3123_v49 = vmul.f32 %v5681_v35, %v5669_v14  ;;  %v5238_v14 = vpack.c.bf16 %v2447_v11, %v2446_v7 }
0x135b   : > { %5231 = vmatprep.subr.bf16.mxu0 %v5230_v36  ;;  %v3124_v48 = vmul.f32 %v5683_v33, %v7005_v54 }
0x135c   : > { %5233 = vmatpush3.bf16.msra.mxu0 %v5230_v36 }
0x135d   : > { %5235 = vmatprep.subr.bf16.mxu0 %v5234_v12  ;;  %v5685_v38 = vpop.eup %5684 }
0x135e   : > { %v5687_v10 = vpop.eup %5686  ;;  %v3125_v53 = vmul.f32 %v5685_v38, %v5671_v56 }
0x135f   : > { %4935 = vmatmul.mubr.msk.f32.vlgmr.msra.gmra.mrb[48].mxu0 %vm776_vm3, %v3120_v25  ;;  %v3126_v63 = vmul.f32 %v5687_v10, %v7010_v27 }
0x1360   : > { %4937 = vmatprep.mubr.msk.f32.mxu0 %vm776_vm3, %v3121_v15  ;;  %5237 = vmatpush3.bf16.msra.mxu0 %v5234_v12 }
0x1361   : > { %5239 = vmatprep.subr.bf16.mxu0 %v5238_v14 }
0x1363   : > { %4938 = vmatmul.mubr.msk.f32.gmra.mrb[50].mxu0 %vm776_vm3, %v3122_v17 }
0x1364   : > { %4940 = vmatprep.mubr.msk.f32.mxu0 %vm776_vm3, %v3123_v49 }
0x1367   : > { %4941 = vmatmul.mubr.msk.f32.gmra.mrb[52].mxu0 %vm776_vm3, %v3124_v48 }
0x1368   : > { %4943 = vmatprep.mubr.msk.f32.mxu0 %vm776_vm3, %v3125_v53 }
0x136b   : > { %4944 = vmatmul.mubr.msk.f32.gmra.mrb[54].mxu0 %vm776_vm3, %v3126_v63 }
0x1432   : > { %v4936_v37 = vpop.f32.mrb[48].mxu0 }
0x1433   : > { %v3241_v62 = vpop.f32.mrb[49].mxu0 }
0x1434   : > { %4950 = vmatprep.mubr.msk.f32.mxu0 %vm638_vm1, %v3241_v62 }
0x1435   : > { %4951 = vmatmul.mubr.msk.f32.vlgmr.msra.gmra.mrb[56].mxu0 %vm638_vm1, %v4936_v37 }
0x1436   : > { %v4939_v54 = vpop.f32.mrb[50].mxu0  ;;  %5241 = vmatpush3.bf16.msra.mxu0 %v5238_v14 }
0x1437   : > { %v3251_v56 = vpop.f32.mrb[51].mxu0 }
0x1438   : > { %4953 = vmatprep.mubr.msk.f32.mxu0 %vm638_vm1, %v3251_v56 }
0x1439   : > { %4954 = vmatmul.mubr.msk.f32.gmra.mrb[58].mxu0 %vm638_vm1, %v4939_v54 }
0x143a   : > { %v4942_v27 = vpop.f32.mrb[52].mxu0 }
0x143b   : > { %v3261_v19 = vpop.f32.mrb[53].mxu0 }
0x143c   : > { %4956 = vmatprep.mubr.msk.f32.mxu0 %vm638_vm1, %v3261_v19 }
0x143d   : > { %4957 = vmatmul.mubr.msk.f32.gmra.mrb[60].mxu0 %vm638_vm1, %v4942_v27 }
0x143e   : > { %v4945_v28 = vpop.f32.mrb[54].mxu0 }
0x143f   : > { %v3271_v58 = vpop.f32.mrb[55].mxu0 }
0x1440   : > { %4959 = vmatprep.mubr.msk.f32.mxu0 %vm638_vm1, %v3271_v58 }
0x1441   : > { %4960 = vmatmul.mubr.msk.f32.gmra.mrb[62].mxu0 %vm638_vm1, %v4945_v28 }
0x1442   : > { %4966 = vmatprep.mubr.msk.f32.mxu0 %vm638_vm1, %v6946_v18  ;;  %v7056_v18 = vld [vmem:[#allocation6 + $0x8] sm:$0xff] }
0x1445   : > { %4967 = vmatmul.mubr.msk.f32.vlgmr.msra.gmra.mrb[56].mxu0 %vm638_vm1, %v6944_v57  ;;  %v3549_v57 = vrot.slane %v7056_v18, %v1705_v32 }
0x1446   : > { %4969 = vmatprep.mubr.msk.f32.mxu0 %vm638_vm1, %v6950_v13 }
0x1449   : > { %4970 = vmatmul.mubr.msk.f32.gmra.mrb[58].mxu0 %vm638_vm1, %v6948_v8 }
0x144a   : > { %4972 = vmatprep.mubr.msk.f32.mxu0 %vm638_vm1, %v6954_v31 }
0x144d   : > { %4973 = vmatmul.mubr.msk.f32.gmra.mrb[60].mxu0 %vm638_vm1, %v6952_v26 }
0x144e   : > { %4975 = vmatprep.mubr.msk.f32.mxu0 %vm638_vm1, %v6958_v21 }
0x1451   : > { %4976 = vmatmul.mubr.msk.f32.gmra.mrb[62].mxu0 %vm638_vm1, %v6956_v47 }
0x1518   : > { %v4968_v13 = vpop.f32.mrb[56].mxu0 }
0x1519   : > { %v3539_v8 = vadd.f32 %v4968_v13, %v6608_v42  ;;  %v3499_v1 = vpop.f32.mrb[57].mxu0 }
0x151a   : > { %v3538_v31 = vadd.f32 %v3499_v1, %v6610_v20 }
0x151b   : > { %v7063_v45 = vadd.f32 %v3549_v57, %v3539_v8 }
0x151c   : > { %v7065_v26 = vadd.f32 %v3549_v57, %v3538_v31  ;;  %v4971_v21 = vpop.f32.mrb[58].mxu0 }
0x151d   : > { %v3541_v41 = vadd.f32 %v4971_v21, %v6618_v46  ;;  %v3509_v47 = vpop.f32.mrb[59].mxu0  ;;  %v3561_v16 = vsel %vm335_vm0, %v7063_v45, 0.0 }
0x151e   : > { %v3540_v30 = vadd.f32 %v3509_v47, %v6620_v59  ;;  %3562 = vadd.xlane.f32.xlu1 %v3561_v16  ;;  %v3558_v32 = vsel %vm335_vm0, %v7065_v26, 0.0 }
0x151f   : > { %v7073_v42 = vadd.f32 %v3549_v57, %v3541_v41  ;;  %3559 = vadd.xlane.f32.xlu0 %v3558_v32 }
0x1520   : > { %v4974_v20 = vpop.f32.mrb[60].mxu0  ;;  %v7078_v23 = vadd.f32 %v3549_v57, %v3540_v30 }
0x1521   : > { %v3543_v44 = vadd.f32 %v4974_v20, %v6628_v52  ;;  %v3519_v5 = vpop.f32.mrb[61].mxu0  ;;  %v3567_v46 = vsel %vm335_vm0, %v7073_v42, 0.0 }
0x1522   : > { %v3542_v43 = vadd.f32 %v3519_v5, %v6630_v2  ;;  %v3564_v39 = vsel %vm335_vm0, %v7078_v23, 0.0 }
0x1523   : > { %v7081_v51 = vadd.f32 %v3549_v57, %v3543_v44  ;;  %3568 = vadd.xlane.f32.xlu0 %v3567_v46 }
0x1524   : > { %v4977_v59 = vpop.f32.mrb[62].mxu0  ;;  %v7086_v40 = vadd.f32 %v3549_v57, %v3542_v43  ;;  %v3687_v43 = vld [vmem:[#allocation4 + $0x20] sm:$0xff] }
0x1525   : > { %v3545_v60 = vadd.f32 %v4977_v59, %v6638_v61  ;;  %v3529_v34 = vpop.f32.mrb[63].mxu0  ;;  %v3573_v24 = vsel %vm335_vm0, %v7081_v51, 0.0  ;;  %v3688_v59 = vld [vmem:[#allocation4 + $0x28] sm:$0xff] }
0x1526   : > { %v3544_v52 = vadd.f32 %v3529_v34, %v6640_v3  ;;  %3574 = vadd.xlane.f32.xlu1 %v3573_v24  ;;  %v3570_v61 = vsel %vm335_vm0, %v7086_v40, 0.0  ;;  %v3689_v34 = vld [vmem:[#allocation4 + $0x30] sm:$0xff]  ;;  %v3690_v24 = vld [vmem:[#allocation4 + $0x38] sm:$0xff] }
0x1527   : > { %v7091_v36 = vadd.f32 %v3549_v57, %v3545_v60  ;;  %3565 = vadd.xlane.f32.xlu0 %v3564_v39  ;;  %v5242_v60 = vpack.c.bf16 %v3688_v59, %v3687_v43 }
0x1528   : > { %v7095_v12 = vadd.f32 %v3549_v57, %v3544_v52  ;;  %v5246_v52 = vpack.c.bf16 %v3690_v24, %v3689_v34 }
0x1529   : > { %v3579_v2 = vsel %vm335_vm0, %v7091_v36, 0.0  ;;  %5243 = vmatprep.subr.bf16.mxu1 %v5242_v60 }
0x152a   : > { %3580 = vadd.xlane.f32.xlu1 %v3579_v2  ;;  %v3576_v3 = vsel %vm335_vm0, %v7095_v12, 0.0  ;;  %5245 = vmatpush3.bf16.msra.mxu1 %v5242_v60 }
0x152b   : > { %3571 = vadd.xlane.f32.xlu0 %v3570_v61  ;;  %5247 = vmatprep.subr.bf16.mxu1 %v5246_v52 }
0x152e   : > { %5249 = vmatpush3.bf16.msra.mxu1 %v5246_v52 }
0x152f   : > { %3577 = vadd.xlane.f32.xlu0 %v3576_v3 }
0x15ab   : > { %v3563_v9 = vpop.xlane.xlu1 %3562 }
0x15ac   : > { %v3583_v29 = vmul.f32 0.03125, %v3563_v9  ;;  %v3560_v25 = vpop.xlane.xlu0 %3559 }
0x15ad   : > { %v3582_v22 = vmul.f32 0.03125, %v3560_v25 }
0x15ae   : > { %v7102_v15 = vsub.f32 %v7063_v45, %v3583_v29 }
0x15af   : > { %v7105_v35 = vsub.f32 %v7065_v26, %v3582_v22 }
0x15b0   : > { %v3569_v17 = vpop.xlane.xlu0 %3568  ;;  %v3599_v33 = vmul.f32 %v7102_v15, %v7102_v15 }
0x15b1   : > { %v3585_v49 = vmul.f32 0.03125, %v3569_v17  ;;  %v3598_v38 = vmul.f32 %v7105_v35, %v7105_v35 }
0x15b2   : > { %v3609_v48 = vsel %vm335_vm0, %v3599_v33, 0.0 }
0x15b3   : > { %v7113_v10 = vsub.f32 %v7073_v42, %v3585_v49  ;;  %v3575_v53 = vpop.xlane.xlu1 %3574  ;;  %3610 = vadd.xlane.f32.xlu1 %v3609_v48  ;;  %v3606_v63 = vsel %vm335_vm0, %v3598_v38, 0.0 }
0x15b4   : > { %v3587_v7 = vmul.f32 0.03125, %v3575_v53  ;;  %v3566_v11 = vpop.xlane.xlu0 %3565  ;;  %3607 = vadd.xlane.f32.xlu0 %v3606_v63 }
0x15b5   : > { %v3584_v14 = vmul.f32 0.03125, %v3566_v11  ;;  %v3601_v37 = vmul.f32 %v7113_v10, %v7113_v10 }
0x15b6   : > { %v7119_v62 = vsub.f32 %v7081_v51, %v3587_v7 }
0x15b7   : > { %v7122_v54 = vsub.f32 %v7078_v23, %v3584_v14  ;;  %v3581_v56 = vpop.xlane.xlu1 %3580  ;;  %v3615_v27 = vsel %vm335_vm0, %v3601_v37, 0.0  ;;  %v3665_v14 = vrot.slane %v7056_v18, %v1821_v50 }
0x15b8   : > { %v3589_v19 = vmul.f32 0.03125, %v3581_v56  ;;  %v3572_v28 = vpop.xlane.xlu0 %3571  ;;  %3616 = vadd.xlane.f32.xlu1 %v3615_v27  ;;  %v3603_v58 = vmul.f32 %v7119_v62, %v7119_v62 }
0x15b9   : > { %v3586_v57 = vmul.f32 0.03125, %v3572_v28  ;;  %v3600_v13 = vmul.f32 %v7122_v54, %v7122_v54 }
0x15ba   : > { %v7130_v8 = vsub.f32 %v7091_v36, %v3589_v19  ;;  %v3621_v1 = vsel %vm335_vm0, %v3603_v58, 0.0 }
0x15bb   : > { %v7134_v31 = vsub.f32 %v7086_v40, %v3586_v57  ;;  %v3612_v21 = vsel %vm335_vm0, %v3600_v13, 0.0  ;;  %v3677_v13 = vrot.slane %v7056_v18, %v1833_v55 }
0x15bc   : > { %3622 = vadd.xlane.f32.xlu1 %v3621_v1  ;;  %3613 = vadd.xlane.f32.xlu0 %v3612_v21  ;;  %v3578_v41 = vpop.xlane.xlu0 %3577  ;;  %v3605_v47 = vmul.f32 %v7130_v8, %v7130_v8 }
0x15bd   : > { %v3588_v16 = vmul.f32 0.03125, %v3578_v41  ;;  %v3602_v30 = vmul.f32 %v7134_v31, %v7134_v31 }
0x15be   : > { %v3627_v32 = vsel %vm335_vm0, %v3605_v47, 0.0 }
0x15bf   : > { %v7143_v20 = vsub.f32 %v7095_v12, %v3588_v16  ;;  %v3618_v44 = vsel %vm335_vm0, %v3602_v30, 0.0 }
0x15c0   : > { %3628 = vadd.xlane.f32.xlu1 %v3627_v32  ;;  %3619 = vadd.xlane.f32.xlu0 %v3618_v44 }
0x15c1   : > { %v3604_v5 = vmul.f32 %v7143_v20, %v7143_v20 }
0x15c3   : > { %v3624_v46 = vsel %vm335_vm0, %v3604_v5, 0.0 }
0x15c4   : > { %3625 = vadd.xlane.f32.xlu0 %v3624_v46 }
0x1640   : > { %v3611_v39 = vpop.xlane.xlu1 %3610 }
0x1641   : > { %v3631_v2 = vmul.f32 0.03125, %v3611_v39  ;;  %v3608_v61 = vpop.xlane.xlu0 %3607 }
0x1642   : > { %v3630_v3 = vmul.f32 0.03125, %v3608_v61 }
0x1643   : > { %v3639_v9 = vadd.f32 1e-05, %v3631_v2 }
0x1644   : > { %v3638_v29 = vadd.f32 1e-05, %v3630_v3 }
0x1645   : > { %5688 = vrsqrt.f32 %v3639_v9  ;;  %v3617_v25 = vpop.xlane.xlu1 %3616 }
0x1646   : > { %5690 = vrsqrt.f32 %v3638_v29  ;;  %v3633_v22 = vmul.f32 0.03125, %v3617_v25 }
0x1648   : > { %v3641_v17 = vadd.f32 1e-05, %v3633_v22  ;;  %v4336_v22 = vld [vmem:[%s7256_s5 + $0x40] sm:$0xff] }
0x1649   : > { %v3623_v33 = vpop.xlane.xlu1 %3622  ;;  %v3614_v49 = vpop.xlane.xlu0 %3613 }
0x164a   : > { %5692 = vrsqrt.f32 %v3641_v17  ;;  %v3635_v38 = vmul.f32 0.03125, %v3623_v33  ;;  %v3632_v48 = vmul.f32 0.03125, %v3614_v49  ;;  %v4338_v33 = vld [vmem:[%s7256_s5 + $0x50] sm:$0xff]  ;;  %v4339_v49 = vld [vmem:[%s7256_s5 + $0x58] sm:$0xff] }
0x164c   : > { %v3643_v53 = vadd.f32 1e-05, %v3635_v38  ;;  %v3640_v63 = vadd.f32 1e-05, %v3632_v48  ;;  %v5254_v38 = vpack.c.bf16 %v4339_v49, %v4338_v33  ;;  %v4340_v48 = vld [vmem:[%s7256_s5 + $0x60] sm:$0xff] }
0x164d   : > { %v3629_v7 = vpop.xlane.xlu1 %3628  ;;  %v3620_v11 = vpop.xlane.xlu0 %3619 }
0x164e   : > { %5694 = vrsqrt.f32 %v3643_v53  ;;  %v3637_v37 = vmul.f32 0.03125, %v3629_v7  ;;  %v3634_v56 = vmul.f32 0.03125, %v3620_v11  ;;  %v4341_v53 = vld [vmem:[%s7256_s5 + $0x68] sm:$0xff]  ;;  %v4342_v7 = vld [vmem:[%s7256_s5 + $0x70] sm:$0xff]  ;;  %v4343_v11 = vld [vmem:[%s7256_s5 + $0x78] sm:$0xff] }
0x164f   : > { %v5689_v27 = vpop.eup %5688  ;;  %5696 = vrsqrt.f32 %v3640_v63  ;;  %v5258_v63 = vpack.c.bf16 %v4341_v53, %v4340_v48 }
0x1650   : > { %v5691_v19 = vpop.eup %5690  ;;  %v3655_v28 = vmul.f32 %v5689_v27, %v7102_v15  ;;  %v3645_v58 = vadd.f32 1e-05, %v3637_v37  ;;  %v3642_v57 = vadd.f32 1e-05, %v3634_v56  ;;  %v3694_v37 = vrot.slane %v7056_v18, %v1849_v0 }
0x1651   : > { %v3626_v1 = vpop.xlane.xlu0 %3625  ;;  %v3654_v21 = vmul.f32 %v5691_v19, %v7105_v35 }
0x1652   : > { %v3667_v41 = vmul.f32 %v3665_v14, %v3655_v28  ;;  %5698 = vrsqrt.f32 %v3645_v58  ;;  %v3636_v50 = vmul.f32 0.03125, %v3626_v1 }
0x1653   : > { %5700 = vrsqrt.f32 %v3642_v57  ;;  %v3666_v47 = vmul.f32 %v3665_v14, %v3654_v21 }
0x1654   : > { %v5693_v16 = vpop.eup %5692  ;;  %v3644_v30 = vadd.f32 1e-05, %v3636_v50  ;;  %v3679_v44 = vadd.f32 %v3677_v13, %v3667_v41 }
0x1655   : > { %v3678_v32 = vadd.f32 %v3677_v13, %v3666_v47  ;;  %v3657_v15 = vmul.f32 %v5693_v16, %v7113_v10 }
0x1656   : > { %5702 = vrsqrt.f32 %v3644_v30 }
0x1657   : > { %4986 = vmatprep.mubr.msk.f32.mxu1 %vm335_vm0, %v3678_v32  ;;  %v3669_v46 = vmul.f32 %v3665_v14, %v3657_v15 }
0x1658   : > { %v5695_v5 = vpop.eup %5694  ;;  %4987 = vmatmul.mubr.msk.f32.vlgmr.msra.gmra.mrb[48].mxu1 %vm335_vm0, %v3679_v44 }
0x1659   : > { %v5697_v55 = vpop.eup %5696  ;;  %v3659_v43 = vmul.f32 %v5695_v5, %v7119_v62  ;;  %v3681_v39 = vadd.f32 %v3677_v13, %v3669_v46 }
0x165a   : > { %v3656_v35 = vmul.f32 %v5697_v55, %v7122_v54 }
0x165b   : > { %v3671_v2 = vmul.f32 %v3665_v14, %v3659_v43 }
0x165c   : > { %v5699_v59 = vpop.eup %5698  ;;  %v3668_v60 = vmul.f32 %v3665_v14, %v3656_v35 }
0x165d   : > { %v5701_v34 = vpop.eup %5700  ;;  %v3661_v61 = vmul.f32 %v5699_v59, %v7130_v8  ;;  %v3683_v62 = vadd.f32 %v3677_v13, %v3671_v2 }
0x165e   : > { %v3680_v24 = vadd.f32 %v3677_v13, %v3668_v60  ;;  %v3658_v52 = vmul.f32 %v5701_v34, %v7134_v31 }
0x165f   : > { %v3673_v25 = vmul.f32 %v3665_v14, %v3661_v61 }
0x1660   : > { %v5703_v10 = vpop.eup %5702  ;;  %4989 = vmatprep.mubr.msk.f32.mxu1 %vm335_vm0, %v3680_v24  ;;  %v3670_v3 = vmul.f32 %v3665_v14, %v3658_v52 }
0x1661   : > { %4990 = vmatmul.mubr.msk.f32.gmra.mrb[50].mxu1 %vm335_vm0, %v3681_v39  ;;  %v3660_v54 = vmul.f32 %v5703_v10, %v7143_v20  ;;  %v3685_v8 = vadd.f32 %v3677_v13, %v3673_v25  ;;  %v4337_v20 = vld [vmem:[%s7256_s5 + $0x48] sm:$0xff] }
0x1662   : > { %v3682_v9 = vadd.f32 %v3677_v13, %v3670_v3  ;;  %v5250_v17 = vpack.c.bf16 %v4337_v20, %v4336_v22 }
0x1663   : > { %v3672_v29 = vmul.f32 %v3665_v14, %v3660_v54  ;;  %v5262_v14 = vpack.c.bf16 %v4343_v11, %v4342_v7 }
0x1664   : > { %4992 = vmatprep.mubr.msk.f32.mxu1 %vm335_vm0, %v3682_v9  ;;  %5251 = vmatprep.subr.bf16.mxu0 %v5250_v17 }
0x1665   : > { %4993 = vmatmul.mubr.msk.f32.gmra.mrb[52].mxu1 %vm335_vm0, %v3683_v62  ;;  %v3684_v31 = vadd.f32 %v3677_v13, %v3672_v29  ;;  %5266 = vmatprep.subr.bf16.mxu1 %v5250_v17 }
0x1666   : > { %5253 = vmatpush3.bf16.msra.mxu0 %v5250_v17  ;;  %5270 = vmatpush3.bf16.msra.mxu1 %v5250_v17 }
0x1667   : > { %4995 = vmatprep.mubr.msk.f32.mxu1 %vm335_vm0, %v3684_v31  ;;  %5255 = vmatprep.subr.bf16.mxu0 %v5254_v38 }
0x1668   : > { %5267 = vmatprep.subr.bf16.mxu1 %v5254_v38 }
0x1669   : > { %4996 = vmatmul.mubr.msk.f32.gmra.mrb[54].mxu1 %vm335_vm0, %v3685_v8 }
0x166a   : > { %5257 = vmatpush3.bf16.msra.mxu0 %v5254_v38  ;;  %5271 = vmatpush3.bf16.msra.mxu1 %v5254_v38 }
0x166b   : > { %5259 = vmatprep.subr.bf16.mxu0 %v5258_v63  ;;  %5268 = vmatprep.subr.bf16.mxu1 %v5258_v63 }
0x166e   : > { %5261 = vmatpush3.bf16.msra.mxu0 %v5258_v63  ;;  %5272 = vmatpush3.bf16.msra.mxu1 %v5258_v63 }
0x166f   : > { %5263 = vmatprep.subr.bf16.mxu0 %v5262_v14  ;;  %5269 = vmatprep.subr.bf16.mxu1 %v5262_v14 }
0x1672   : > { %5265 = vmatpush3.bf16.msra.mxu0 %v5262_v14  ;;  %5273 = vmatpush3.bf16.msra.mxu1 %v5262_v14 }
0x172b   : > { %v4988_v56 = vpop.f32.mrb[48].mxu1 }
0x172c   : > { %v3791_v27 = vadd.f32 %v4988_v56, %v3694_v37  ;;  %v3785_v19 = vpop.f32.mrb[49].mxu1 }
0x172d   : > { %v3786_v28 = vadd.f32 %v3785_v19, %v3694_v37 }
0x172e   : > { %v3833_v58 = vmul.f32 0.70710677, %v3791_v27  ;;  %v3825_v60 = vmul.f32 0.5, %v3791_v27 }
0x172f   : > { %v3832_v57 = vmul.f32 0.70710677, %v3786_v28  ;;  %v3824_v35 = vmul.f32 0.5, %v3786_v28  ;;  %v4013_v28 = vrot.slane %v7056_v18, %v2167_v4  ;;  %v5731_v4 = vld [vmem:[%s6017_s21] sm:$0xff] }
0x1730   : > { %5704 = verf.f32 %v3833_v58 }
0x1731   : > { %5706 = verf.f32 %v3832_v57 }
0x1734   : > { %v4991_v13 = vpop.f32.mrb[50].mxu1 }
0x1735   : > { %v3801_v1 = vadd.f32 %v4991_v13, %v3694_v37  ;;  %v3795_v21 = vpop.f32.mrb[51].mxu1 }
0x1736   : > { %v3796_v41 = vadd.f32 %v3795_v21, %v3694_v37 }
0x1737   : > { %v3835_v50 = vmul.f32 0.70710677, %v3801_v1  ;;  %v3827_v25 = vmul.f32 0.5, %v3801_v1 }
0x1738   : > { %v3834_v47 = vmul.f32 0.70710677, %v3796_v41  ;;  %v4994_v16 = vpop.f32.mrb[52].mxu1  ;;  %v3826_v62 = vmul.f32 0.5, %v3796_v41 }
0x1739   : > { %5708 = verf.f32 %v3835_v50  ;;  %v3811_v30 = vadd.f32 %v4994_v16, %v3694_v37  ;;  %v3805_v32 = vpop.f32.mrb[53].mxu1 }
0x173a   : > { %v5705_v44 = vpop.eup %5704  ;;  %5710 = verf.f32 %v3834_v47  ;;  %v3806_v0 = vadd.f32 %v3805_v32, %v3694_v37 }
0x173b   : > { %v5707_v15 = vpop.eup %5706  ;;  %v3849_v5 = vadd.f32 1.0, %v5705_v44  ;;  %v3837_v55 = vmul.f32 0.70710677, %v3811_v30  ;;  %v3829_v38 = vmul.f32 0.5, %v3811_v30 }
0x173c   : > { %v3848_v46 = vadd.f32 1.0, %v5707_v15  ;;  %v3836_v43 = vmul.f32 0.70710677, %v3806_v0  ;;  %v4997_v59 = vpop.f32.mrb[54].mxu1  ;;  %v3828_v33 = vmul.f32 0.5, %v3806_v0  ;;  %v5732_v0 = vld [vmem:[%s6017_s21 + $0x18] sm:$0xff] }
0x173d   : > { %5712 = verf.f32 %v3837_v55  ;;  %v3821_v34 = vadd.f32 %v4997_v59, %v3694_v37  ;;  %v3815_v24 = vpop.f32.mrb[55].mxu1  ;;  %v3857_v2 = vmul.f32 %v3849_v5, %v3825_v60  ;;  %v5734_v60 = vld [vmem:[%s6017_s21 + $0x28] sm:$0xff] }
0x173e   : > { %v3856_v52 = vmul.f32 %v3848_v46, %v3824_v35  ;;  %5714 = verf.f32 %v3836_v43  ;;  %v3816_v39 = vadd.f32 %v3815_v24, %v3694_v37  ;;  %v5733_v35 = vld [vmem:[%s6017_s21 + $0x10] sm:$0xff] }
0x173f   : > { %v3839_v61 = vmul.f32 0.70710677, %v3821_v34  ;;  %v3831_v56 = vmul.f32 0.5, %v3821_v34 }
0x1740   : > { %v3838_v10 = vmul.f32 0.70710677, %v3816_v39  ;;  %5014 = vmatprep.mubr.msk.f32.mxu0 %vm776_vm3, %v3856_v52  ;;  %v3830_v14 = vmul.f32 0.5, %v3816_v39  ;;  %v5735_v52 = vld [vmem:[%s6017_s21 + $0x20] sm:$0xff] }
0x1741   : > { %5716 = verf.f32 %v3839_v61  ;;  %5015 = vmatmul.mubr.msk.f32.vlgmr.msra.gmra.mrb[64].mxu0 %vm776_vm3, %v3857_v2 }
0x1742   : > { %5718 = verf.f32 %v3838_v10  ;;  %v5736_v10 = vld [vmem:[%s6017_s21 + $0x38] sm:$0xff] }
0x1743   : > { %v5709_v3 = vpop.eup %5708 }
0x1744   : > { %v5711_v54 = vpop.eup %5710  ;;  %v3851_v9 = vadd.f32 1.0, %v5709_v3 }
0x1745   : > { %v3850_v29 = vadd.f32 1.0, %v5711_v54  ;;  %v5737_v54 = vld [vmem:[%s6017_s21 + $0x30] sm:$0xff] }
0x1746   : > { %v3859_v20 = vmul.f32 %v3851_v9, %v3827_v25 }
0x1747   : > { %v5713_v31 = vpop.eup %5712  ;;  %v3858_v8 = vmul.f32 %v3850_v29, %v3826_v62 }
0x1748   : > { %v5715_v22 = vpop.eup %5714  ;;  %v3853_v17 = vadd.f32 1.0, %v5713_v31 }
0x1749   : > { %v3852_v49 = vadd.f32 1.0, %v5715_v22  ;;  %5017 = vmatprep.mubr.msk.f32.mxu1 %vm776_vm3, %v3858_v8 }
0x174a   : > { %5018 = vmatmul.mubr.msk.f32.vlgmr.msra.gmra.mrb[56].mxu1 %vm776_vm3, %v3859_v20  ;;  %v3861_v7 = vmul.f32 %v3853_v17, %v3829_v38 }
0x174b   : > { %v5717_v48 = vpop.eup %5716  ;;  %v3860_v53 = vmul.f32 %v3852_v49, %v3828_v33 }
0x174c   : > { %v5719_v63 = vpop.eup %5718  ;;  %v3855_v11 = vadd.f32 1.0, %v5717_v48 }
0x174d   : > { %v3854_v37 = vadd.f32 1.0, %v5719_v63  ;;  %5020 = vmatprep.mubr.msk.f32.mxu1 %vm776_vm3, %v3860_v53 }
0x174e   : > { %5021 = vmatmul.mubr.msk.f32.gmra.mrb[58].mxu1 %vm776_vm3, %v3861_v7  ;;  %v3863_v19 = vmul.f32 %v3855_v11, %v3831_v56 }
0x174f   : > { %v3862_v27 = vmul.f32 %v3854_v37, %v3830_v14 }
0x1751   : > { %5023 = vmatprep.mubr.msk.f32.mxu1 %vm776_vm3, %v3862_v27 }
0x1752   : > { %5024 = vmatmul.mubr.msk.f32.gmra.mrb[60].mxu1 %vm776_vm3, %v3863_v19 }
0x1814   : > { %v5016_v58 = vpop.f32.mrb[64].mxu0 }
0x1815   : > { %v4003_v57 = vadd.f32 %v5016_v58, %v7063_v45  ;;  %v3963_v13 = vpop.f32.mrb[65].mxu0 }
0x1816   : > { %v4002_v1 = vadd.f32 %v3963_v13, %v7065_v26 }
0x1817   : > { %v4015_v21 = vadd.f32 %v4013_v28, %v4003_v57 }
0x1818   : > { %v4014_v41 = vadd.f32 %v4013_v28, %v4002_v1 }
0x1819   : > { %v4023_v50 = vadd.f32 %v5730_v6, %v4015_v21 }
0x181a   : > { %v4022_v18 = vadd.f32 %v5731_v4, %v4014_v41 }
0x181b   : > { %4031 = vst.msk [vmem:[%s7216_s26 + $0x8] sm:$0xff] %vm335_vm0, %v4023_v50 }
0x181c   : > { %4030 = vst.msk [vmem:[%s7216_s26] sm:$0xff] %vm335_vm0, %v4022_v18 }
0x181d   : > { %v5019_v45 = vpop.f32.mrb[56].mxu1 }
0x181e   : > { %v4005_v26 = vadd.f32 %v5019_v45, %v7073_v42  ;;  %v3973_v47 = vpop.f32.mrb[57].mxu1 }
0x181f   : > { %v4004_v16 = vadd.f32 %v3973_v47, %v7078_v23 }
0x1820   : > { %v4017_v30 = vadd.f32 %v4013_v28, %v4005_v26 }
0x1821   : > { %v4016_v32 = vadd.f32 %v4013_v28, %v4004_v16  ;;  %v5022_v44 = vpop.f32.mrb[58].mxu1 }
0x1822   : > { %v4025_v15 = vadd.f32 %v5732_v0, %v4017_v30  ;;  %v4007_v5 = vadd.f32 %v5022_v44, %v7081_v51  ;;  %v3983_v55 = vpop.f32.mrb[59].mxu1 }
0x1823   : > { %v4024_v46 = vadd.f32 %v5733_v35, %v4016_v32  ;;  %v4006_v43 = vadd.f32 %v3983_v55, %v7086_v40 }
0x1824   : > { %4033 = vst.msk [vmem:[%s7216_s26 + $0x18] sm:$0xff] %vm335_vm0, %v4025_v15  ;;  %v4019_v42 = vadd.f32 %v4013_v28, %v4007_v5 }
0x1825   : > { %4032 = vst.msk [vmem:[%s7216_s26 + $0x10] sm:$0xff] %vm335_vm0, %v4024_v46  ;;  %v4018_v23 = vadd.f32 %v4013_v28, %v4006_v43  ;;  %v5025_v59 = vpop.f32.mrb[60].mxu1 }
0x1826   : > { %v4027_v51 = vadd.f32 %v5734_v60, %v4019_v42  ;;  %v4009_v34 = vadd.f32 %v5025_v59, %v7091_v36  ;;  %v3993_v24 = vpop.f32.mrb[61].mxu1 }
0x1827   : > { %v4026_v39 = vadd.f32 %v5735_v52, %v4018_v23  ;;  %v4008_v40 = vadd.f32 %v3993_v24, %v7095_v12 }
0x1828   : > { %4035 = vst.msk [vmem:[%s7216_s26 + $0x28] sm:$0xff] %vm335_vm0, %v4027_v51  ;;  %v4021_v2 = vadd.f32 %v4013_v28, %v4009_v34 }
0x1829   : > { %4034 = vst.msk [vmem:[%s7216_s26 + $0x20] sm:$0xff] %vm335_vm0, %v4026_v39  ;;  %v4020_v61 = vadd.f32 %v4013_v28, %v4008_v40 }
0x182a   : > { %v4029_v3 = vadd.f32 %v5736_v10, %v4021_v2 }
0x182b   : > { %v4028_v9 = vadd.f32 %v5737_v54, %v4020_v61 }
0x182c   : > { %4037 = vst.msk [vmem:[%s7216_s26 + $0x38] sm:$0xff] %vm335_vm0, %v4029_v3 }
0x182d   : > { %4036 = vst.msk [vmem:[%s7216_s26 + $0x30] sm:$0xff] %vm335_vm0, %v4028_v9 }
0x182e PF: > { %s19_s24 = sadd.s32 1, %s5836_s24  }
0x182f   : > { %p16_p5 = scmp.ge.s32.totalorder %s19_s24, 4  }
0x1831   :  { %18 = sbr.rel (!%p16_p5) target bundleno = 2 (0x2), region = 99 }
0x1838   :  { %4060 = vsyncpa [#allocation3], 1 }
0x1839   :  { %4062 = vsyncpa [#allocation3 + $0x1], 1 }
0x183a   :  { %4063 = vsyncpa [#allocation5], 1 }

</bundles_post_ra>
